<compile_context>
chip_gen: v7x
topology: tpu7x:2x2x1
jax: 0.10.0
libtpu: 0.0.40
codegen_flags: <defaults>
</compile_context>

<pallas_src>
import functools

import numpy as np
import jax
import jax.numpy as jnp
from jax.experimental import pallas as pl
from jax.experimental.pallas import tpu as pltpu

MXU_DTYPE = jnp.bfloat16              # MXU operand dtype; accumulation is f32
LN_EPS = 1e-6
RMS_EPS = 1e-5


def _default_vmem_limit():
    # ~3/4 of physical VMEM leaves headroom for Mosaic internal scratch:
    # 128 MiB parts (v5e/v6e) -> 96 MiB, v7x (64 MiB) -> 48 MiB.
    try:
        cap = pltpu.get_tpu_info().vmem_capacity_bytes
        return int(min(100 * 1024 * 1024, cap * 3 // 4))
    except Exception:
        return 48 * 1024 * 1024


VMEM_LIMIT_BYTES = _default_vmem_limit()


def _compiler_params(dimension_semantics):
    return pltpu.CompilerParams(dimension_semantics=dimension_semantics,
                                vmem_limit_bytes=VMEM_LIMIT_BYTES)


def _fit(n, pref):
    """Largest legal tile <= pref dividing n; full dim as fallback (always legal)."""
    if n <= pref:
        return n
    if n % pref == 0:
        return pref
    t = (pref // 128) * 128
    while t >= 128:
        if n % t == 0:
            return t
        t -= 128
    return n


# --------------------- tiled linear (+bias, optional SiLU-in) ---------------------

def _linear_kernel(x_ref, w_ref, b_ref, o_ref, acc_ref, *, silu_in):
    @pl.when(pl.program_id(2) == 0)
    def _():
        acc_ref[...] = jnp.zeros_like(acc_ref)

    x = x_ref[...]
    if silu_in:                                   # fused SiLU on input tile (adaLN)
        xf = x.astype(jnp.float32)
        x = (xf * jax.nn.sigmoid(xf)).astype(x_ref.dtype)
    acc_ref[...] += jnp.dot(x, w_ref[...], preferred_element_type=jnp.float32)

    @pl.when(pl.program_id(2) == pl.num_programs(2) - 1)
    def _():
        o_ref[...] = (acc_ref[...] + b_ref[...]).astype(o_ref.dtype)


def pallas_linear(x, w, b=None, *, silu_in=False, out_dtype=None,
                  tm=512, tn=1024, tk=512):
    M, K = x.shape
    N = w.shape[1]
    out_dtype = out_dtype or x.dtype
    xc = x.astype(MXU_DTYPE)
    wc = w.astype(MXU_DTYPE)
    b2 = (jnp.zeros((N,), jnp.float32) if b is None
          else b.astype(jnp.float32)).reshape(1, N)
    tm, tn, tk = _fit(M, tm), _fit(N, tn), _fit(K, tk)
    return pl.pallas_call(
        functools.partial(_linear_kernel, silu_in=silu_in),
        out_shape=jax.ShapeDtypeStruct((M, N), out_dtype),
        grid=(M // tm, N // tn, K // tk),
        in_specs=[pl.BlockSpec((tm, tk), lambda i, j, k: (i, k)),
                  pl.BlockSpec((tk, tn), lambda i, j, k: (k, j)),
                  pl.BlockSpec((1, tn), lambda i, j, k: (0, j))],
        out_specs=pl.BlockSpec((tm, tn), lambda i, j, k: (i, j)),
        scratch_shapes=[pltpu.VMEM((tm, tn), jnp.float32)],
        compiler_params=_compiler_params(("parallel", "parallel", "arbitrary")),
    )(xc, wc, b2)


# --------- fused QKV projection + q/k RMSNorm, separate q/k/v outputs -------------

def _qkv_rms_kernel(x_ref, w_ref, b_ref, qg_ref, kg_ref,
                    q_ref, k_ref, v_ref, acc_ref, *, inner):
    kk = pl.program_id(1)

    @pl.when(kk == 0)
    def _():
        acc_ref[...] = jnp.zeros_like(acc_ref)

    acc_ref[...] += jnp.dot(x_ref[...], w_ref[...],
                            preferred_element_type=jnp.float32)

    @pl.when(kk == pl.num_programs(1) - 1)
    def _():
        r = acc_ref[...] + b_ref[...]                     # (tm, 3*inner), f32

        def rms(t, g):
            ms = jnp.mean(t * t, axis=-1, keepdims=True)
            return t * jax.lax.rsqrt(ms + RMS_EPS) * g

        # three direct slice stores (no (tm, 3*inner) concat copy in VMEM)
        q_ref[...] = rms(r[:, :inner], qg_ref[...]).astype(q_ref.dtype)
        k_ref[...] = rms(r[:, inner:2 * inner], kg_ref[...]).astype(k_ref.dtype)
        v_ref[...] = r[:, 2 * inner:].astype(v_ref.dtype)


def pallas_qkv_rms(x, wqkv, bqkv, q_gamma, k_gamma, *, inner,
                   out_dtype=None, tm=512, tk=512):
    M, K = x.shape
    N = wqkv.shape[1]                                     # 3 * inner
    out_dtype = out_dtype or x.dtype
    xc = x.astype(MXU_DTYPE)
    wc = wqkv.astype(MXU_DTYPE)
    b2 = bqkv.astype(jnp.float32).reshape(1, N)
    qg = q_gamma.astype(jnp.float32).reshape(1, inner)
    kg = k_gamma.astype(jnp.float32).reshape(1, inner)
    tm, tk = _fit(M, tm), _fit(K, tk)
    out_sds = jax.ShapeDtypeStruct((M, inner), out_dtype)
    qkv_out_spec = pl.BlockSpec((tm, inner), lambda i, k: (i, 0))
    return pl.pallas_call(
        functools.partial(_qkv_rms_kernel, inner=inner),
        out_shape=(out_sds, out_sds, out_sds),
        grid=(M // tm, K // tk),
        in_specs=[pl.BlockSpec((tm, tk), lambda i, k: (i, k)),
                  pl.BlockSpec((tk, N), lambda i, k: (k, 0)),
                  pl.BlockSpec((1, N), lambda i, k: (0, 0)),
                  pl.BlockSpec((1, inner), lambda i, k: (0, 0)),
                  pl.BlockSpec((1, inner), lambda i, k: (0, 0))],
        out_specs=(qkv_out_spec, qkv_out_spec, qkv_out_spec),
        scratch_shapes=[pltpu.VMEM((tm, N), jnp.float32)],
        compiler_params=_compiler_params(("parallel", "arbitrary")),
    )(xc, wc, b2, qg, kg)


# --------------------- LayerNorm (no affine) + adaLN modulate ---------------------

def _ln_modulate_kernel(x_ref, scale_ref, shift_ref, o_ref):
    x = x_ref[...].astype(jnp.float32)
    mean = jnp.mean(x, axis=-1, keepdims=True)
    var = jnp.mean(jnp.square(x - mean), axis=-1, keepdims=True)
    xn = (x - mean) * jax.lax.rsqrt(var + LN_EPS)
    o_ref[...] = (xn * (1.0 + scale_ref[...].astype(jnp.float32))
                  + shift_ref[...].astype(jnp.float32)).astype(o_ref.dtype)


def pallas_ln_modulate(x, scale, shift, *, out_dtype=None, ts=256):
    B, S, D = x.shape
    out_dtype = out_dtype or x.dtype
    ts = _fit(S, ts)
    return pl.pallas_call(
        _ln_modulate_kernel,
        out_shape=jax.ShapeDtypeStruct((B, S, D), out_dtype),
        grid=(B, S // ts),
        in_specs=[pl.BlockSpec((1, ts, D), lambda b, s: (b, s, 0)),
                  pl.BlockSpec((1, 1, D), lambda b, s: (b, 0, 0)),
                  pl.BlockSpec((1, 1, D), lambda b, s: (b, 0, 0))],
        out_specs=pl.BlockSpec((1, ts, D), lambda b, s: (b, s, 0)),
        compiler_params=_compiler_params(("parallel", "parallel")),
    )(x, scale, shift)


# ------------------------ flash attention (online softmax) ------------------------
# q arrives pre-scaled (1/sqrt(Dh) folded into q RMSNorm gamma) and rotated.

def _flash_attn_kernel(q_ref, k_ref, v_ref, o_ref, m_ref, l_ref, acc_ref):
    ki = pl.program_id(3)

    @pl.when(ki == 0)
    def _():
        m_ref[...] = jnp.full(m_ref.shape, -jnp.inf, jnp.float32)
        l_ref[...] = jnp.zeros(l_ref.shape, jnp.float32)
        acc_ref[...] = jnp.zeros(acc_ref.shape, jnp.float32)

    q = q_ref[0]
    k = k_ref[0]
    v = v_ref[0]
    # contract last dims directly (no explicit k.T / XLU transpose)
    s = jax.lax.dot_general(q, k, (((1,), (1,)), ((), ())),
                            preferred_element_type=jnp.float32)
    m_prev = m_ref[...]
    m_new = jnp.maximum(m_prev, jnp.max(s, axis=-1, keepdims=True))
    alpha = jnp.exp(m_prev - m_new)
    p = jnp.exp(s - m_new)
    l_ref[...] = alpha * l_ref[...] + jnp.sum(p, axis=-1, keepdims=True)
    acc_ref[...] = alpha * acc_ref[...] + jnp.dot(
        p.astype(v.dtype), v, preferred_element_type=jnp.float32)
    m_ref[...] = m_new

    @pl.when(ki == pl.num_programs(3) - 1)
    def _():
        o_ref[0] = (acc_ref[...] * pl.reciprocal(l_ref[...], approx=True)
                    ).astype(o_ref.dtype)


def pallas_flash_attention(q, k, v, *, num_heads, tq=128, tkv=256):
    # q, k, v: [B, S, H*Dh] with heads folded in the last dim (Dh = 128 in HiDream,
    # so head slices are lane-aligned).
    B, S, HD = q.shape
    H = num_heads
    Dh = HD // H
    tq, tkv = _fit(S, tq), _fit(S, tkv)
    q_spec = pl.BlockSpec((1, tq, Dh), lambda b, h, qi, ki: (b, qi, h))
    kv_spec = pl.BlockSpec((1, tkv, Dh), lambda b, h, qi, ki: (b, ki, h))
    return pl.pallas_call(
        _flash_attn_kernel,
        out_shape=jax.ShapeDtypeStruct((B, S, HD), q.dtype),
        grid=(B, H, S // tq, S // tkv),
        in_specs=[q_spec, kv_spec, kv_spec],
        out_specs=pl.BlockSpec((1, tq, Dh), lambda b, h, qi, ki: (b, qi, h)),
        scratch_shapes=[pltpu.VMEM((tq, 1), jnp.float32),
                        pltpu.VMEM((tq, 1), jnp.float32),
                        pltpu.VMEM((tq, Dh), jnp.float32)],
        compiler_params=_compiler_params(
            ("parallel", "parallel", "parallel", "arbitrary")),
    )(q.astype(MXU_DTYPE), k.astype(MXU_DTYPE), v.astype(MXU_DTYPE))


# -------------- attention output projection fused with gate + residual ------------

def _attn_out_kernel(x_ref, w_ref, b_ref, g_ref, r_ref, o_ref, acc_ref):
    kk = pl.program_id(2)

    @pl.when(kk == 0)
    def _():
        acc_ref[...] = jnp.zeros_like(acc_ref)

    acc_ref[...] += jnp.dot(x_ref[0], w_ref[...],
                            preferred_element_type=jnp.float32)

    @pl.when(kk == pl.num_programs(2) - 1)
    def _():
        o_ref[0] = (g_ref[0, 0] * (acc_ref[...] + b_ref[...])
                    + r_ref[0].astype(jnp.float32)).astype(o_ref.dtype)


def pallas_attn_out_gated(x, w, b, gate, residual, *, out_dtype=jnp.float32,
                          ts=256, tk=1024):
    """out[b,s,:] = gate[b,0,:] * (x[b,s,:] @ w + b) + residual[b,s,:]."""
    B, S, K = x.shape
    N = w.shape[1]
    ts, tk = _fit(S, ts), _fit(K, tk)
    return pl.pallas_call(
        _attn_out_kernel,
        out_shape=jax.ShapeDtypeStruct((B, S, N), out_dtype),
        grid=(B, S // ts, K // tk),
        in_specs=[pl.BlockSpec((1, ts, tk), lambda b, s, k: (b, s, k)),
                  pl.BlockSpec((tk, N), lambda b, s, k: (k, 0)),
                  pl.BlockSpec((1, N), lambda b, s, k: (0, 0)),
                  pl.BlockSpec((1, 1, N), lambda b, s, k: (b, 0, 0)),
                  pl.BlockSpec((1, ts, N), lambda b, s, k: (b, s, 0))],
        out_specs=pl.BlockSpec((1, ts, N), lambda b, s, k: (b, s, 0)),
        scratch_shapes=[pltpu.VMEM((ts, N), jnp.float32)],
        compiler_params=_compiler_params(("parallel", "parallel", "arbitrary")),
    )(x.astype(MXU_DTYPE), w.astype(MXU_DTYPE),
      b.astype(jnp.float32).reshape(1, N),
      gate.astype(jnp.float32), residual)


# ------------- fused (weighted) SwiGLU expert bank (routed + shared) --------------

def _moe_swiglu_kernel(x_ref, w13_ref, w2_ref, c_ref, o_ref, acc_ref, *, hc, nch):
    e = pl.program_id(1)

    @pl.when(e == 0)
    def _():
        acc_ref[...] = jnp.zeros_like(acc_ref)

    x = x_ref[...]                                             # (tm, D)
    c = c_ref[0]                                               # (tm, 1) row weights
    # static chunk loop over the hidden dim: bounds f32 temporaries in VMEM while
    # the full expert weight block is streamed only once per M tile.
    for ci in range(nch):
        w13c = w13_ref[0, :, 2 * hc * ci:2 * hc * (ci + 1)]    # (D, 2*hc)
        h = jnp.dot(x, w13c, preferred_element_type=jnp.float32)
        h1 = h[:, :hc]
        h3 = h[:, hc:]
        g = (h1 * jax.nn.sigmoid(h1)) * h3                     # SiLU(xW1) * xW3
        part = jnp.dot(g.astype(w2_ref.dtype),
                       w2_ref[0, hc * ci:hc * (ci + 1), :],
                       preferred_element_type=jnp.float32)     # (tm, D)
        acc_ref[...] += c * part

    @pl.when(e == pl.num_programs(1) - 1)
    def _():
        o_ref[...] = acc_ref[...].astype(o_ref.dtype)


def pallas_moe_swiglu(x, w1, w3, w2, combine, *, out_dtype=None,
                      tm=1024, hc_pref=1024):
    """x:[M,D]  w1/w3:[E,D,HID]  w2:[E,HID,D]  combine:[E,M] per-(expert,row) weight.

    Grid is (M tiles, experts) only: each expert's weights stream once per M tile
    (large tm => minimal weight restreaming); the hidden dim is processed fully
    per grid step, chunked inside the kernel into hc-wide pieces (w1||w3 are
    pre-interleaved per chunk so each chunk is a single MXU dot)."""
    M, D = x.shape
    E, _, HID = w1.shape
    out_dtype = out_dtype or x.dtype
    tm = _fit(M, tm)
    hc = _fit(HID, hc_pref)
    nch = HID // hc
    w13 = jnp.concatenate(
        [w1.reshape(E, D, nch, 1, hc), w3.reshape(E, D, nch, 1, hc)], axis=3
    ).reshape(E, D, 2 * HID).astype(MXU_DTYPE)
    w2c = w2.astype(MXU_DTYPE)
    xc = x.astype(MXU_DTYPE)
    comb = combine.astype(jnp.float32).reshape(E, M, 1)
    # TODO(synk): gate zero-weight experts per M tile via scalar prefetch + pl.when
    # when top_k < num_experts (dense evaluation wastes (E-top_k)/E of the FLOPs).
    return pl.pallas_call(
        functools.partial(_moe_swiglu_kernel, hc=hc, nch=nch),
        out_shape=jax.ShapeDtypeStruct((M, D), out_dtype),
        grid=(M // tm, E),
        in_specs=[pl.BlockSpec((tm, D), lambda i, e: (i, 0)),
                  pl.BlockSpec((1, D, 2 * HID), lambda i, e: (e, 0, 0)),
                  pl.BlockSpec((1, HID, D), lambda i, e: (e, 0, 0)),
                  pl.BlockSpec((1, tm, 1), lambda i, e: (e, i, 0))],
        out_specs=pl.BlockSpec((tm, D), lambda i, e: (i, 0)),
        scratch_shapes=[pltpu.VMEM((tm, D), jnp.float32)],
        compiler_params=_compiler_params(("parallel", "arbitrary")),
    )(xc, w13, w2c, comb)


# ----------------------------------- JAX glue -------------------------------------

def apply_rope(xq, xk, freqs_cis):
    # reference-path RoPE: freqs_cis [B,S,1,Dh//2,2,2]; xq/xk [B,S,H,Dh]
    B, S, H, D = xq.shape
    xq_ = xq.astype(jnp.float32).reshape(B, S, H, D // 2, 1, 2)
    xk_ = xk.astype(jnp.float32).reshape(B, S, H, D // 2, 1, 2)
    xq_out = freqs_cis[..., 0] * xq_[..., 0] + freqs_cis[..., 1] * xq_[..., 1]
    xk_out = freqs_cis[..., 0] * xk_[..., 0] + freqs_cis[..., 1] * xk_[..., 1]
    return (xq_out.reshape(B, S, H, D).astype(xq.dtype),
            xk_out.reshape(B, S, H, D).astype(xk.dtype))


def swiglu_hidden(hidden_dim, multiple_of=256):
    h = int(2 * hidden_dim / 3)
    return multiple_of * ((h + multiple_of - 1) // multiple_of)


def hidream_single_block(params, image_tokens, adaln_input, rope,
                         image_tokens_masks=None):
    B, S, dim = image_tokens.shape
    H = params["num_heads"]
    Dh = dim // H
    half = Dh // 2
    M = B * S

    # adaLN: Linear(SiLU(adaln_input)) -> 6*dim; single grid step (tiny M)
    mod = pallas_linear(adaln_input, params["ada_w"], params["ada_b"],
                        silu_in=True, out_dtype=jnp.float32,
                        tm=B, tn=6 * dim, tk=dim)
    (shift_msa, scale_msa, gate_msa,
     shift_mlp, scale_mlp, gate_mlp) = [m.reshape(B, 1, dim)
                                        for m in jnp.split(mod, 6, axis=-1)]

    # ------------------------------ attention branch ------------------------------
    norm_x = pallas_ln_modulate(image_tokens, scale_msa, shift_msa,
                                out_dtype=MXU_DTYPE)
    xf = norm_x.reshape(M, dim)

    # Per-head even/odd column permutation so RoPE becomes a rotate-half form;
    # q.k scores are invariant to a permutation shared by q and k within a head.
    perm = np.concatenate(
        [h * Dh + np.concatenate([np.arange(0, Dh, 2), np.arange(1, Dh, 2)])
         for h in range(H)])
    wqkv = jnp.concatenate([params["wq"][:, perm], params["wk"][:, perm],
                            params["wv"]], axis=1)
    bqkv = jnp.concatenate([params["bq"][perm], params["bk"][perm],
                            params["bv"]])
    # fold the 1/sqrt(Dh) attention scale into the q RMSNorm gamma
    qg = params["q_rms_w"][perm] * (1.0 / (Dh ** 0.5))
    kg = params["k_rms_w"][perm]

    q, k, v = pallas_qkv_rms(xf, wqkv, bqkv, qg, kg, inner=dim,
                             out_dtype=MXU_DTYPE)          # 3 x [M, dim]
    q = q.reshape(B, S, dim)
    k = k.reshape(B, S, dim)
    v = v.reshape(B, S, dim)

    if image_tokens_masks is not None:
        # NOTE: matches the HiDream processor (zeros K, not -inf logit masking);
        # per-token scaling commutes with the RoPE rotation below.
        k = k * image_tokens_masks.reshape(B, -1, 1).astype(k.dtype)

    # RoPE on the permuted layout: a single fused XLA elementwise pass (bf16
    # in/out, no pair-interleaved gathers, no f32 round trip).
    a = rope[..., 0, 0]                                     # [B, S, 1, half]
    b_ = rope[..., 0, 1]
    c = rope[..., 1, 0]
    d = rope[..., 1, 1]
    coef_x = jnp.concatenate([a, d], axis=-1)               # [B, S, 1, Dh]
    coef_r = jnp.concatenate([b_, c], axis=-1)

    def rope_rotate_half(t):
        tf = t.astype(jnp.float32).reshape(B, S, H, Dh)
        t_roll = jnp.concatenate([tf[..., half:], tf[..., :half]], axis=-1)
        return (coef_x * tf + coef_r * t_roll).reshape(B, S, dim).astype(t.dtype)

    q = rope_rotate_half(q)
    k = rope_rotate_half(k)

    attn = pallas_flash_attention(q, k, v, num_heads=H)      # [B, S, H*Dh]

    # output projection fused with gate_msa * (.) + residual
    x_attn = pallas_attn_out_gated(attn, params["wo"], params["bo"],
                                   gate_msa, image_tokens)   # [B, S, dim] f32

    # ------------------------- MoE SwiGLU feed-forward branch ---------------------
    norm_x2 = pallas_ln_modulate(x_attn, scale_mlp, shift_mlp,
                                 out_dtype=MXU_DTYPE)
    xf2 = norm_x2.reshape(M, dim)

    # Router: tiny (dim x E) matmul; a lane-width-4 Pallas output would be
    # pathological, so leave it to XLA.
    logits = jnp.dot(xf2.astype(jnp.float32), params["gate_w"])
    scores = jax.nn.softmax(logits, axis=-1)
    # TODO(synk): top-k routing stays in JAX; experts are evaluated densely in the
    # fused kernel, weighted by the (sparse) combine matrix.
    topk_w, topk_idx = jax.lax.top_k(scores, params["top_k"])
    E = params["num_experts"]
    combine = jnp.sum(jax.nn.one_hot(topk_idx, E, dtype=jnp.float32)
                      * topk_w[..., None].astype(jnp.float32), axis=1)   # [M, E]

    # Fold the shared expert in as an extra always-on expert (zero-padded to the
    # routed hidden size) so routed + shared is a single fused kernel.
    HIDR = params["exp_w1"].shape[-1]
    HIDS = params["sh_w1"].shape[-1]
    assert HIDS <= HIDR
    pad = HIDR - HIDS
    w1_all = jnp.concatenate(
        [params["exp_w1"], jnp.pad(params["sh_w1"], ((0, 0), (0, pad)))[None]], 0)
    w3_all = jnp.concatenate(
        [params["exp_w3"], jnp.pad(params["sh_w3"], ((0, 0), (0, pad)))[None]], 0)
    w2_all = jnp.concatenate(
        [params["exp_w2"], jnp.pad(params["sh_w2"], ((0, pad), (0, 0)))[None]], 0)
    combine_all = jnp.concatenate([combine.T, jnp.ones((1, M), jnp.float32)], 0)

    ff = pallas_moe_swiglu(xf2, w1_all, w3_all, w2_all, combine_all,
                           out_dtype=jnp.float32).reshape(B, S, dim)

    return gate_mlp * ff + x_attn


# ------------------------------ pure-JAX reference --------------------------------

def reference_block(params, image_tokens, adaln_input, rope,
                    image_tokens_masks=None):
    B, S, dim = image_tokens.shape
    H = params["num_heads"]
    Dh = dim // H

    xs = adaln_input * jax.nn.sigmoid(adaln_input)
    mod = xs @ params["ada_w"] + params["ada_b"]
    (shift_msa, scale_msa, gate_msa,
     shift_mlp, scale_mlp, gate_mlp) = [m.reshape(B, 1, dim)
                                        for m in jnp.split(mod, 6, axis=-1)]

    def ln(x):
        mu = jnp.mean(x, -1, keepdims=True)
        var = jnp.mean((x - mu) ** 2, -1, keepdims=True)
        return (x - mu) * jax.lax.rsqrt(var + LN_EPS)

    def rms(x, w):
        return x * jax.lax.rsqrt(jnp.mean(x * x, -1, keepdims=True) + RMS_EPS) * w

    nx = ln(image_tokens) * (1 + scale_msa) + shift_msa
    xf = nx.reshape(B * S, dim)
    q = rms(xf @ params["wq"] + params["bq"], params["q_rms_w"])
    k = rms(xf @ params["wk"] + params["bk"], params["k_rms_w"])
    v = xf @ params["wv"] + params["bv"]
    q = q.reshape(B, S, H, Dh)
    k = k.reshape(B, S, H, Dh)
    v = v.reshape(B, S, H, Dh)
    if image_tokens_masks is not None:
        k = k * image_tokens_masks.reshape(B, -1, 1, 1)
    q, k = apply_rope(q, k, rope)
    q = q.transpose(0, 2, 1, 3)
    k = k.transpose(0, 2, 1, 3)
    v = v.transpose(0, 2, 1, 3)
    s = jnp.einsum("bhqd,bhkd->bhqk", q, k) / jnp.sqrt(jnp.float32(Dh))
    p = jax.nn.softmax(s, axis=-1)
    a = jnp.einsum("bhqk,bhkd->bhqd", p, v)
    a = a.transpose(0, 2, 1, 3).reshape(B * S, dim)
    attn_out = (a @ params["wo"] + params["bo"]).reshape(B, S, dim)
    x = gate_msa * attn_out + image_tokens

    nx2 = ln(x) * (1 + scale_mlp) + shift_mlp
    xf2 = nx2.reshape(B * S, dim)
    logits = xf2 @ params["gate_w"]
    scores = jax.nn.softmax(logits, -1)
    topk_w, topk_idx = jax.lax.top_k(scores, params["top_k"])
    E = params["num_experts"]
    combine = jnp.sum(jax.nn.one_hot(topk_idx, E, dtype=xf2.dtype)
                      * topk_w[..., None], axis=1)

    def swiglu(xx, w1, w3, w2):
        h1 = xx @ w1
        h3 = xx @ w3
        return ((h1 * jax.nn.sigmoid(h1)) * h3) @ w2

    routed = sum(combine[:, e:e + 1] * swiglu(xf2, params["exp_w1"][e],
                                              params["exp_w3"][e],
                                              params["exp_w2"][e])
                 for e in range(E))
    shared = swiglu(xf2, params["sh_w1"], params["sh_w3"], params["sh_w2"])
    ff_out = (routed + shared).reshape(B, S, dim)
    return gate_mlp * ff_out + x


# --------------------------------- param init -------------------------------------

def init_params(key, dim, heads, head_dim, num_routed_experts=4,
                num_activated_experts=2):
    inner = heads * head_dim
    assert inner == dim, "HiDream uses dim == heads * head_dim"
    hid_routed = swiglu_hidden(4 * dim)
    hid_shared = swiglu_hidden((4 * dim) // 2)

    ks = iter(jax.random.split(key, 40))

    def w(shape, scale=0.02):
        return (scale * jax.random.normal(next(ks), shape)).astype(jnp.float32)

    # NOTE: original module zero-inits adaLN weight/bias (identity at init);
    # random init here so the whole path is exercised numerically.
    params = {
        "num_heads": heads,
        "num_experts": num_routed_experts,
        "top_k": num_activated_experts,
        "ada_w": w((dim, 6 * dim)),
        "ada_b": w((6 * dim,)),
        "wq": w((dim, inner)), "bq": w((inner,)),
        "wk": w((dim, inner)), "bk": w((inner,)),
        "wv": w((dim, inner)), "bv": w((inner,)),
        "wo": w((inner, dim)), "bo": w((dim,)),
        "q_rms_w": (1.0 + w((inner,), 0.1)),
        "k_rms_w": (1.0 + w((inner,), 0.1)),
        "gate_w": w((dim, num_routed_experts), 0.5),
        "exp_w1": w((num_routed_experts, dim, hid_routed)),
        "exp_w3": w((num_routed_experts, dim, hid_routed)),
        "exp_w2": w((num_routed_experts, hid_routed, dim)),
        "sh_w1": w((dim, hid_shared)),
        "sh_w3": w((dim, hid_shared)),
        "sh_w2": w((hid_shared, dim)),
    }
    return params


def make_rope(B, S, head_dim):
    half = head_dim // 2
    angles = 0.1 * jnp.arange(S, dtype=jnp.float32)[:, None] * (
        jnp.arange(half, dtype=jnp.float32)[None, :] + 1.0)            # [S, half]
    cos, sin = jnp.cos(angles), jnp.sin(angles)
    rot = jnp.stack([jnp.stack([cos, -sin], -1),
                     jnp.stack([sin, cos], -1)], -2)                   # [S, half, 2, 2]
    return jnp.broadcast_to(rot[None, :, None], (B, S, 1, half, 2, 2)).astype(
        jnp.float32)


# ------------------------------------- main ----------------------------------------

if __name__ == "__main__":
    # Shapes chosen so every tiled BlockSpec is (8,128)-aligned: head_dim=128
    # (HiDream's real head size), S a multiple of the q/kv tiles.
    B, S = 8, 256
    heads, head_dim = 4, 128
    dim = heads * head_dim                                   # 512

    key = jax.random.PRNGKey(0)
    kp, kx, ka = jax.random.split(key, 3)
    # num_activated_experts == num_routed_experts in the test config so the
    # bf16-vs-f32 comparison is not confounded by top-k tie flips on near-equal
    # routing scores; the kernel path is identical for any top_k.
    params = init_params(kp, dim, heads, head_dim,
                         num_routed_experts=4, num_activated_experts=4)
    image_tokens = jax.random.normal(kx, (B, S, dim), jnp.float32)
    adaln_input = jax.random.normal(ka, (B, dim), jnp.float32)
    rope = make_rope(B, S, head_dim)

    out = hidream_single_block(params, image_tokens, adaln_input, rope,
                               image_tokens_masks=None)
    out = jax.block_until_ready(out)

    ref = reference_block(params, image_tokens, adaln_input, rope,
                          image_tokens_masks=None)
    ref = jax.block_until_ready(ref)

    assert out.shape == image_tokens.shape
    if not bool(jnp.allclose(out.astype(jnp.float32), ref, atol=2e-2, rtol=2e-2)):
        raise AssertionError(
            "mismatch vs reference, max abs err = "
            f"{float(jnp.max(jnp.abs(out.astype(jnp.float32) - ref)))}")
    print("KERNEL_OK")
</pallas_src>

<mosaic_0001>
module attributes {stable_mosaic.version = 11 : i64} {
  func.func @_linear_kernel(%arg0: i32, %arg1: i32, %arg2: i32, %arg3: memref<8x512xbf16, #tpu.memory_space<vmem>>, %arg4: memref<512x3072xbf16, #tpu.memory_space<vmem>>, %arg5: memref<1x3072xf32, #tpu.memory_space<vmem>>, %arg6: memref<8x3072xf32, #tpu.memory_space<vmem>>, %arg7: memref<8x3072xf32, #tpu.memory_space<vmem>>) attributes {dimension_semantics = [#tpu.dimension_semantics<parallel>, #tpu.dimension_semantics<parallel>, #tpu.dimension_semantics<arbitrary>], iteration_bounds = array<i64: 1, 1, 1>, scalar_prefetch = 0 : i64, scratch_operands = 1 : i64, tpu.core_type = #tpu.core_type<tc>, window_params = [{transform_indices = @transform_0, window_bounds = array<i64: 8, 512>}, {transform_indices = @transform_1, window_bounds = array<i64: 512, 3072>}, {transform_indices = @transform_2, window_bounds = array<i64: 1, 3072>}, {transform_indices = @transform_3, window_bounds = array<i64: 8, 3072>}]} {
    %c0_i32 = arith.constant 0 : i32
    %0 = arith.cmpi eq, %arg2, %c0_i32 : i32
    %1 = arith.extui %0 : i1 to i32
    %c0_i32_0 = arith.constant 0 : i32
    %2 = arith.cmpi ne, %1, %c0_i32_0 : i32
    scf.if %2 {
      %cst_11 = arith.constant 0.000000e+00 : f32
      %20 = vector.broadcast %cst_11 : f32 to vector<8x3072xf32>
      %c0_12 = arith.constant 0 : index
      %c0_13 = arith.constant 0 : index
      %21 = vector.load %arg7[%c0_12, %c0_13] : memref<8x3072xf32, #tpu.memory_space<vmem>>, vector<8x3072xf32>
      tpu.vector_store %arg7[%c0_12, %c0_13], %20 {strides = array<i32>} : memref<8x3072xf32, #tpu.memory_space<vmem>>, vector<8x3072xf32>,
    } else {
    }
    %c0 = arith.constant 0 : index
    %c0_1 = arith.constant 0 : index
    %3 = vector.load %arg3[%c0, %c0_1] : memref<8x512xbf16, #tpu.memory_space<vmem>>, vector<8x512xbf16>
    %4 = arith.extf %3 : vector<8x512xbf16> to vector<8x512xf32>
    %5 = arith.negf %4 : vector<8x512xf32>
    %6 = math.exp %5 : vector<8x512xf32>
    %cst = arith.constant 1.000000e+00 : f32
    %7 = vector.broadcast %cst : f32 to vector<8x512xf32>
    %8 = arith.addf %7, %6 : vector<8x512xf32>
    %9 = arith.divf %7, %8 : vector<8x512xf32>
    %10 = arith.mulf %4, %9 : vector<8x512xf32>
    %11 = arith.truncf %10 : vector<8x512xf32> to vector<8x512xbf16>
    %c0_2 = arith.constant 0 : index
    %c0_3 = arith.constant 0 : index
    %12 = vector.load %arg7[%c0_2, %c0_3] : memref<8x3072xf32, #tpu.memory_space<vmem>>, vector<8x3072xf32>
    %c0_4 = arith.constant 0 : index
    %c0_5 = arith.constant 0 : index
    %13 = vector.load %arg4[%c0_4, %c0_5] : memref<512x3072xbf16, #tpu.memory_space<vmem>>, vector<512x3072xbf16>
    %cst_6 = arith.constant dense<0.000000e+00> : vector<8x3072xf32>
    %14 = tpu.matmul %11, %13, %cst_6 {dimension_numbers = #tpu.dot_dimension_numbers<[1], [0], [0], [1], [0, 0, 1, 1], [], []>} : vector<8x512xbf16>, vector<512x3072xbf16>, vector<8x3072xf32> -> vector<8x3072xf32>
    %15 = arith.addf %12, %14 : vector<8x3072xf32>
    %c0_7 = arith.constant 0 : index
    %c0_8 = arith.constant 0 : index
    %16 = vector.load %arg7[%c0_7, %c0_8] : memref<8x3072xf32, #tpu.memory_space<vmem>>, vector<8x3072xf32>
    tpu.vector_store %arg7[%c0_7, %c0_8], %15 {strides = array<i32>} : memref<8x3072xf32, #tpu.memory_space<vmem>>, vector<8x3072xf32>,
    %c0_i32_9 = arith.constant 0 : i32
    %17 = arith.cmpi eq, %arg2, %c0_i32_9 : i32
    %18 = arith.extui %17 : i1 to i32
    %c0_i32_10 = arith.constant 0 : i32
    %19 = arith.cmpi ne, %18, %c0_i32_10 : i32
    scf.if %19 {
      %c0_11 = arith.constant 0 : index
      %c0_12 = arith.constant 0 : index
      %20 = vector.load %arg7[%c0_11, %c0_12] : memref<8x3072xf32, #tpu.memory_space<vmem>>, vector<8x3072xf32>
      %c0_13 = arith.constant 0 : index
      %c0_14 = arith.constant 0 : index
      %21 = vector.load %arg5[%c0_13, %c0_14] : memref<1x3072xf32, #tpu.memory_space<vmem>>, vector<1x3072xf32>
      %22 = vector.broadcast %21 : vector<1x3072xf32> to vector<8x3072xf32>
      %23 = arith.addf %20, %22 : vector<8x3072xf32>
      %c0_15 = arith.constant 0 : index
      %c0_16 = arith.constant 0 : index
      %24 = vector.load %arg6[%c0_15, %c0_16] : memref<8x3072xf32, #tpu.memory_space<vmem>>, vector<8x3072xf32>
      tpu.vector_store %arg6[%c0_15, %c0_16], %23 {strides = array<i32>} : memref<8x3072xf32, #tpu.memory_space<vmem>>, vector<8x3072xf32>,
    } else {
    }
    return
  }
  func.func @transform_0(%arg0: i32, %arg1: i32, %arg2: i32) -> (i32, i32) {
    %c0_i32 = arith.constant 0 : i32
    return %arg0, %arg2 : i32, i32
  }
  func.func @transform_1(%arg0: i32, %arg1: i32, %arg2: i32) -> (i32, i32) {
    %c0_i32 = arith.constant 0 : i32
    return %arg2, %arg1 : i32, i32
  }
  func.func @transform_2(%arg0: i32, %arg1: i32, %arg2: i32) -> (i32, i32) {
    %c0_i32 = arith.constant 0 : i32
    %c0_i32_0 = arith.constant 0 : i32
    return %c0_i32, %arg1 : i32, i32
  }
  func.func @transform_3(%arg0: i32, %arg1: i32, %arg2: i32) -> (i32, i32) {
    %c0_i32 = arith.constant 0 : i32
    return %arg0, %arg1 : i32, i32
  }
}

</mosaic_0001>

<bundles_post_ra>
// kernel: tpu_custom_call.1
= control target key start
LH: loop header
LB: loop body
LE: loop exit
PB: predicated region body
PF: predicated region fallthrough
CT: control target
= control target key end

     0   :  { %8 = vsyncpa [#allocation4], 0  ;;  %s7119_s0 = inlined_call_operand.hbm [shape: bf16[8,512], index: 0, kind: input, shape index: {}]   ;;  %s7120_s1 = inlined_call_operand.hbm [shape: bf16[512,3072], index: 1, kind: input, shape index: {}]   ;;  %s7121_s2 = inlined_call_operand.hbm [shape: f32[1,3072], index: 2, kind: input, shape index: {}]   ;;  %s7122_s3 = inlined_call_operand.hbm [shape: f32[8,3072], index: 3, kind: output, shape index: {}]  }
   0x1   :  { %9 = vsyncpa [#allocation7], 0 }
   0x2   :  { %10 = vsyncpa [#allocation5], 0  ;;  %s6889_s12 = smov [#allocation6]   ;;  %s6795_s16 = scalar_lea.hbm %s7120_s1, 98304 }
   0x3   :  { %s26_s13 = sshll.u32 %s6889_s12, 4  ;;  %p6796_p0 = scmp.ne.s32.totalorder %s7120_s1, %s6795_s16  ;;  %s27_s13 = int_to_ptr.vmem [resolvable:$true] %s26_s13 }
   0x4   :  { %p6799_p1 = scmp.lt.u32.totalorder %s6795_s16, %s7120_s1 }
   0x6   :  { %p6801_p2 = pnand %p6799_p1, %p6796_p0 }
   0x8   :  { %6804 = shalt.err (!%p6801_p2)
}
   0x9   :  { %s6805_s21 = scalar_lea.vmem %s27_s13, 98304  ;;  %p6810_p4 = scmp.lt.s32.totalorder %s27_s13, %s27_s13 }
   0xa   :  { %p6806_p3 = scmp.ne.s32.totalorder %s27_s13, %s6805_s21  ;;  %p6811_p5 = scmp.lt.s32.totalorder %s6805_s21, %s6805_s21 }
   0xc   :  { %p6812_p6 = por %p6811_p5, %p6810_p4 }
   0xe   :  { %p6813_p7 = pnand %p6812_p6, %p6806_p3 }
  0x10   :  { %6816 = shalt.err (!%p6813_p7)
}
  0x11   :  { %s6890_s22 = smov 1536   ;;  %s6891_s23 = smov 96  }
  0x12   :  { %32 = dma.hbm_to_vmem [thread:$0]  %s7120_s1, 98304, %s27_s13, [#allocation7], %s6890_s22, %s6890_s22, %s6891_s23  }
  0x13   :  { %s6892_s26 = smov [#allocation3]   ;;  %s6893_s28 = smov [#allocation8]  }
  0x14   :  { %s17_s27 = sshll.u32 %s6892_s26, 4  ;;  %s39_s29 = sshll.u32 %s6893_s28, 4  ;;  %s18_s27 = int_to_ptr.vmem [resolvable:$true] %s17_s27  ;;  %s40_s29 = int_to_ptr.vmem [resolvable:$true] %s39_s29 }
  0x15   :  { %s6817_s5 = scalar_lea.hbm %s7119_s0, 256 }
  0x16   :  { %p6818_p8 = scmp.ne.s32.totalorder %s7119_s0, %s6817_s5  ;;  %p6821_p9 = scmp.lt.u32.totalorder %s6817_s5, %s7119_s0 }
  0x18   :  { %p6823_p10 = pnand %p6821_p9, %p6818_p8 }
  0x1a   :  { %6826 = shalt.err (!%p6823_p10)
}
  0x1b   :  { %s6827_s1 = scalar_lea.vmem %s18_s27, 256  ;;  %p6832_p12 = scmp.lt.s32.totalorder %s18_s27, %s18_s27 }
  0x1c   :  { %p6828_p11 = scmp.ne.s32.totalorder %s18_s27, %s6827_s1  ;;  %p6833_p13 = scmp.lt.s32.totalorder %s6827_s1, %s6827_s1 }
  0x1e   :  { %p6834_p0 = por %p6833_p13, %p6832_p12 }
  0x20   :  { %p6835_p1 = pnand %p6834_p0, %p6828_p11 }
  0x22   :  { %6838 = shalt.err (!%p6835_p1)
}
  0x23   :  { %20 = dma.hbm_to_vmem [thread:$0]  %s7119_s0, 256, %s18_s27, [#allocation4]  }
  0x24   :  { %s6839_s14 = scalar_lea.hbm %s7121_s2, 384 }
  0x25   :  { %p6840_p2 = scmp.ne.s32.totalorder %s7121_s2, %s6839_s14  ;;  %p6843_p3 = scmp.lt.u32.totalorder %s6839_s14, %s7121_s2 }
  0x27   :  { %p6845_p4 = pnand %p6843_p3, %p6840_p2 }
  0x29   :  { %6848 = shalt.err (!%p6845_p4)
}
  0x2a   :  { %s6849_s19 = scalar_lea.vmem %s40_s29, 384  ;;  %p6854_p6 = scmp.lt.s32.totalorder %s40_s29, %s40_s29 }
  0x2b   :  { %p6850_p5 = scmp.ne.s32.totalorder %s40_s29, %s6849_s19  ;;  %p6855_p7 = scmp.lt.s32.totalorder %s6849_s19, %s6849_s19 }
  0x2d   :  { %p6856_p8 = por %p6855_p7, %p6854_p6 }
  0x2f   :  { %p6857_p9 = pnand %p6856_p8, %p6850_p5 }
  0x31   :  { %6860 = shalt.err (!%p6857_p9)
}
  0x32   :  { %42 = dma.hbm_to_vmem [thread:$0]  %s7121_s2, 384, %s40_s29, [#allocation7]  }
  0x33   :  { %6883 = dma.done.wait [#allocation4], 256  }
  0x34   :  { %6884 = vsyncadd [#allocation4], 4294967040 }
  0x35   :  { %6885 = dma.done.wait [#allocation7], 98688  }
  0x36   :  { %6886 = vsyncadd [#allocation7], 4294868608  ;;  %v142_v0 = vld [vmem:[#allocation6] sm:$0xff]  ;;  %v6951_v53 = vld [vmem:[#allocation3] sm:$0xff]  ;;  %s6894_s2 = smov [#allocation9]  }
  0x37   :  { %v154_v1 = vld [vmem:[#allocation6 + $0x60] sm:$0xff]  ;;  %v6953_v54 = vld [vmem:[#allocation3 + $0x8] sm:$0xff]  ;;  %v83_v58 = vunpack.c.h.bf16 %v6951_v53  ;;  %v82_v62 = vunpack.c.l.bf16 %v6951_v53  ;;  %v563_v53 = vld [vmem:[#allocation6 + $0xd28] sm:$0xff]  ;;  %s5989_s21 = sshll.u32 %s6894_s2, 4  ;;  %s5990_s21 = int_to_ptr.vmem [resolvable:$true] %s5989_s21 }
  0x38   :  { %v526_v2 = vld [vmem:[#allocation6 + $0xc00] sm:$0xff]  ;;  %v6004_v3 = vcombine.high %v142_v0, %v154_v1  ;;  %v6003_v5 = vcombine.low %v142_v0, %v154_v1  ;;  %v85_v59 = vunpack.c.h.bf16 %v6953_v54  ;;  %v84_v63 = vunpack.c.l.bf16 %v6953_v54  ;;  %s6861_s22 = scalar_lea.vmem %s5990_s21, 3072  ;;  %p6866_p11 = scmp.lt.s32.totalorder %s5990_s21, %s5990_s21 }
  0x39   :  { %v538_v4 = vld [vmem:[#allocation6 + $0xc60] sm:$0xff]  ;;  %v6000_v1 = vmul.f32 -1.442695, %v83_v58  ;;  %p6862_p10 = scmp.ne.s32.totalorder %s5990_s21, %s6861_s22  ;;  %p6867_p12 = scmp.lt.s32.totalorder %s6861_s22, %s6861_s22 }
  0x3a   :  { %v166_v6 = vld [vmem:[#allocation6 + $0xc0] sm:$0xff]  ;;  %v6388_v8 = vcombine.high %v526_v2, %v538_v4  ;;  %v6387_v9 = vcombine.low %v526_v2, %v538_v4  ;;  %4750 = vmatprep.subr.bf16.mxu0 %v6004_v3  ;;  %v6002_v2 = vmul.f32 -1.442695, %v85_v59 }
  0x3b   :  { %v178_v7 = vld [vmem:[#allocation6 + $0x120] sm:$0xff]  ;;  %4751 = vmatpush1.bf16.msra.mxu0 %v6003_v5  ;;  %v5999_v5 = vmul.f32 -1.442695, %v82_v62  ;;  %6777 = vpow2.f32 %v6000_v1  ;;  %p6868_p13 = por %p6867_p12, %p6866_p11 }
  0x3c   :  { %v6028_v10 = vcombine.high %v166_v6, %v178_v7  ;;  %v550_v11 = vld [vmem:[#allocation6 + $0xcc0] sm:$0xff]  ;;  %4791 = vmatprep.subr.bf16.mxu1 %v6388_v8  ;;  %v6027_v18 = vcombine.low %v166_v6, %v178_v7  ;;  %6779 = vpow2.f32 %v6002_v2 }
  0x3d   :  { %v562_v12 = vld [vmem:[#allocation6 + $0xd20] sm:$0xff]  ;;  %4792 = vmatpush1.bf16.msra.mxu1 %v6387_v9  ;;  %v6001_v9 = vmul.f32 -1.442695, %v84_v63  ;;  %6781 = vpow2.f32 %v5999_v5  ;;  %p6869_p0 = pnand %p6868_p13, %p6862_p10 }
  0x3e   :  { %v190_v13 = vld [vmem:[#allocation6 + $0x180] sm:$0xff]  ;;  %v6412_v14 = vcombine.high %v550_v11, %v562_v12  ;;  %4752 = vmatprep.subr.bf16.mxu0 %v6028_v10  ;;  %v6411_v19 = vcombine.low %v550_v11, %v562_v12 }
  0x3f   :  { %v202_v15 = vld [vmem:[#allocation6 + $0x1e0] sm:$0xff]  ;;  %4753 = vmatpush1.bf16.msra.mxu0 %v6027_v18  ;;  %6783 = vpow2.f32 %v6001_v9 }
  0x40   :  { %v574_v16 = vld [vmem:[#allocation6 + $0xd80] sm:$0xff]  ;;  %v6052_v20 = vcombine.high %v190_v13, %v202_v15  ;;  %4793 = vmatprep.subr.bf16.mxu1 %v6412_v14  ;;  %v6051_v26 = vcombine.low %v190_v13, %v202_v15 }
  0x41   :  { %v586_v17 = vld [vmem:[#allocation6 + $0xde0] sm:$0xff]  ;;  %4794 = vmatpush1.bf16.msra.mxu1 %v6411_v19 }
  0x42   :  { %v6436_v21 = vcombine.high %v574_v16, %v586_v17  ;;  %v214_v22 = vld [vmem:[#allocation6 + $0x240] sm:$0xff]  ;;  %4754 = vmatprep.subr.bf16.mxu0 %v6052_v20  ;;  %v6435_v27 = vcombine.low %v574_v16, %v586_v17 }
  0x43   :  { %v226_v23 = vld [vmem:[#allocation6 + $0x2a0] sm:$0xff]  ;;  %4755 = vmatpush1.bf16.msra.mxu0 %v6051_v26 }
  0x44   :  { %v598_v24 = vld [vmem:[#allocation6 + $0xe40] sm:$0xff]  ;;  %v6076_v28 = vcombine.high %v214_v22, %v226_v23  ;;  %4795 = vmatprep.subr.bf16.mxu1 %v6436_v21  ;;  %v6075_v34 = vcombine.low %v214_v22, %v226_v23 }
  0x45   :  { %v610_v25 = vld [vmem:[#allocation6 + $0xea0] sm:$0xff]  ;;  %4796 = vmatpush1.bf16.msra.mxu1 %v6435_v27 }
  0x46   :  { %v6460_v29 = vcombine.high %v598_v24, %v610_v25  ;;  %v238_v30 = vld [vmem:[#allocation6 + $0x300] sm:$0xff]  ;;  %4756 = vmatprep.subr.bf16.mxu0 %v6076_v28  ;;  %v6459_v35 = vcombine.low %v598_v24, %v610_v25  ;;  %v6778_v28 = vpop.eup %6777 }
  0x47   :  { %v250_v31 = vld [vmem:[#allocation6 + $0x360] sm:$0xff]  ;;  %4757 = vmatpush1.bf16.msra.mxu0 %v6075_v34 }
  0x48   :  { %v622_v32 = vld [vmem:[#allocation6 + $0xf00] sm:$0xff]  ;;  %v6100_v36 = vcombine.high %v238_v30, %v250_v31  ;;  %4797 = vmatprep.subr.bf16.mxu1 %v6460_v29  ;;  %v6099_v42 = vcombine.low %v238_v30, %v250_v31  ;;  %v6780_v30 = vpop.eup %6779 }
  0x49   :  { %v634_v33 = vld [vmem:[#allocation6 + $0xf60] sm:$0xff]  ;;  %4798 = vmatpush1.bf16.msra.mxu1 %v6459_v35 }
  0x4a   :  { %v6484_v37 = vcombine.high %v622_v32, %v634_v33  ;;  %v262_v38 = vld [vmem:[#allocation6 + $0x3c0] sm:$0xff]  ;;  %4758 = vmatprep.subr.bf16.mxu0 %v6100_v36  ;;  %v6483_v43 = vcombine.low %v622_v32, %v634_v33  ;;  %v99_v33 = vadd.f32 1.0, %v6778_v28  ;;  %v143_v28 = vld [vmem:[#allocation6 + $0x8] sm:$0xff] }
  0x4b   :  { %v274_v39 = vld [vmem:[#allocation6 + $0x420] sm:$0xff]  ;;  %4759 = vmatpush1.bf16.msra.mxu0 %v6099_v42 }
  0x4c   :  { %v646_v40 = vld [vmem:[#allocation6 + $0xfc0] sm:$0xff]  ;;  %v6124_v44 = vcombine.high %v262_v38, %v274_v39  ;;  %4799 = vmatprep.subr.bf16.mxu1 %v6484_v37  ;;  %v6123_v50 = vcombine.low %v262_v38, %v274_v39  ;;  %v101_v37 = vadd.f32 1.0, %v6780_v30  ;;  %v6782_v38 = vpop.eup %6781  ;;  %6785 = vrcp.f32 %v99_v33 }
  0x4d   :  { %v658_v41 = vld [vmem:[#allocation6 + $0x1020] sm:$0xff]  ;;  %4800 = vmatpush1.bf16.msra.mxu1 %v6483_v43 }
  0x4e   :  { %v6508_v45 = vcombine.high %v646_v40, %v658_v41  ;;  %v286_v46 = vld [vmem:[#allocation6 + $0x480] sm:$0xff]  ;;  %4760 = vmatprep.subr.bf16.mxu0 %v6124_v44  ;;  %v6507_v51 = vcombine.low %v646_v40, %v658_v41  ;;  %v6784_v41 = vpop.eup %6783  ;;  %6787 = vrcp.f32 %v101_v37 }
  0x4f   :  { %v298_v47 = vld [vmem:[#allocation6 + $0x4e0] sm:$0xff]  ;;  %4761 = vmatpush1.bf16.msra.mxu0 %v6123_v50 }
  0x50   :  { %v670_v48 = vld [vmem:[#allocation6 + $0x1080] sm:$0xff]  ;;  %v6148_v52 = vcombine.high %v286_v46, %v298_v47  ;;  %4801 = vmatprep.subr.bf16.mxu1 %v6508_v45  ;;  %v6147_v0 = vcombine.low %v286_v46, %v298_v47 }
  0x51   :  { %v682_v49 = vld [vmem:[#allocation6 + $0x10e0] sm:$0xff]  ;;  %4802 = vmatpush1.bf16.msra.mxu1 %v6507_v51  ;;  %v100_v51 = vadd.f32 1.0, %v6784_v41  ;;  %v551_v41 = vld [vmem:[#allocation6 + $0xcc8] sm:$0xff] }
  0x52   :  { %v6532_v55 = vcombine.high %v670_v48, %v682_v49  ;;  %v310_v56 = vld [vmem:[#allocation6 + $0x540] sm:$0xff]  ;;  %4762 = vmatprep.subr.bf16.mxu0 %v6148_v52  ;;  %v6531_v3 = vcombine.low %v670_v48, %v682_v49  ;;  %v98_v48 = vadd.f32 1.0, %v6782_v38  ;;  %v167_v38 = vld [vmem:[#allocation6 + $0xc8] sm:$0xff] }
  0x53   :  { %v322_v57 = vld [vmem:[#allocation6 + $0x5a0] sm:$0xff]  ;;  %4763 = vmatpush1.bf16.msra.mxu0 %v6147_v0 }
  0x54   :  { %v694_v60 = vld [vmem:[#allocation6 + $0x1140] sm:$0xff]  ;;  %v6172_v4 = vcombine.high %v310_v56, %v322_v57  ;;  %4803 = vmatprep.subr.bf16.mxu1 %v6532_v55  ;;  %v6171_v12 = vcombine.low %v310_v56, %v322_v57  ;;  %6789 = vrcp.f32 %v98_v48 }
  0x55   :  { %v706_v61 = vld [vmem:[#allocation6 + $0x11a0] sm:$0xff]  ;;  %4804 = vmatpush1.bf16.msra.mxu1 %v6531_v3  ;;  %6791 = vrcp.f32 %v100_v51 }
  0x56   :  { %v6556_v6 = vcombine.high %v694_v60, %v706_v61  ;;  %v334_v7 = vld [vmem:[#allocation6 + $0x600] sm:$0xff]  ;;  %4764 = vmatprep.subr.bf16.mxu0 %v6172_v4  ;;  %v6555_v13 = vcombine.low %v694_v60, %v706_v61  ;;  %v6786_v3 = vpop.eup %6785 }
  0x57   :  { %v346_v8 = vld [vmem:[#allocation6 + $0x660] sm:$0xff]  ;;  %4765 = vmatpush1.bf16.msra.mxu0 %v6171_v12 }
  0x58   :  { %v718_v10 = vld [vmem:[#allocation6 + $0x1200] sm:$0xff]  ;;  %v6196_v14 = vcombine.high %v334_v7, %v346_v8  ;;  %4805 = vmatprep.subr.bf16.mxu1 %v6556_v6  ;;  %v6195_v20 = vcombine.low %v334_v7, %v346_v8  ;;  %v6788_v6 = vpop.eup %6787 }
  0x59   :  { %v730_v11 = vld [vmem:[#allocation6 + $0x1260] sm:$0xff]  ;;  %4806 = vmatpush1.bf16.msra.mxu1 %v6555_v13  ;;  %v113_v13 = vmul.f32 %v6788_v6, %v85_v59 }
  0x5a   :  { %v6580_v15 = vcombine.high %v718_v10, %v730_v11  ;;  %v358_v16 = vld [vmem:[#allocation6 + $0x6c0] sm:$0xff]  ;;  %4766 = vmatprep.subr.bf16.mxu0 %v6196_v14  ;;  %v6579_v21 = vcombine.low %v718_v10, %v730_v11  ;;  %v111_v10 = vmul.f32 %v6786_v3, %v83_v58  ;;  %v251_v3 = vld [vmem:[#allocation6 + $0x368] sm:$0xff] }
  0x5b   :  { %v370_v17 = vld [vmem:[#allocation6 + $0x720] sm:$0xff]  ;;  %4767 = vmatpush1.bf16.msra.mxu0 %v6195_v20 }
  0x5c   :  { %v742_v18 = vld [vmem:[#allocation6 + $0x12c0] sm:$0xff]  ;;  %v6220_v22 = vcombine.high %v358_v16, %v370_v17  ;;  %4807 = vmatprep.subr.bf16.mxu1 %v6580_v15  ;;  %v6219_v29 = vcombine.low %v358_v16, %v370_v17  ;;  %v6971_v15 = vpack.c.bf16 %v111_v10, %v111_v10  ;;  %v263_v10 = vld [vmem:[#allocation6 + $0x3c8] sm:$0xff] }
  0x5d   :  { %v754_v19 = vld [vmem:[#allocation6 + $0x1320] sm:$0xff]  ;;  %4808 = vmatpush1.bf16.msra.mxu1 %v6579_v21 }
  0x5e   :  { %v6604_v23 = vcombine.high %v742_v18, %v754_v19  ;;  %v382_v24 = vld [vmem:[#allocation6 + $0x780] sm:$0xff]  ;;  %4768 = vmatprep.subr.bf16.mxu0 %v6220_v22  ;;  %v6603_v31 = vcombine.low %v742_v18, %v754_v19  ;;  %v6973_v18 = vpack.c.bf16 %v113_v13, %v113_v13  ;;  %4782 = vmatprep.mubr.bf16.mxu0 %v6971_v15  ;;  %v6790_v59 = vpop.eup %6789  ;;  %v659_v13 = vld [vmem:[#allocation6 + $0x1028] sm:$0xff] }
  0x5f   :  { %v394_v25 = vld [vmem:[#allocation6 + $0x7e0] sm:$0xff]  ;;  %4769 = vmatpush1.bf16.msra.mxu0 %v6219_v29  ;;  %v155_v29 = vld [vmem:[#allocation6 + $0x68] sm:$0xff]  ;;  %v110_v30 = vmul.f32 %v6790_v59, %v82_v62 }
  0x60   :  { %v766_v26 = vld [vmem:[#allocation6 + $0x1380] sm:$0xff]  ;;  %v6244_v32 = vcombine.high %v382_v24, %v394_v25  ;;  %4809 = vmatprep.subr.bf16.mxu1 %v6604_v23  ;;  %v6243_v42 = vcombine.low %v382_v24, %v394_v25  ;;  %4823 = vmatprep.mubr.bf16.mxu1 %v6973_v18  ;;  %v6792_v24 = vpop.eup %6791 }
  0x61   :  { %v778_v27 = vld [vmem:[#allocation6 + $0x13e0] sm:$0xff]  ;;  %4810 = vmatpush1.bf16.msra.mxu1 %v6603_v31  ;;  %v527_v31 = vld [vmem:[#allocation6 + $0xc08] sm:$0xff] }
  0x62   :  { %v6628_v34 = vcombine.high %v766_v26, %v778_v27  ;;  %v406_v35 = vld [vmem:[#allocation6 + $0x840] sm:$0xff]  ;;  %4770 = vmatprep.subr.bf16.mxu0 %v6244_v32  ;;  %v6627_v43 = vcombine.low %v766_v26, %v778_v27  ;;  %v539_v32 = vld [vmem:[#allocation6 + $0xc68] sm:$0xff] }
  0x63   :  { %v418_v36 = vld [vmem:[#allocation6 + $0x8a0] sm:$0xff]  ;;  %4771 = vmatpush1.bf16.msra.mxu0 %v6243_v42  ;;  %v6390_v37 = vcombine.high %v527_v31, %v539_v32  ;;  %v6005_v42 = vcombine.low %v143_v28, %v155_v29  ;;  %v6389_v54 = vcombine.low %v527_v31, %v539_v32 }
  0x64   :  { %v790_v39 = vld [vmem:[#allocation6 + $0x1440] sm:$0xff]  ;;  %v6268_v44 = vcombine.high %v406_v35, %v418_v36  ;;  %4811 = vmatprep.subr.bf16.mxu1 %v6628_v34  ;;  %v6267_v52 = vcombine.low %v406_v35, %v418_v36  ;;  %v112_v34 = vmul.f32 %v6792_v24, %v84_v63  ;;  %v6006_v36 = vcombine.high %v143_v28, %v155_v29  ;;  %v695_v28 = vld [vmem:[#allocation6 + $0x1148] sm:$0xff] }
  0x65   :  { %v802_v40 = vld [vmem:[#allocation6 + $0x14a0] sm:$0xff]  ;;  %4812 = vmatpush1.bf16.msra.mxu1 %v6627_v43  ;;  %v6414_v43 = vcombine.high %v551_v41, %v563_v53  ;;  %v707_v29 = vld [vmem:[#allocation6 + $0x11a8] sm:$0xff] }
  0x66   :  { %v6652_v45 = vcombine.high %v790_v39, %v802_v40  ;;  %v430_v46 = vld [vmem:[#allocation6 + $0x900] sm:$0xff]  ;;  %4772 = vmatprep.subr.bf16.mxu0 %v6268_v44  ;;  %v6651_v55 = vcombine.low %v790_v39, %v802_v40  ;;  %v179_v39 = vld [vmem:[#allocation6 + $0x128] sm:$0xff]  ;;  %v6981_v40 = vpack.c.bf16 %v110_v30, %v110_v30  ;;  %v6983_v62 = vpack.c.bf16 %v112_v34, %v112_v34 }
  0x67   :  { %v442_v47 = vld [vmem:[#allocation6 + $0x960] sm:$0xff]  ;;  %4773 = vmatpush1.bf16.msra.mxu0 %v6267_v52  ;;  %v6030_v63 = vcombine.high %v167_v38, %v179_v39  ;;  %v191_v44 = vld [vmem:[#allocation6 + $0x188] sm:$0xff]  ;;  %v6029_v48 = vcombine.low %v167_v38, %v179_v39  ;;  %v6557_v39 = vcombine.low %v695_v28, %v707_v29 }
  0x68   :  { %v814_v49 = vld [vmem:[#allocation6 + $0x1500] sm:$0xff]  ;;  %v6292_v56 = vcombine.high %v430_v46, %v442_v47  ;;  %4813 = vmatprep.subr.bf16.mxu1 %v6652_v45  ;;  %v6291_v2 = vcombine.low %v430_v46, %v442_v47  ;;  %v203_v45 = vld [vmem:[#allocation6 + $0x1e8] sm:$0xff] }
  0x69   :  { %v826_v50 = vld [vmem:[#allocation6 + $0x1560] sm:$0xff]  ;;  %4814 = vmatpush1.bf16.msra.mxu1 %v6651_v55  ;;  %v575_v46 = vld [vmem:[#allocation6 + $0xd88] sm:$0xff] }
  0x6a   :  { %v6676_v57 = vcombine.high %v814_v49, %v826_v50  ;;  %v454_v60 = vld [vmem:[#allocation6 + $0x9c0] sm:$0xff]  ;;  %4774 = vmatprep.subr.bf16.mxu0 %v6292_v56  ;;  %v6675_v4 = vcombine.low %v814_v49, %v826_v50  ;;  %v587_v47 = vld [vmem:[#allocation6 + $0xde8] sm:$0xff]  ;;  %v6413_v49 = vcombine.low %v551_v41, %v563_v53  ;;  %v6054_v50 = vcombine.high %v191_v44, %v203_v45 }
  0x6b   :  { %v466_v61 = vld [vmem:[#allocation6 + $0xa20] sm:$0xff]  ;;  %4775 = vmatpush1.bf16.msra.mxu0 %v6291_v2  ;;  %v6438_v51 = vcombine.high %v575_v46, %v587_v47  ;;  %v215_v52 = vld [vmem:[#allocation6 + $0x248] sm:$0xff] }
  0x6c   :  { %v838_v0 = vld [vmem:[#allocation6 + $0x15c0] sm:$0xff]  ;;  %v6316_v5 = vcombine.high %v454_v60, %v466_v61  ;;  %4815 = vmatprep.subr.bf16.mxu1 %v6676_v57  ;;  %v6315_v14 = vcombine.low %v454_v60, %v466_v61  ;;  %v227_v55 = vld [vmem:[#allocation6 + $0x2a8] sm:$0xff]  ;;  %v6053_v60 = vcombine.low %v191_v44, %v203_v45  ;;  %v6437_v61 = vcombine.low %v575_v46, %v587_v47 }
  0x6d   :  { %v850_v1 = vld [vmem:[#allocation6 + $0x1620] sm:$0xff]  ;;  %4816 = vmatpush1.bf16.msra.mxu1 %v6675_v4  ;;  %v599_v56 = vld [vmem:[#allocation6 + $0xe48] sm:$0xff]  ;;  %v6077_v6 = vcombine.low %v215_v52, %v227_v55 }
  0x6e   :  { %v6700_v7 = vcombine.high %v838_v0, %v850_v1  ;;  %v478_v8 = vld [vmem:[#allocation6 + $0xa80] sm:$0xff]  ;;  %4776 = vmatprep.subr.bf16.mxu0 %v6316_v5  ;;  %v6699_v16 = vcombine.low %v838_v0, %v850_v1  ;;  %v611_v57 = vld [vmem:[#allocation6 + $0xea8] sm:$0xff]  ;;  %v6078_v0 = vcombine.high %v215_v52, %v227_v55 }
  0x6f   :  { %v490_v9 = vld [vmem:[#allocation6 + $0xae0] sm:$0xff]  ;;  %4777 = vmatpush1.bf16.msra.mxu0 %v6315_v14  ;;  %v6462_v1 = vcombine.high %v599_v56, %v611_v57  ;;  %v239_v2 = vld [vmem:[#allocation6 + $0x308] sm:$0xff] }
  0x70   :  { %v862_v11 = vld [vmem:[#allocation6 + $0x1680] sm:$0xff]  ;;  %v6340_v17 = vcombine.high %v478_v8, %v490_v9  ;;  %4817 = vmatprep.subr.bf16.mxu1 %v6700_v7  ;;  %v6339_v23 = vcombine.low %v478_v8, %v490_v9  ;;  %v623_v4 = vld [vmem:[#allocation6 + $0xf08] sm:$0xff]  ;;  %v6461_v7 = vcombine.low %v599_v56, %v611_v57  ;;  %v6102_v8 = vcombine.high %v239_v2, %v251_v3 }
  0x71   :  { %v874_v12 = vld [vmem:[#allocation6 + $0x16e0] sm:$0xff]  ;;  %4818 = vmatpush1.bf16.msra.mxu1 %v6699_v16  ;;  %v635_v5 = vld [vmem:[#allocation6 + $0xf68] sm:$0xff]  ;;  %v6101_v14 = vcombine.low %v239_v2, %v251_v3 }
  0x72   :  { %v6724_v19 = vcombine.high %v862_v11, %v874_v12  ;;  %v502_v20 = vld [vmem:[#allocation6 + $0xb40] sm:$0xff]  ;;  %4778 = vmatprep.subr.bf16.mxu0 %v6340_v17  ;;  %v6723_v25 = vcombine.low %v862_v11, %v874_v12  ;;  %v6486_v9 = vcombine.high %v623_v4, %v635_v5  ;;  %v275_v11 = vld [vmem:[#allocation6 + $0x428] sm:$0xff]  ;;  %v6485_v16 = vcombine.low %v623_v4, %v635_v5 }
  0x73   :  { %v514_v21 = vld [vmem:[#allocation6 + $0xba0] sm:$0xff]  ;;  %4779 = vmatpush1.bf16.msra.mxu0 %v6339_v23  ;;  %v647_v12 = vld [vmem:[#allocation6 + $0xfc8] sm:$0xff]  ;;  %v6126_v17 = vcombine.high %v263_v10, %v275_v11  ;;  %v6125_v59 = vcombine.low %v263_v10, %v275_v11 }
  0x74   :  { %v886_v58 = vld [vmem:[#allocation6 + $0x1740] sm:$0xff]  ;;  %v6364_v26 = vcombine.high %v502_v20, %v514_v21  ;;  %4819 = vmatprep.subr.bf16.mxu1 %v6724_v19  ;;  %v6363_v33 = vcombine.low %v502_v20, %v514_v21  ;;  %v6510_v19 = vcombine.high %v647_v12, %v659_v13  ;;  %v287_v20 = vld [vmem:[#allocation6 + $0x488] sm:$0xff]  ;;  %v6509_v23 = vcombine.low %v647_v12, %v659_v13 }
  0x75   :  { %v898_v22 = vld [vmem:[#allocation6 + $0x17a0] sm:$0xff]  ;;  %4820 = vmatpush1.bf16.msra.mxu1 %v6723_v25  ;;  %v299_v21 = vld [vmem:[#allocation6 + $0x4e8] sm:$0xff] }
  0x76   :  { %v6748_v27 = vcombine.high %v886_v58, %v898_v22  ;;  %4780 = vmatprep.subr.bf16.mxu0 %v6364_v26  ;;  %v6747_v35 = vcombine.low %v886_v58, %v898_v22  ;;  %v671_v58 = vld [vmem:[#allocation6 + $0x1088] sm:$0xff]  ;;  %v6150_v24 = vcombine.high %v287_v20, %v299_v21  ;;  %v6149_v30 = vcombine.low %v287_v20, %v299_v21 }
  0x77   :  { %4781 = vmatpush1.bf16.msra.mxu0 %v6363_v33  ;;  %v683_v22 = vld [vmem:[#allocation6 + $0x10e8] sm:$0xff]  ;;  %v6558_v33 = vcombine.high %v695_v28, %v707_v29 }
  0x78   :  { %4821 = vmatprep.subr.bf16.mxu1 %v6748_v27  ;;  %4832 = vmatprep.subr.bf16.mxu0 %v6006_v36  ;;  %v6534_v25 = vcombine.high %v671_v58, %v683_v22  ;;  %v311_v26 = vld [vmem:[#allocation6 + $0x548] sm:$0xff]  ;;  %v6533_v31 = vcombine.low %v671_v58, %v683_v22 }
  0x79   :  { %4822 = vmatpush1.bf16.msra.mxu1 %v6747_v35  ;;  %v323_v27 = vld [vmem:[#allocation6 + $0x5a8] sm:$0xff] }
  0x7a   :  { %4873 = vmatprep.subr.bf16.mxu1 %v6390_v37  ;;  %4783 = vmatmul.mubr.bf16.vlgmr.msra.gmra.mrb[0].mxu0 %v6981_v40  ;;  %v6174_v32 = vcombine.high %v311_v26, %v323_v27  ;;  %v335_v34 = vld [vmem:[#allocation6 + $0x608] sm:$0xff]  ;;  %v6173_v38 = vcombine.low %v311_v26, %v323_v27 }
  0x7b   :  { %4833 = vmatpush1.bf16.msra.mxu0 %v6005_v42  ;;  %4864 = vmatprep.mubr.bf16.mxu0 %v6971_v15  ;;  %v347_v35 = vld [vmem:[#allocation6 + $0x668] sm:$0xff] }
  0x7c   :  { %4824 = vmatmul.mubr.bf16.vlgmr.msra.gmra.mrb[0].mxu1 %v6983_v62  ;;  %4834 = vmatprep.subr.bf16.mxu0 %v6030_v63  ;;  %v719_v36 = vld [vmem:[#allocation6 + $0x1208] sm:$0xff]  ;;  %v6198_v41 = vcombine.high %v335_v34, %v347_v35  ;;  %v6197_v44 = vcombine.low %v335_v34, %v347_v35 }
  0x7d   :  { %4874 = vmatpush1.bf16.msra.mxu1 %v6389_v54  ;;  %4905 = vmatprep.mubr.bf16.mxu1 %v6973_v18  ;;  %v731_v37 = vld [vmem:[#allocation6 + $0x1268] sm:$0xff] }
  0x7e   :  { %4875 = vmatprep.subr.bf16.mxu1 %v6414_v43  ;;  %v6582_v53 = vcombine.high %v719_v36, %v731_v37  ;;  %v359_v42 = vld [vmem:[#allocation6 + $0x6c8] sm:$0xff]  ;;  %v6581_v45 = vcombine.low %v719_v36, %v731_v37 }
  0x7f   :  { %4835 = vmatpush1.bf16.msra.mxu0 %v6029_v48  ;;  %v371_v54 = vld [vmem:[#allocation6 + $0x728] sm:$0xff] }
  0x80   :  { %4836 = vmatprep.subr.bf16.mxu0 %v6054_v50  ;;  %v743_v63 = vld [vmem:[#allocation6 + $0x12c8] sm:$0xff]  ;;  %v6222_v46 = vcombine.high %v359_v42, %v371_v54  ;;  %v6221_v52 = vcombine.low %v359_v42, %v371_v54 }
  0x81   :  { %4876 = vmatpush1.bf16.msra.mxu1 %v6413_v49  ;;  %v755_v43 = vld [vmem:[#allocation6 + $0x1328] sm:$0xff] }
  0x82   :  { %4877 = vmatprep.subr.bf16.mxu1 %v6438_v51  ;;  %v6606_v47 = vcombine.high %v743_v63, %v755_v43  ;;  %v383_v48 = vld [vmem:[#allocation6 + $0x788] sm:$0xff]  ;;  %v6605_v55 = vcombine.low %v743_v63, %v755_v43 }
  0x83   :  { %4837 = vmatpush1.bf16.msra.mxu0 %v6053_v60  ;;  %v395_v49 = vld [vmem:[#allocation6 + $0x7e8] sm:$0xff] }
  0x84   :  { %4838 = vmatprep.subr.bf16.mxu0 %v6078_v0  ;;  %v767_v50 = vld [vmem:[#allocation6 + $0x1388] sm:$0xff]  ;;  %v6246_v56 = vcombine.high %v383_v48, %v395_v49  ;;  %v6245_v2 = vcombine.low %v383_v48, %v395_v49 }
  0x85   :  { %4878 = vmatpush1.bf16.msra.mxu1 %v6437_v61  ;;  %v779_v51 = vld [vmem:[#allocation6 + $0x13e8] sm:$0xff] }
  0x86   :  { %4879 = vmatprep.subr.bf16.mxu1 %v6462_v1  ;;  %v6630_v57 = vcombine.high %v767_v50, %v779_v51  ;;  %v407_v60 = vld [vmem:[#allocation6 + $0x848] sm:$0xff]  ;;  %v6629_v3 = vcombine.low %v767_v50, %v779_v51 }
  0x87   :  { %4839 = vmatpush1.bf16.msra.mxu0 %v6077_v6  ;;  %v419_v61 = vld [vmem:[#allocation6 + $0x8a8] sm:$0xff] }
  0x88   :  { %4840 = vmatprep.subr.bf16.mxu0 %v6102_v8  ;;  %v791_v0 = vld [vmem:[#allocation6 + $0x1448] sm:$0xff]  ;;  %v6270_v4 = vcombine.high %v407_v60, %v419_v61  ;;  %v6269_v10 = vcombine.low %v407_v60, %v419_v61 }
  0x89   :  { %4880 = vmatpush1.bf16.msra.mxu1 %v6461_v7  ;;  %v803_v1 = vld [vmem:[#allocation6 + $0x14a8] sm:$0xff] }
  0x8a   :  { %4881 = vmatprep.subr.bf16.mxu1 %v6486_v9  ;;  %v6654_v5 = vcombine.high %v791_v0, %v803_v1  ;;  %v431_v6 = vld [vmem:[#allocation6 + $0x908] sm:$0xff]  ;;  %v6653_v11 = vcombine.low %v791_v0, %v803_v1 }
  0x8b   :  { %4841 = vmatpush1.bf16.msra.mxu0 %v6101_v14  ;;  %v443_v7 = vld [vmem:[#allocation6 + $0x968] sm:$0xff] }
  0x8c   :  { %4842 = vmatprep.subr.bf16.mxu0 %v6126_v17  ;;  %v815_v8 = vld [vmem:[#allocation6 + $0x1508] sm:$0xff]  ;;  %v6294_v12 = vcombine.high %v431_v6, %v443_v7  ;;  %v6293_v20 = vcombine.low %v431_v6, %v443_v7 }
  0x8d   :  { %4882 = vmatpush1.bf16.msra.mxu1 %v6485_v16  ;;  %v827_v9 = vld [vmem:[#allocation6 + $0x1568] sm:$0xff] }
  0x8e   :  { %4883 = vmatprep.subr.bf16.mxu1 %v6510_v19  ;;  %v6678_v13 = vcombine.high %v815_v8, %v827_v9  ;;  %v455_v14 = vld [vmem:[#allocation6 + $0x9c8] sm:$0xff]  ;;  %v6677_v21 = vcombine.low %v815_v8, %v827_v9 }
  0x8f   :  { %4843 = vmatpush1.bf16.msra.mxu0 %v6125_v59  ;;  %v467_v16 = vld [vmem:[#allocation6 + $0xa28] sm:$0xff] }
  0x90   :  { %4844 = vmatprep.subr.bf16.mxu0 %v6150_v24  ;;  %v839_v17 = vld [vmem:[#allocation6 + $0x15c8] sm:$0xff]  ;;  %v6318_v58 = vcombine.high %v455_v14, %v467_v16  ;;  %v6317_v26 = vcombine.low %v455_v14, %v467_v16 }
  0x91   :  { %4884 = vmatpush1.bf16.msra.mxu1 %v6509_v23  ;;  %v851_v19 = vld [vmem:[#allocation6 + $0x1628] sm:$0xff] }
  0x92   :  { %4885 = vmatprep.subr.bf16.mxu1 %v6534_v25  ;;  %v6702_v22 = vcombine.high %v839_v17, %v851_v19  ;;  %v479_v59 = vld [vmem:[#allocation6 + $0xa88] sm:$0xff]  ;;  %v6701_v27 = vcombine.low %v839_v17, %v851_v19 }
  0x93   :  { %4845 = vmatpush1.bf16.msra.mxu0 %v6149_v30  ;;  %v491_v23 = vld [vmem:[#allocation6 + $0xae8] sm:$0xff] }
  0x94   :  { %4846 = vmatprep.subr.bf16.mxu0 %v6174_v32  ;;  %v863_v24 = vld [vmem:[#allocation6 + $0x1688] sm:$0xff]  ;;  %v6342_v28 = vcombine.high %v479_v59, %v491_v23  ;;  %v6341_v34 = vcombine.low %v479_v59, %v491_v23 }
  0x95   :  { %4886 = vmatpush1.bf16.msra.mxu1 %v6533_v31  ;;  %v875_v25 = vld [vmem:[#allocation6 + $0x16e8] sm:$0xff] }
  0x96   :  { %4887 = vmatprep.subr.bf16.mxu1 %v6558_v33  ;;  %v6726_v29 = vcombine.high %v863_v24, %v875_v25  ;;  %v503_v30 = vld [vmem:[#allocation6 + $0xb48] sm:$0xff]  ;;  %v6725_v35 = vcombine.low %v863_v24, %v875_v25 }
  0x97   :  { %4847 = vmatpush1.bf16.msra.mxu0 %v6173_v38  ;;  %v515_v31 = vld [vmem:[#allocation6 + $0xba8] sm:$0xff]  ;;  %v144_v38 = vld [vmem:[#allocation6 + $0x10] sm:$0xff] }
  0x98   :  { %4848 = vmatprep.subr.bf16.mxu0 %v6198_v41  ;;  %v887_v32 = vld [vmem:[#allocation6 + $0x1748] sm:$0xff]  ;;  %v6366_v36 = vcombine.high %v503_v30, %v515_v31  ;;  %v528_v41 = vld [vmem:[#allocation6 + $0xc10] sm:$0xff]  ;;  %v6365_v42 = vcombine.low %v503_v30, %v515_v31 }
  0x99   :  { %4888 = vmatpush1.bf16.msra.mxu1 %v6557_v39  ;;  %v899_v33 = vld [vmem:[#allocation6 + $0x17a8] sm:$0xff]  ;;  %v156_v39 = vld [vmem:[#allocation6 + $0x70] sm:$0xff] }
  0x9a   :  { %4889 = vmatprep.subr.bf16.mxu1 %v6582_v53  ;;  %v6750_v37 = vcombine.high %v887_v32, %v899_v33  ;;  %v540_v53 = vld [vmem:[#allocation6 + $0xc70] sm:$0xff]  ;;  %v6749_v54 = vcombine.low %v887_v32, %v899_v33  ;;  %v6008_v63 = vcombine.high %v144_v38, %v156_v39  ;;  %v6007_v48 = vcombine.low %v144_v38, %v156_v39 }
  0x9b   :  { %4849 = vmatpush1.bf16.msra.mxu0 %v6197_v44  ;;  %v6392_v43 = vcombine.high %v528_v41, %v540_v53  ;;  %v168_v44 = vld [vmem:[#allocation6 + $0xd0] sm:$0xff]  ;;  %v6391_v49 = vcombine.low %v528_v41, %v540_v53 }
  0x9c   :  { %4850 = vmatprep.subr.bf16.mxu0 %v6222_v46  ;;  %v552_v46 = vld [vmem:[#allocation6 + $0xcd0] sm:$0xff] }
  0x9d   :  { %4890 = vmatpush1.bf16.msra.mxu1 %v6581_v45  ;;  %v180_v45 = vld [vmem:[#allocation6 + $0x130] sm:$0xff] }
  0x9e   :  { %4891 = vmatprep.subr.bf16.mxu1 %v6606_v47  ;;  %v564_v47 = vld [vmem:[#allocation6 + $0xd30] sm:$0xff]  ;;  %v6032_v50 = vcombine.high %v168_v44, %v180_v45  ;;  %v6031_v60 = vcombine.low %v168_v44, %v180_v45 }
  0x9f   :  { %4851 = vmatpush1.bf16.msra.mxu0 %v6221_v52  ;;  %v6416_v51 = vcombine.high %v552_v46, %v564_v47  ;;  %v192_v52 = vld [vmem:[#allocation6 + $0x190] sm:$0xff]  ;;  %v6415_v61 = vcombine.low %v552_v46, %v564_v47 }
  0xa0   :  { %4852 = vmatprep.subr.bf16.mxu0 %v6246_v56  ;;  %v576_v56 = vld [vmem:[#allocation6 + $0xd90] sm:$0xff] }
  0xa1   :  { %4892 = vmatpush1.bf16.msra.mxu1 %v6605_v55  ;;  %v204_v55 = vld [vmem:[#allocation6 + $0x1f0] sm:$0xff] }
  0xa2   :  { %4893 = vmatprep.subr.bf16.mxu1 %v6630_v57  ;;  %v588_v57 = vld [vmem:[#allocation6 + $0xdf0] sm:$0xff]  ;;  %v6056_v0 = vcombine.high %v192_v52, %v204_v55  ;;  %v6055_v6 = vcombine.low %v192_v52, %v204_v55 }
  0xa3   :  { %4853 = vmatpush1.bf16.msra.mxu0 %v6245_v2  ;;  %v6440_v1 = vcombine.high %v576_v56, %v588_v57  ;;  %v216_v2 = vld [vmem:[#allocation6 + $0x250] sm:$0xff]  ;;  %v6439_v7 = vcombine.low %v576_v56, %v588_v57 }
  0xa4   :  { %4854 = vmatprep.subr.bf16.mxu0 %v6270_v4  ;;  %v600_v4 = vld [vmem:[#allocation6 + $0xe50] sm:$0xff] }
  0xa5   :  { %4894 = vmatpush1.bf16.msra.mxu1 %v6629_v3  ;;  %v228_v3 = vld [vmem:[#allocation6 + $0x2b0] sm:$0xff] }
  0xa6   :  { %4895 = vmatprep.subr.bf16.mxu1 %v6654_v5  ;;  %v612_v5 = vld [vmem:[#allocation6 + $0xeb0] sm:$0xff]  ;;  %v6080_v8 = vcombine.high %v216_v2, %v228_v3  ;;  %v6079_v14 = vcombine.low %v216_v2, %v228_v3 }
  0xa7   :  { %4855 = vmatpush1.bf16.msra.mxu0 %v6269_v10  ;;  %v6464_v9 = vcombine.high %v600_v4, %v612_v5  ;;  %v240_v10 = vld [vmem:[#allocation6 + $0x310] sm:$0xff]  ;;  %v6463_v16 = vcombine.low %v600_v4, %v612_v5 }
  0xa8   :  { %4856 = vmatprep.subr.bf16.mxu0 %v6294_v12  ;;  %v624_v12 = vld [vmem:[#allocation6 + $0xf10] sm:$0xff] }
  0xa9   :  { %4896 = vmatpush1.bf16.msra.mxu1 %v6653_v11  ;;  %v252_v11 = vld [vmem:[#allocation6 + $0x370] sm:$0xff] }
  0xaa   :  { %4897 = vmatprep.subr.bf16.mxu1 %v6678_v13  ;;  %v636_v13 = vld [vmem:[#allocation6 + $0xf70] sm:$0xff]  ;;  %v6104_v17 = vcombine.high %v240_v10, %v252_v11  ;;  %v6103_v59 = vcombine.low %v240_v10, %v252_v11 }
  0xab   :  { %4857 = vmatpush1.bf16.msra.mxu0 %v6293_v20  ;;  %v6488_v19 = vcombine.high %v624_v12, %v636_v13  ;;  %v264_v20 = vld [vmem:[#allocation6 + $0x3d0] sm:$0xff]  ;;  %v6487_v23 = vcombine.low %v624_v12, %v636_v13 }
  0xac   :  { %4858 = vmatprep.subr.bf16.mxu0 %v6318_v58  ;;  %v648_v58 = vld [vmem:[#allocation6 + $0xfd0] sm:$0xff] }
  0xad   :  { %4898 = vmatpush1.bf16.msra.mxu1 %v6677_v21  ;;  %v276_v21 = vld [vmem:[#allocation6 + $0x430] sm:$0xff] }
  0xae   :  { %4899 = vmatprep.subr.bf16.mxu1 %v6702_v22  ;;  %v660_v22 = vld [vmem:[#allocation6 + $0x1030] sm:$0xff]  ;;  %v6128_v24 = vcombine.high %v264_v20, %v276_v21  ;;  %v6127_v30 = vcombine.low %v264_v20, %v276_v21 }
  0xaf   :  { %4859 = vmatpush1.bf16.msra.mxu0 %v6317_v26  ;;  %v6512_v25 = vcombine.high %v648_v58, %v660_v22  ;;  %v288_v26 = vld [vmem:[#allocation6 + $0x490] sm:$0xff]  ;;  %v6511_v31 = vcombine.low %v648_v58, %v660_v22 }
  0xb0   :  { %4860 = vmatprep.subr.bf16.mxu0 %v6342_v28  ;;  %v672_v28 = vld [vmem:[#allocation6 + $0x1090] sm:$0xff] }
  0xb1   :  { %4900 = vmatpush1.bf16.msra.mxu1 %v6701_v27  ;;  %v300_v27 = vld [vmem:[#allocation6 + $0x4f0] sm:$0xff] }
  0xb2   :  { %4901 = vmatprep.subr.bf16.mxu1 %v6726_v29  ;;  %v684_v29 = vld [vmem:[#allocation6 + $0x10f0] sm:$0xff]  ;;  %v6152_v32 = vcombine.high %v288_v26, %v300_v27  ;;  %v6151_v38 = vcombine.low %v288_v26, %v300_v27 }
  0xb3   :  { %4861 = vmatpush1.bf16.msra.mxu0 %v6341_v34  ;;  %v6536_v33 = vcombine.high %v672_v28, %v684_v29  ;;  %v312_v34 = vld [vmem:[#allocation6 + $0x550] sm:$0xff]  ;;  %v6535_v39 = vcombine.low %v672_v28, %v684_v29 }
  0xb4   :  { %4862 = vmatprep.subr.bf16.mxu0 %v6366_v36  ;;  %v696_v36 = vld [vmem:[#allocation6 + $0x1150] sm:$0xff] }
  0xb5   :  { %4902 = vmatpush1.bf16.msra.mxu1 %v6725_v35  ;;  %v324_v35 = vld [vmem:[#allocation6 + $0x5b0] sm:$0xff] }
  0xb6   :  { %4903 = vmatprep.subr.bf16.mxu1 %v6750_v37  ;;  %v708_v37 = vld [vmem:[#allocation6 + $0x11b0] sm:$0xff]  ;;  %v6176_v41 = vcombine.high %v312_v34, %v324_v35  ;;  %v6175_v44 = vcombine.low %v312_v34, %v324_v35 }
  0xb7   :  { %4863 = vmatpush1.bf16.msra.mxu0 %v6365_v42  ;;  %v6560_v53 = vcombine.high %v696_v36, %v708_v37  ;;  %v336_v42 = vld [vmem:[#allocation6 + $0x610] sm:$0xff]  ;;  %v6559_v45 = vcombine.low %v696_v36, %v708_v37 }
  0xb8   :  { %4914 = vmatprep.subr.bf16.mxu0 %v6008_v63  ;;  %v720_v63 = vld [vmem:[#allocation6 + $0x1210] sm:$0xff] }
  0xb9   :  { %4904 = vmatpush1.bf16.msra.mxu1 %v6749_v54  ;;  %v348_v54 = vld [vmem:[#allocation6 + $0x670] sm:$0xff] }
  0xba   :  { %4955 = vmatprep.subr.bf16.mxu1 %v6392_v43  ;;  %4865 = vmatmul.mubr.bf16.vlgmr.msra.gmra.mrb[4].mxu0 %v6981_v40  ;;  %v732_v43 = vld [vmem:[#allocation6 + $0x1270] sm:$0xff]  ;;  %v6200_v46 = vcombine.high %v336_v42, %v348_v54  ;;  %v6199_v52 = vcombine.low %v336_v42, %v348_v54 }
  0xbb   :  { %4915 = vmatpush1.bf16.msra.mxu0 %v6007_v48  ;;  %4946 = vmatprep.mubr.bf16.mxu0 %v6971_v15  ;;  %v6584_v47 = vcombine.high %v720_v63, %v732_v43  ;;  %v360_v48 = vld [vmem:[#allocation6 + $0x6d0] sm:$0xff]  ;;  %v6583_v55 = vcombine.low %v720_v63, %v732_v43 }
  0xbc   :  { %4906 = vmatmul.mubr.bf16.vlgmr.msra.gmra.mrb[4].mxu1 %v6983_v62  ;;  %4916 = vmatprep.subr.bf16.mxu0 %v6032_v50  ;;  %v744_v50 = vld [vmem:[#allocation6 + $0x12d0] sm:$0xff] }
  0xbd   :  { %4956 = vmatpush1.bf16.msra.mxu1 %v6391_v49  ;;  %4987 = vmatprep.mubr.bf16.mxu1 %v6973_v18  ;;  %v372_v49 = vld [vmem:[#allocation6 + $0x730] sm:$0xff] }
  0xbe   :  { %4957 = vmatprep.subr.bf16.mxu1 %v6416_v51  ;;  %v756_v51 = vld [vmem:[#allocation6 + $0x1330] sm:$0xff]  ;;  %v6224_v56 = vcombine.high %v360_v48, %v372_v49  ;;  %v6223_v2 = vcombine.low %v360_v48, %v372_v49 }
  0xbf   :  { %4917 = vmatpush1.bf16.msra.mxu0 %v6031_v60  ;;  %v6608_v57 = vcombine.high %v744_v50, %v756_v51  ;;  %v384_v60 = vld [vmem:[#allocation6 + $0x790] sm:$0xff]  ;;  %v6607_v3 = vcombine.low %v744_v50, %v756_v51 }
  0xc0   :  { %4918 = vmatprep.subr.bf16.mxu0 %v6056_v0  ;;  %v768_v0 = vld [vmem:[#allocation6 + $0x1390] sm:$0xff] }
  0xc1   :  { %4958 = vmatpush1.bf16.msra.mxu1 %v6415_v61  ;;  %v396_v61 = vld [vmem:[#allocation6 + $0x7f0] sm:$0xff] }
  0xc2   :  { %4959 = vmatprep.subr.bf16.mxu1 %v6440_v1  ;;  %v780_v1 = vld [vmem:[#allocation6 + $0x13f0] sm:$0xff]  ;;  %v6248_v4 = vcombine.high %v384_v60, %v396_v61  ;;  %v6247_v10 = vcombine.low %v384_v60, %v396_v61 }
  0xc3   :  { %4919 = vmatpush1.bf16.msra.mxu0 %v6055_v6  ;;  %v6632_v5 = vcombine.high %v768_v0, %v780_v1  ;;  %v408_v6 = vld [vmem:[#allocation6 + $0x850] sm:$0xff]  ;;  %v6631_v11 = vcombine.low %v768_v0, %v780_v1 }
  0xc4   :  { %4920 = vmatprep.subr.bf16.mxu0 %v6080_v8  ;;  %v792_v8 = vld [vmem:[#allocation6 + $0x1450] sm:$0xff] }
  0xc5   :  { %4960 = vmatpush1.bf16.msra.mxu1 %v6439_v7  ;;  %v420_v7 = vld [vmem:[#allocation6 + $0x8b0] sm:$0xff] }
  0xc6   :  { %4961 = vmatprep.subr.bf16.mxu1 %v6464_v9  ;;  %v804_v9 = vld [vmem:[#allocation6 + $0x14b0] sm:$0xff]  ;;  %v6272_v12 = vcombine.high %v408_v6, %v420_v7  ;;  %v6271_v20 = vcombine.low %v408_v6, %v420_v7 }
  0xc7   :  { %4921 = vmatpush1.bf16.msra.mxu0 %v6079_v14  ;;  %v6656_v13 = vcombine.high %v792_v8, %v804_v9  ;;  %v432_v14 = vld [vmem:[#allocation6 + $0x910] sm:$0xff]  ;;  %v6655_v21 = vcombine.low %v792_v8, %v804_v9 }
  0xc8   :  { %4922 = vmatprep.subr.bf16.mxu0 %v6104_v17  ;;  %v816_v17 = vld [vmem:[#allocation6 + $0x1510] sm:$0xff] }
  0xc9   :  { %4962 = vmatpush1.bf16.msra.mxu1 %v6463_v16  ;;  %v444_v16 = vld [vmem:[#allocation6 + $0x970] sm:$0xff] }
  0xca   :  { %4963 = vmatprep.subr.bf16.mxu1 %v6488_v19  ;;  %v828_v19 = vld [vmem:[#allocation6 + $0x1570] sm:$0xff]  ;;  %v6296_v58 = vcombine.high %v432_v14, %v444_v16  ;;  %v6295_v26 = vcombine.low %v432_v14, %v444_v16 }
  0xcb   :  { %4923 = vmatpush1.bf16.msra.mxu0 %v6103_v59  ;;  %v6680_v22 = vcombine.high %v816_v17, %v828_v19  ;;  %v456_v59 = vld [vmem:[#allocation6 + $0x9d0] sm:$0xff]  ;;  %v6679_v27 = vcombine.low %v816_v17, %v828_v19 }
  0xcc   :  { %4924 = vmatprep.subr.bf16.mxu0 %v6128_v24  ;;  %v840_v24 = vld [vmem:[#allocation6 + $0x15d0] sm:$0xff] }
  0xcd   :  { %4964 = vmatpush1.bf16.msra.mxu1 %v6487_v23  ;;  %v468_v23 = vld [vmem:[#allocation6 + $0xa30] sm:$0xff] }
  0xce   :  { %4965 = vmatprep.subr.bf16.mxu1 %v6512_v25  ;;  %v852_v25 = vld [vmem:[#allocation6 + $0x1630] sm:$0xff]  ;;  %v6320_v28 = vcombine.high %v456_v59, %v468_v23  ;;  %v6319_v34 = vcombine.low %v456_v59, %v468_v23 }
  0xcf   :  { %4925 = vmatpush1.bf16.msra.mxu0 %v6127_v30  ;;  %v6704_v29 = vcombine.high %v840_v24, %v852_v25  ;;  %v480_v30 = vld [vmem:[#allocation6 + $0xa90] sm:$0xff]  ;;  %v6703_v35 = vcombine.low %v840_v24, %v852_v25 }
  0xd0   :  { %4926 = vmatprep.subr.bf16.mxu0 %v6152_v32  ;;  %v864_v32 = vld [vmem:[#allocation6 + $0x1690] sm:$0xff] }
  0xd1   :  { %4966 = vmatpush1.bf16.msra.mxu1 %v6511_v31  ;;  %v492_v31 = vld [vmem:[#allocation6 + $0xaf0] sm:$0xff] }
  0xd2   :  { %4967 = vmatprep.subr.bf16.mxu1 %v6536_v33  ;;  %v876_v33 = vld [vmem:[#allocation6 + $0x16f0] sm:$0xff]  ;;  %v6344_v36 = vcombine.high %v480_v30, %v492_v31  ;;  %v6343_v42 = vcombine.low %v480_v30, %v492_v31 }
  0xd3   :  { %4927 = vmatpush1.bf16.msra.mxu0 %v6151_v38  ;;  %v6728_v37 = vcombine.high %v864_v32, %v876_v33  ;;  %v504_v38 = vld [vmem:[#allocation6 + $0xb50] sm:$0xff]  ;;  %v6727_v54 = vcombine.low %v864_v32, %v876_v33 }
  0xd4   :  { %4928 = vmatprep.subr.bf16.mxu0 %v6176_v41  ;;  %v888_v41 = vld [vmem:[#allocation6 + $0x1750] sm:$0xff] }
  0xd5   :  { %4968 = vmatpush1.bf16.msra.mxu1 %v6535_v39  ;;  %v516_v39 = vld [vmem:[#allocation6 + $0xbb0] sm:$0xff] }
  0xd6   :  { %4969 = vmatprep.subr.bf16.mxu1 %v6560_v53  ;;  %v900_v53 = vld [vmem:[#allocation6 + $0x17b0] sm:$0xff]  ;;  %v6368_v63 = vcombine.high %v504_v38, %v516_v39  ;;  %v6367_v48 = vcombine.low %v504_v38, %v516_v39 }
  0xd7   :  { %4929 = vmatpush1.bf16.msra.mxu0 %v6175_v44  ;;  %v6752_v43 = vcombine.high %v888_v41, %v900_v53  ;;  %v145_v44 = vld [vmem:[#allocation6 + $0x18] sm:$0xff]  ;;  %v6751_v49 = vcombine.low %v888_v41, %v900_v53 }
  0xd8   :  { %4930 = vmatprep.subr.bf16.mxu0 %v6200_v46  ;;  %v529_v46 = vld [vmem:[#allocation6 + $0xc18] sm:$0xff] }
  0xd9   :  { %4970 = vmatpush1.bf16.msra.mxu1 %v6559_v45  ;;  %v157_v45 = vld [vmem:[#allocation6 + $0x78] sm:$0xff] }
  0xda   :  { %4971 = vmatprep.subr.bf16.mxu1 %v6584_v47  ;;  %v541_v47 = vld [vmem:[#allocation6 + $0xc78] sm:$0xff]  ;;  %v6010_v50 = vcombine.high %v145_v44, %v157_v45  ;;  %v6009_v60 = vcombine.low %v145_v44, %v157_v45 }
  0xdb   :  { %4931 = vmatpush1.bf16.msra.mxu0 %v6199_v52  ;;  %v6394_v51 = vcombine.high %v529_v46, %v541_v47  ;;  %v169_v52 = vld [vmem:[#allocation6 + $0xd8] sm:$0xff]  ;;  %v6393_v61 = vcombine.low %v529_v46, %v541_v47 }
  0xdc   :  { %4932 = vmatprep.subr.bf16.mxu0 %v6224_v56  ;;  %v553_v56 = vld [vmem:[#allocation6 + $0xcd8] sm:$0xff] }
  0xdd   :  { %4972 = vmatpush1.bf16.msra.mxu1 %v6583_v55  ;;  %v181_v55 = vld [vmem:[#allocation6 + $0x138] sm:$0xff] }
  0xde   :  { %4973 = vmatprep.subr.bf16.mxu1 %v6608_v57  ;;  %v565_v57 = vld [vmem:[#allocation6 + $0xd38] sm:$0xff]  ;;  %v6034_v0 = vcombine.high %v169_v52, %v181_v55  ;;  %v6033_v6 = vcombine.low %v169_v52, %v181_v55 }
  0xdf   :  { %4933 = vmatpush1.bf16.msra.mxu0 %v6223_v2  ;;  %v6418_v1 = vcombine.high %v553_v56, %v565_v57  ;;  %v193_v2 = vld [vmem:[#allocation6 + $0x198] sm:$0xff]  ;;  %v6417_v7 = vcombine.low %v553_v56, %v565_v57 }
  0xe0   :  { %4934 = vmatprep.subr.bf16.mxu0 %v6248_v4  ;;  %v577_v4 = vld [vmem:[#allocation6 + $0xd98] sm:$0xff] }
  0xe1   :  { %4974 = vmatpush1.bf16.msra.mxu1 %v6607_v3  ;;  %v205_v3 = vld [vmem:[#allocation6 + $0x1f8] sm:$0xff] }
  0xe2   :  { %4975 = vmatprep.subr.bf16.mxu1 %v6632_v5  ;;  %v589_v5 = vld [vmem:[#allocation6 + $0xdf8] sm:$0xff]  ;;  %v6058_v8 = vcombine.high %v193_v2, %v205_v3  ;;  %v6057_v14 = vcombine.low %v193_v2, %v205_v3 }
  0xe3   :  { %4935 = vmatpush1.bf16.msra.mxu0 %v6247_v10  ;;  %v6442_v9 = vcombine.high %v577_v4, %v589_v5  ;;  %v217_v10 = vld [vmem:[#allocation6 + $0x258] sm:$0xff]  ;;  %v6441_v16 = vcombine.low %v577_v4, %v589_v5 }
  0xe4   :  { %4936 = vmatprep.subr.bf16.mxu0 %v6272_v12  ;;  %v601_v12 = vld [vmem:[#allocation6 + $0xe58] sm:$0xff] }
  0xe5   :  { %4976 = vmatpush1.bf16.msra.mxu1 %v6631_v11  ;;  %v229_v11 = vld [vmem:[#allocation6 + $0x2b8] sm:$0xff] }
  0xe6   :  { %4977 = vmatprep.subr.bf16.mxu1 %v6656_v13  ;;  %v613_v13 = vld [vmem:[#allocation6 + $0xeb8] sm:$0xff]  ;;  %v6082_v17 = vcombine.high %v217_v10, %v229_v11  ;;  %v6081_v59 = vcombine.low %v217_v10, %v229_v11 }
  0xe7   :  { %4937 = vmatpush1.bf16.msra.mxu0 %v6271_v20  ;;  %v6466_v19 = vcombine.high %v601_v12, %v613_v13  ;;  %v241_v20 = vld [vmem:[#allocation6 + $0x318] sm:$0xff]  ;;  %v6465_v23 = vcombine.low %v601_v12, %v613_v13 }
  0xe8   :  { %4938 = vmatprep.subr.bf16.mxu0 %v6296_v58  ;;  %v625_v58 = vld [vmem:[#allocation6 + $0xf18] sm:$0xff] }
  0xe9   :  { %4978 = vmatpush1.bf16.msra.mxu1 %v6655_v21  ;;  %v253_v21 = vld [vmem:[#allocation6 + $0x378] sm:$0xff] }
  0xea   :  { %4979 = vmatprep.subr.bf16.mxu1 %v6680_v22  ;;  %v637_v22 = vld [vmem:[#allocation6 + $0xf78] sm:$0xff]  ;;  %v6106_v24 = vcombine.high %v241_v20, %v253_v21  ;;  %v6105_v30 = vcombine.low %v241_v20, %v253_v21 }
  0xeb   :  { %4939 = vmatpush1.bf16.msra.mxu0 %v6295_v26  ;;  %v6490_v25 = vcombine.high %v625_v58, %v637_v22  ;;  %v265_v26 = vld [vmem:[#allocation6 + $0x3d8] sm:$0xff]  ;;  %v6489_v31 = vcombine.low %v625_v58, %v637_v22 }
  0xec   :  { %4940 = vmatprep.subr.bf16.mxu0 %v6320_v28  ;;  %v649_v28 = vld [vmem:[#allocation6 + $0xfd8] sm:$0xff] }
  0xed   :  { %4980 = vmatpush1.bf16.msra.mxu1 %v6679_v27  ;;  %v277_v27 = vld [vmem:[#allocation6 + $0x438] sm:$0xff] }
  0xee   :  { %4981 = vmatprep.subr.bf16.mxu1 %v6704_v29  ;;  %v661_v29 = vld [vmem:[#allocation6 + $0x1038] sm:$0xff]  ;;  %v6130_v32 = vcombine.high %v265_v26, %v277_v27  ;;  %v6129_v38 = vcombine.low %v265_v26, %v277_v27 }
  0xef   :  { %4941 = vmatpush1.bf16.msra.mxu0 %v6319_v34  ;;  %v6514_v33 = vcombine.high %v649_v28, %v661_v29  ;;  %v289_v34 = vld [vmem:[#allocation6 + $0x498] sm:$0xff]  ;;  %v6513_v39 = vcombine.low %v649_v28, %v661_v29 }
  0xf0   :  { %4942 = vmatprep.subr.bf16.mxu0 %v6344_v36  ;;  %v673_v36 = vld [vmem:[#allocation6 + $0x1098] sm:$0xff] }
  0xf1   :  { %4982 = vmatpush1.bf16.msra.mxu1 %v6703_v35  ;;  %v301_v35 = vld [vmem:[#allocation6 + $0x4f8] sm:$0xff] }
  0xf2   :  { %4983 = vmatprep.subr.bf16.mxu1 %v6728_v37  ;;  %v685_v37 = vld [vmem:[#allocation6 + $0x10f8] sm:$0xff]  ;;  %v6154_v41 = vcombine.high %v289_v34, %v301_v35  ;;  %v6153_v44 = vcombine.low %v289_v34, %v301_v35 }
  0xf3   :  { %4943 = vmatpush1.bf16.msra.mxu0 %v6343_v42  ;;  %v6538_v53 = vcombine.high %v673_v36, %v685_v37  ;;  %v313_v42 = vld [vmem:[#allocation6 + $0x558] sm:$0xff]  ;;  %v6537_v45 = vcombine.low %v673_v36, %v685_v37 }
  0xf4   :  { %4944 = vmatprep.subr.bf16.mxu0 %v6368_v63  ;;  %v697_v63 = vld [vmem:[#allocation6 + $0x1158] sm:$0xff] }
  0xf5   :  { %4984 = vmatpush1.bf16.msra.mxu1 %v6727_v54  ;;  %v325_v54 = vld [vmem:[#allocation6 + $0x5b8] sm:$0xff] }
  0xf6   :  { %4985 = vmatprep.subr.bf16.mxu1 %v6752_v43  ;;  %v709_v43 = vld [vmem:[#allocation6 + $0x11b8] sm:$0xff]  ;;  %v6178_v46 = vcombine.high %v313_v42, %v325_v54  ;;  %v6177_v52 = vcombine.low %v313_v42, %v325_v54 }
  0xf7   :  { %4945 = vmatpush1.bf16.msra.mxu0 %v6367_v48  ;;  %v6562_v47 = vcombine.high %v697_v63, %v709_v43  ;;  %v337_v48 = vld [vmem:[#allocation6 + $0x618] sm:$0xff]  ;;  %v6561_v55 = vcombine.low %v697_v63, %v709_v43 }
  0xf8   :  { %4996 = vmatprep.subr.bf16.mxu0 %v6010_v50  ;;  %v721_v50 = vld [vmem:[#allocation6 + $0x1218] sm:$0xff] }
  0xf9   :  { %4986 = vmatpush1.bf16.msra.mxu1 %v6751_v49  ;;  %v349_v49 = vld [vmem:[#allocation6 + $0x678] sm:$0xff] }
  0xfa   :  { %5037 = vmatprep.subr.bf16.mxu1 %v6394_v51  ;;  %4947 = vmatmul.mubr.bf16.vlgmr.msra.gmra.mrb[8].mxu0 %v6981_v40  ;;  %v733_v51 = vld [vmem:[#allocation6 + $0x1278] sm:$0xff]  ;;  %v6202_v56 = vcombine.high %v337_v48, %v349_v49  ;;  %v6201_v2 = vcombine.low %v337_v48, %v349_v49 }
  0xfb   :  { %4997 = vmatpush1.bf16.msra.mxu0 %v6009_v60  ;;  %5028 = vmatprep.mubr.bf16.mxu0 %v6971_v15  ;;  %v6586_v57 = vcombine.high %v721_v50, %v733_v51  ;;  %v361_v60 = vld [vmem:[#allocation6 + $0x6d8] sm:$0xff]  ;;  %v6585_v3 = vcombine.low %v721_v50, %v733_v51 }
  0xfc   :  { %4988 = vmatmul.mubr.bf16.vlgmr.msra.gmra.mrb[8].mxu1 %v6983_v62  ;;  %4998 = vmatprep.subr.bf16.mxu0 %v6034_v0  ;;  %v745_v0 = vld [vmem:[#allocation6 + $0x12d8] sm:$0xff] }
  0xfd   :  { %5038 = vmatpush1.bf16.msra.mxu1 %v6393_v61  ;;  %5069 = vmatprep.mubr.bf16.mxu1 %v6973_v18  ;;  %v373_v61 = vld [vmem:[#allocation6 + $0x738] sm:$0xff] }
  0xfe   :  { %5039 = vmatprep.subr.bf16.mxu1 %v6418_v1  ;;  %v757_v1 = vld [vmem:[#allocation6 + $0x1338] sm:$0xff]  ;;  %v6226_v4 = vcombine.high %v361_v60, %v373_v61  ;;  %v6225_v10 = vcombine.low %v361_v60, %v373_v61 }
  0xff   :  { %4999 = vmatpush1.bf16.msra.mxu0 %v6033_v6  ;;  %v6610_v5 = vcombine.high %v745_v0, %v757_v1  ;;  %v385_v6 = vld [vmem:[#allocation6 + $0x798] sm:$0xff]  ;;  %v6609_v11 = vcombine.low %v745_v0, %v757_v1 }
 0x100   :  { %5000 = vmatprep.subr.bf16.mxu0 %v6058_v8  ;;  %v769_v8 = vld [vmem:[#allocation6 + $0x1398] sm:$0xff] }
 0x101   :  { %5040 = vmatpush1.bf16.msra.mxu1 %v6417_v7  ;;  %v397_v7 = vld [vmem:[#allocation6 + $0x7f8] sm:$0xff] }
 0x102   :  { %5041 = vmatprep.subr.bf16.mxu1 %v6442_v9  ;;  %v781_v9 = vld [vmem:[#allocation6 + $0x13f8] sm:$0xff]  ;;  %v6250_v12 = vcombine.high %v385_v6, %v397_v7  ;;  %v6249_v20 = vcombine.low %v385_v6, %v397_v7 }
 0x103   :  { %5001 = vmatpush1.bf16.msra.mxu0 %v6057_v14  ;;  %v6634_v13 = vcombine.high %v769_v8, %v781_v9  ;;  %v409_v14 = vld [vmem:[#allocation6 + $0x858] sm:$0xff]  ;;  %v6633_v21 = vcombine.low %v769_v8, %v781_v9 }
 0x104   :  { %5002 = vmatprep.subr.bf16.mxu0 %v6082_v17  ;;  %v793_v17 = vld [vmem:[#allocation6 + $0x1458] sm:$0xff] }
 0x105   :  { %5042 = vmatpush1.bf16.msra.mxu1 %v6441_v16  ;;  %v421_v16 = vld [vmem:[#allocation6 + $0x8b8] sm:$0xff] }
 0x106   :  { %5043 = vmatprep.subr.bf16.mxu1 %v6466_v19  ;;  %v805_v19 = vld [vmem:[#allocation6 + $0x14b8] sm:$0xff]  ;;  %v6274_v58 = vcombine.high %v409_v14, %v421_v16  ;;  %v6273_v26 = vcombine.low %v409_v14, %v421_v16 }
 0x107   :  { %5003 = vmatpush1.bf16.msra.mxu0 %v6081_v59  ;;  %v6658_v22 = vcombine.high %v793_v17, %v805_v19  ;;  %v433_v59 = vld [vmem:[#allocation6 + $0x918] sm:$0xff]  ;;  %v6657_v27 = vcombine.low %v793_v17, %v805_v19 }
 0x108   :  { %5004 = vmatprep.subr.bf16.mxu0 %v6106_v24  ;;  %v817_v24 = vld [vmem:[#allocation6 + $0x1518] sm:$0xff] }
 0x109   :  { %5044 = vmatpush1.bf16.msra.mxu1 %v6465_v23  ;;  %v445_v23 = vld [vmem:[#allocation6 + $0x978] sm:$0xff] }
 0x10a   :  { %5045 = vmatprep.subr.bf16.mxu1 %v6490_v25  ;;  %v829_v25 = vld [vmem:[#allocation6 + $0x1578] sm:$0xff]  ;;  %v6298_v28 = vcombine.high %v433_v59, %v445_v23  ;;  %v6297_v34 = vcombine.low %v433_v59, %v445_v23 }
 0x10b   :  { %5005 = vmatpush1.bf16.msra.mxu0 %v6105_v30  ;;  %v6682_v29 = vcombine.high %v817_v24, %v829_v25  ;;  %v457_v30 = vld [vmem:[#allocation6 + $0x9d8] sm:$0xff]  ;;  %v6681_v35 = vcombine.low %v817_v24, %v829_v25 }
 0x10c   :  { %5006 = vmatprep.subr.bf16.mxu0 %v6130_v32  ;;  %v841_v32 = vld [vmem:[#allocation6 + $0x15d8] sm:$0xff] }
 0x10d   :  { %5046 = vmatpush1.bf16.msra.mxu1 %v6489_v31  ;;  %v469_v31 = vld [vmem:[#allocation6 + $0xa38] sm:$0xff] }
 0x10e   :  { %5047 = vmatprep.subr.bf16.mxu1 %v6514_v33  ;;  %v853_v33 = vld [vmem:[#allocation6 + $0x1638] sm:$0xff]  ;;  %v6322_v36 = vcombine.high %v457_v30, %v469_v31  ;;  %v6321_v42 = vcombine.low %v457_v30, %v469_v31  ;;  %v638_v30 = vld [vmem:[#allocation6 + $0xf80] sm:$0xff] }
 0x10f   :  { %5007 = vmatpush1.bf16.msra.mxu0 %v6129_v38  ;;  %v6706_v37 = vcombine.high %v841_v32, %v853_v33  ;;  %v481_v38 = vld [vmem:[#allocation6 + $0xa98] sm:$0xff]  ;;  %v6705_v54 = vcombine.low %v841_v32, %v853_v33 }
 0x110   :  { %5008 = vmatprep.subr.bf16.mxu0 %v6154_v41  ;;  %v865_v41 = vld [vmem:[#allocation6 + $0x1698] sm:$0xff] }
 0x111   :  { %5048 = vmatpush1.bf16.msra.mxu1 %v6513_v39  ;;  %v493_v39 = vld [vmem:[#allocation6 + $0xaf8] sm:$0xff] }
 0x112   :  { %5049 = vmatprep.subr.bf16.mxu1 %v6538_v53  ;;  %v877_v53 = vld [vmem:[#allocation6 + $0x16f8] sm:$0xff]  ;;  %v6346_v63 = vcombine.high %v481_v38, %v493_v39  ;;  %v6345_v48 = vcombine.low %v481_v38, %v493_v39  ;;  %v650_v38 = vld [vmem:[#allocation6 + $0xfe0] sm:$0xff] }
 0x113   :  { %5009 = vmatpush1.bf16.msra.mxu0 %v6153_v44  ;;  %v6730_v43 = vcombine.high %v865_v41, %v877_v53  ;;  %v505_v44 = vld [vmem:[#allocation6 + $0xb58] sm:$0xff]  ;;  %v6729_v49 = vcombine.low %v865_v41, %v877_v53  ;;  %v662_v39 = vld [vmem:[#allocation6 + $0x1040] sm:$0xff] }
 0x114   :  { %5010 = vmatprep.subr.bf16.mxu0 %v6178_v46  ;;  %v889_v46 = vld [vmem:[#allocation6 + $0x1758] sm:$0xff] }
 0x115   :  { %5050 = vmatpush1.bf16.msra.mxu1 %v6537_v45  ;;  %v517_v45 = vld [vmem:[#allocation6 + $0xbb8] sm:$0xff] }
 0x116   :  { %5051 = vmatprep.subr.bf16.mxu1 %v6562_v47  ;;  %v901_v47 = vld [vmem:[#allocation6 + $0x17b8] sm:$0xff]  ;;  %v6370_v50 = vcombine.high %v505_v44, %v517_v45  ;;  %v6369_v60 = vcombine.low %v505_v44, %v517_v45  ;;  %v302_v44 = vld [vmem:[#allocation6 + $0x500] sm:$0xff] }
 0x117   :  { %5011 = vmatpush1.bf16.msra.mxu0 %v6177_v52  ;;  %v6754_v51 = vcombine.high %v889_v46, %v901_v47  ;;  %v146_v52 = vld [vmem:[#allocation6 + $0x20] sm:$0xff]  ;;  %v6753_v61 = vcombine.low %v889_v46, %v901_v47 }
 0x118   :  { %5012 = vmatprep.subr.bf16.mxu0 %v6202_v56  ;;  %v530_v56 = vld [vmem:[#allocation6 + $0xc20] sm:$0xff] }
 0x119   :  { %5052 = vmatpush1.bf16.msra.mxu1 %v6561_v55  ;;  %v158_v55 = vld [vmem:[#allocation6 + $0x80] sm:$0xff] }
 0x11a   :  { %5053 = vmatprep.subr.bf16.mxu1 %v6586_v57  ;;  %v542_v57 = vld [vmem:[#allocation6 + $0xc80] sm:$0xff]  ;;  %v6012_v0 = vcombine.high %v146_v52, %v158_v55  ;;  %v6011_v6 = vcombine.low %v146_v52, %v158_v55 }
 0x11b   :  { %5013 = vmatpush1.bf16.msra.mxu0 %v6201_v2  ;;  %v6396_v1 = vcombine.high %v530_v56, %v542_v57  ;;  %v170_v2 = vld [vmem:[#allocation6 + $0xe0] sm:$0xff]  ;;  %v6395_v7 = vcombine.low %v530_v56, %v542_v57 }
 0x11c   :  { %5014 = vmatprep.subr.bf16.mxu0 %v6226_v4  ;;  %v554_v4 = vld [vmem:[#allocation6 + $0xce0] sm:$0xff] }
 0x11d   :  { %5054 = vmatpush1.bf16.msra.mxu1 %v6585_v3  ;;  %v182_v3 = vld [vmem:[#allocation6 + $0x140] sm:$0xff] }
 0x11e   :  { %5055 = vmatprep.subr.bf16.mxu1 %v6610_v5  ;;  %v566_v5 = vld [vmem:[#allocation6 + $0xd40] sm:$0xff]  ;;  %v6036_v8 = vcombine.high %v170_v2, %v182_v3  ;;  %v6035_v14 = vcombine.low %v170_v2, %v182_v3 }
 0x11f   :  { %5015 = vmatpush1.bf16.msra.mxu0 %v6225_v10  ;;  %v6420_v9 = vcombine.high %v554_v4, %v566_v5  ;;  %v194_v10 = vld [vmem:[#allocation6 + $0x1a0] sm:$0xff]  ;;  %v6419_v16 = vcombine.low %v554_v4, %v566_v5 }
 0x120   :  { %5016 = vmatprep.subr.bf16.mxu0 %v6250_v12  ;;  %v578_v12 = vld [vmem:[#allocation6 + $0xda0] sm:$0xff] }
 0x121   :  { %5056 = vmatpush1.bf16.msra.mxu1 %v6609_v11  ;;  %v206_v11 = vld [vmem:[#allocation6 + $0x200] sm:$0xff] }
 0x122   :  { %5057 = vmatprep.subr.bf16.mxu1 %v6634_v13  ;;  %v590_v13 = vld [vmem:[#allocation6 + $0xe00] sm:$0xff]  ;;  %v6060_v17 = vcombine.high %v194_v10, %v206_v11  ;;  %v6059_v59 = vcombine.low %v194_v10, %v206_v11 }
 0x123   :  { %5017 = vmatpush1.bf16.msra.mxu0 %v6249_v20  ;;  %v6444_v19 = vcombine.high %v578_v12, %v590_v13  ;;  %v218_v20 = vld [vmem:[#allocation6 + $0x260] sm:$0xff]  ;;  %v6443_v23 = vcombine.low %v578_v12, %v590_v13 }
 0x124   :  { %5018 = vmatprep.subr.bf16.mxu0 %v6274_v58  ;;  %v602_v58 = vld [vmem:[#allocation6 + $0xe60] sm:$0xff] }
 0x125   :  { %5058 = vmatpush1.bf16.msra.mxu1 %v6633_v21  ;;  %v230_v21 = vld [vmem:[#allocation6 + $0x2c0] sm:$0xff] }
 0x126   :  { %5059 = vmatprep.subr.bf16.mxu1 %v6658_v22  ;;  %v614_v22 = vld [vmem:[#allocation6 + $0xec0] sm:$0xff]  ;;  %v6084_v24 = vcombine.high %v218_v20, %v230_v21  ;;  %v6083_v31 = vcombine.low %v218_v20, %v230_v21 }
 0x127   :  { %5019 = vmatpush1.bf16.msra.mxu0 %v6273_v26  ;;  %v6468_v25 = vcombine.high %v602_v58, %v614_v22  ;;  %v242_v26 = vld [vmem:[#allocation6 + $0x320] sm:$0xff]  ;;  %v6467_v32 = vcombine.low %v602_v58, %v614_v22 }
 0x128   :  { %5020 = vmatprep.subr.bf16.mxu0 %v6298_v28  ;;  %v5815_v28 = vlaneseq  ;;  %v7006_v45 = vld [vmem:[#allocation8] sm:$0xff] }
 0x129   :  { %5060 = vmatpush1.bf16.msra.mxu1 %v6657_v27  ;;  %v254_v27 = vld [vmem:[#allocation6 + $0x380] sm:$0xff] }
 0x12a   :  { %5061 = vmatprep.subr.bf16.mxu1 %v6682_v29  ;;  %v626_v29 = vld [vmem:[#allocation6 + $0xf20] sm:$0xff]  ;;  %v6108_v33 = vcombine.high %v242_v26, %v254_v27  ;;  %v6107_v41 = vcombine.low %v242_v26, %v254_v27 }
 0x12b   :  { %5021 = vmatpush1.bf16.msra.mxu0 %v6297_v34  ;;  %v6492_v34 = vcombine.high %v626_v29, %v638_v30  ;;  %v6491_v53 = vcombine.low %v626_v29, %v638_v30  ;;  %v674_v47 = vld [vmem:[#allocation6 + $0x10a0] sm:$0xff] }
 0x12c   :  { %5022 = vmatprep.subr.bf16.mxu0 %v6322_v36  ;;  %v266_v36 = vld [vmem:[#allocation6 + $0x3e0] sm:$0xff] }
 0x12d   :  { %5062 = vmatpush1.bf16.msra.mxu1 %v6681_v35  ;;  %v7001_v35 = vshrl.u32 %v5815_v28, 7  ;;  %v314_v57 = vld [vmem:[#allocation6 + $0x560] sm:$0xff] }
 0x12e   :  { %5063 = vmatprep.subr.bf16.mxu1 %v6706_v37  ;;  %v278_v37 = vld [vmem:[#allocation6 + $0x440] sm:$0xff] }
 0x12f   :  { %5023 = vmatpush1.bf16.msra.mxu0 %v6321_v42  ;;  %v6132_v42 = vcombine.high %v266_v36, %v278_v37  ;;  %v7009_v46 = vsub.s32 1, %v7001_v35  ;;  %v698_v2 = vld [vmem:[#allocation6 + $0x1160] sm:$0xff] }
 0x130   :  { %5024 = vmatprep.subr.bf16.mxu0 %v6346_v63  ;;  %v6516_v63 = vcombine.high %v650_v38, %v662_v39  ;;  %v710_v3 = vld [vmem:[#allocation6 + $0x11c0] sm:$0xff] }
 0x131   :  { %5064 = vmatpush1.bf16.msra.mxu1 %v6705_v54  ;;  %v7004_v54 = vsub.s32 0, %v7001_v35  ;;  %v722_v21 = vld [vmem:[#allocation6 + $0x1220] sm:$0xff] }
 0x132   :  { %5065 = vmatprep.subr.bf16.mxu1 %v6730_v43  ;;  %v290_v43 = vld [vmem:[#allocation6 + $0x4a0] sm:$0xff] }
 0x133   :  { %5025 = vmatpush1.bf16.msra.mxu0 %v6345_v48  ;;  %v686_v48 = vld [vmem:[#allocation6 + $0x1100] sm:$0xff]  ;;  %v5818_v55 = vrot.slane %v7006_v45, %v7004_v54 }
 0x134   :  { %5026 = vmatprep.subr.bf16.mxu0 %v6370_v50  ;;  %v6515_v50 = vcombine.low %v650_v38, %v662_v39  ;;  %v6540_v56 = vcombine.high %v674_v47, %v686_v48  ;;  %v6539_v11 = vcombine.low %v674_v47, %v686_v48  ;;  %v734_v58 = vld [vmem:[#allocation6 + $0x1280] sm:$0xff] }
 0x135   :  { %5066 = vmatpush1.bf16.msra.mxu1 %v6729_v49  ;;  %v6131_v49 = vcombine.low %v266_v36, %v278_v37  ;;  %v374_v26 = vld [vmem:[#allocation6 + $0x740] sm:$0xff]  ;;  %v6587_v30 = vcombine.low %v722_v21, %v734_v58 }
 0x136   :  { %5067 = vmatprep.subr.bf16.mxu1 %v6754_v51  ;;  %v6156_v51 = vcombine.high %v290_v43, %v302_v44  ;;  %v746_v27 = vld [vmem:[#allocation6 + $0x12e0] sm:$0xff] }
 0x137   :  { %5027 = vmatpush1.bf16.msra.mxu0 %v6369_v60  ;;  %v326_v60 = vld [vmem:[#allocation6 + $0x5c0] sm:$0xff] }
 0x138   :  { %5078 = vmatprep.subr.bf16.mxu0 %v6012_v0  ;;  %v6180_v12 = vcombine.high %v314_v57, %v326_v60  ;;  %v6179_v22 = vcombine.low %v314_v57, %v326_v60  ;;  %v758_v28 = vld [vmem:[#allocation6 + $0x1340] sm:$0xff] }
 0x139   :  { %5068 = vmatpush1.bf16.msra.mxu1 %v6753_v61  ;;  %v770_v36 = vld [vmem:[#allocation6 + $0x13a0] sm:$0xff]  ;;  %v6611_v39 = vcombine.low %v746_v27, %v758_v28 }
 0x13a   :  { %5119 = vmatprep.subr.bf16.mxu1 %v6396_v1  ;;  %5029 = vmatmul.mubr.bf16.vlgmr.msra.gmra.mrb[12].mxu0 %v6981_v40  ;;  %v5822_v1 = vrot.slane %v7006_v45, %v7009_v46  ;;  %v782_v37 = vld [vmem:[#allocation6 + $0x1400] sm:$0xff] }
 0x13b   :  { %5079 = vmatpush1.bf16.msra.mxu0 %v6011_v6  ;;  %5110 = vmatprep.mubr.bf16.mxu0 %v6971_v15  ;;  %v6635_v48 = vcombine.low %v770_v36, %v782_v37 }
 0x13c   :  { %5070 = vmatmul.mubr.bf16.vlgmr.msra.gmra.mrb[12].mxu1 %v6983_v62  ;;  %5080 = vmatprep.subr.bf16.mxu0 %v6036_v8 }
 0x13d   :  { %5120 = vmatpush1.bf16.msra.mxu1 %v6395_v7  ;;  %5151 = vmatprep.mubr.bf16.mxu1 %v6973_v18  ;;  %v6155_v7 = vcombine.low %v290_v43, %v302_v44  ;;  %v794_v43 = vld [vmem:[#allocation6 + $0x1460] sm:$0xff] }
 0x13e   :  { %5121 = vmatprep.subr.bf16.mxu1 %v6420_v9  ;;  %v806_v44 = vld [vmem:[#allocation6 + $0x14c0] sm:$0xff] }
 0x13f   :  { %5081 = vmatpush1.bf16.msra.mxu0 %v6035_v14  ;;  %v6659_v60 = vcombine.low %v794_v43, %v806_v44 }
 0x140   :  { %5082 = vmatprep.subr.bf16.mxu0 %v6060_v17  ;;  %v338_v17 = vld [vmem:[#allocation6 + $0x620] sm:$0xff] }
 0x141   :  { %5122 = vmatpush1.bf16.msra.mxu1 %v6419_v16  ;;  %v6564_v16 = vcombine.high %v698_v2, %v710_v3 }
 0x142   :  { %5123 = vmatprep.subr.bf16.mxu1 %v6444_v19  ;;  %v350_v19 = vld [vmem:[#allocation6 + $0x680] sm:$0xff] }
 0x143   :  { %5083 = vmatpush1.bf16.msra.mxu0 %v6059_v59  ;;  %v6563_v59 = vcombine.low %v698_v2, %v710_v3  ;;  %v6203_v29 = vcombine.low %v338_v17, %v350_v19  ;;  %v470_v2 = vld [vmem:[#allocation6 + $0xa40] sm:$0xff] }
 0x144   :  { %5084 = vmatprep.subr.bf16.mxu0 %v6084_v24  ;;  %v6588_v24 = vcombine.high %v722_v21, %v734_v58  ;;  %v842_v3 = vld [vmem:[#allocation6 + $0x15e0] sm:$0xff] }
 0x145   :  { %5124 = vmatpush1.bf16.msra.mxu1 %v6443_v23  ;;  %v6204_v23 = vcombine.high %v338_v17, %v350_v19  ;;  %v506_v19 = vld [vmem:[#allocation6 + $0xb60] sm:$0xff] }
 0x146   :  { %5125 = vmatprep.subr.bf16.mxu1 %v6468_v25  ;;  %v362_v25 = vld [vmem:[#allocation6 + $0x6e0] sm:$0xff] }
 0x147   :  { %5085 = vmatpush1.bf16.msra.mxu0 %v6083_v31  ;;  %v6228_v31 = vcombine.high %v362_v25, %v374_v26  ;;  %v6227_v38 = vcombine.low %v362_v25, %v374_v26  ;;  %v890_v21 = vld [vmem:[#allocation6 + $0x1760] sm:$0xff]  ;;  %v147_v25 = vld [vmem:[#allocation6 + $0x28] sm:$0xff] }
 0x148   :  { %5086 = vmatprep.subr.bf16.mxu0 %v6108_v33  ;;  %v386_v33 = vld [vmem:[#allocation6 + $0x7a0] sm:$0xff]  ;;  %v159_v26 = vld [vmem:[#allocation6 + $0x88] sm:$0xff] }
 0x149   :  { %5126 = vmatpush1.bf16.msra.mxu1 %v6467_v32  ;;  %v6612_v32 = vcombine.high %v746_v27, %v758_v28  ;;  %v902_v58 = vld [vmem:[#allocation6 + $0x17c0] sm:$0xff]  ;;  %v531_v27 = vld [vmem:[#allocation6 + $0xc28] sm:$0xff] }
 0x14a   :  { %5127 = vmatprep.subr.bf16.mxu1 %v6492_v34  ;;  %v398_v34 = vld [vmem:[#allocation6 + $0x800] sm:$0xff]  ;;  %v543_v28 = vld [vmem:[#allocation6 + $0xc88] sm:$0xff] }
 0x14b   :  { %5087 = vmatpush1.bf16.msra.mxu0 %v6107_v41  ;;  %v6252_v41 = vcombine.high %v386_v33, %v398_v34  ;;  %v6251_v47 = vcombine.low %v386_v33, %v398_v34  ;;  %v171_v33 = vld [vmem:[#allocation6 + $0xe8] sm:$0xff] }
 0x14c   :  { %5088 = vmatprep.subr.bf16.mxu0 %v6132_v42  ;;  %v410_v42 = vld [vmem:[#allocation6 + $0x860] sm:$0xff]  ;;  %v183_v34 = vld [vmem:[#allocation6 + $0x148] sm:$0xff] }
 0x14d   :  { %5128 = vmatpush1.bf16.msra.mxu1 %v6491_v53  ;;  %v4784_v52 = vpop.f32.mrb[0].mxu0  ;;  %v6636_v53 = vcombine.high %v770_v36, %v782_v37  ;;  %v555_v36 = vld [vmem:[#allocation6 + $0xce8] sm:$0xff] }
 0x14e   :  { %5129 = vmatprep.subr.bf16.mxu1 %v6516_v63  ;;  %v4786_v0 = vpop.f32.mrb[1].mxu0  ;;  %v422_v63 = vld [vmem:[#allocation6 + $0x8c0] sm:$0xff]  ;;  %v567_v37 = vld [vmem:[#allocation6 + $0xd48] sm:$0xff] }
 0x14f   :  { %v4825_v61 = vpop.f32.mrb[0].mxu1  ;;  %v4788_v6 = vpop.f32.mrb[2].mxu0  ;;  %5089 = vmatpush1.bf16.msra.mxu0 %v6131_v49  ;;  %v6276_v49 = vcombine.high %v410_v42, %v422_v63  ;;  %v6275_v57 = vcombine.low %v410_v42, %v422_v63  ;;  %v195_v42 = vld [vmem:[#allocation6 + $0x1a8] sm:$0xff] }
 0x150   :  { %v4826_v4 = vadd.f32 %v4825_v61, %v4784_v52  ;;  %v4827_v5 = vpop.f32.mrb[1].mxu1  ;;  %v4789_v10 = vpop.f32.mrb[3].mxu0  ;;  %5090 = vmatprep.subr.bf16.mxu0 %v6156_v51  ;;  %v434_v51 = vld [vmem:[#allocation6 + $0x920] sm:$0xff]  ;;  %v207_v63 = vld [vmem:[#allocation6 + $0x208] sm:$0xff] }
 0x151   :  { %v4828_v8 = vadd.f32 %v4827_v5, %v4786_v0  ;;  %v4829_v9 = vpop.f32.mrb[2].mxu1  ;;  %5130 = vmatpush1.bf16.msra.mxu1 %v6515_v50  ;;  %v6660_v50 = vcombine.high %v794_v43, %v806_v44  ;;  %v446_v52 = vld [vmem:[#allocation6 + $0x980] sm:$0xff]  ;;  %v579_v43 = vld [vmem:[#allocation6 + $0xda8] sm:$0xff] }
 0x152   :  { %v5935_v13 = vadd.f32 %v5818_v55, %v4826_v4  ;;  %v4830_v14 = vpop.f32.mrb[3].mxu1  ;;  %5131 = vmatprep.subr.bf16.mxu1 %v6540_v56  ;;  %v818_v55 = vld [vmem:[#allocation6 + $0x1520] sm:$0xff]  ;;  %v6300_v61 = vcombine.high %v434_v51, %v446_v52  ;;  %v6299_v5 = vcombine.low %v434_v51, %v446_v52  ;;  %v591_v44 = vld [vmem:[#allocation6 + $0xe08] sm:$0xff] }
 0x153   :  { %v5936_v20 = vadd.f32 %v5822_v1, %v4828_v8  ;;  %5091 = vmatpush1.bf16.msra.mxu0 %v6155_v7  ;;  %v830_v56 = vld [vmem:[#allocation6 + $0x1580] sm:$0xff]  ;;  %v219_v51 = vld [vmem:[#allocation6 + $0x268] sm:$0xff] }
 0x154   :  { %5959 = vst [vmem:[#allocation9] sm:$0xff] %v5935_v13  ;;  %5092 = vmatprep.subr.bf16.mxu0 %v6180_v12  ;;  %v6684_v0 = vcombine.high %v818_v55, %v830_v56  ;;  %v458_v1 = vld [vmem:[#allocation6 + $0x9e0] sm:$0xff]  ;;  %v6683_v6 = vcombine.low %v818_v55, %v830_v56  ;;  %v231_v52 = vld [vmem:[#allocation6 + $0x2c8] sm:$0xff] }
 0x155   :  { %5960 = vst [vmem:[#allocation9 + $0x8] sm:$0xff] %v5936_v20  ;;  %5132 = vmatpush1.bf16.msra.mxu1 %v6539_v11  ;;  %v854_v4 = vld [vmem:[#allocation6 + $0x1640] sm:$0xff]  ;;  %v6324_v7 = vcombine.high %v458_v1, %v470_v2  ;;  %v6323_v13 = vcombine.low %v458_v1, %v470_v2  ;;  %v603_v55 = vld [vmem:[#allocation6 + $0xe68] sm:$0xff] }
 0x156   :  { %5133 = vmatprep.subr.bf16.mxu1 %v6564_v16  ;;  %v6708_v8 = vcombine.high %v842_v3, %v854_v4  ;;  %v482_v9 = vld [vmem:[#allocation6 + $0xaa0] sm:$0xff]  ;;  %v6707_v14 = vcombine.low %v842_v3, %v854_v4  ;;  %v615_v56 = vld [vmem:[#allocation6 + $0xec8] sm:$0xff] }
 0x157   :  { %5093 = vmatpush1.bf16.msra.mxu0 %v6179_v22  ;;  %v494_v10 = vld [vmem:[#allocation6 + $0xb00] sm:$0xff]  ;;  %v243_v1 = vld [vmem:[#allocation6 + $0x328] sm:$0xff] }
 0x158   :  { %5094 = vmatprep.subr.bf16.mxu0 %v6204_v23  ;;  %v866_v11 = vld [vmem:[#allocation6 + $0x16a0] sm:$0xff]  ;;  %v6348_v16 = vcombine.high %v482_v9, %v494_v10  ;;  %v6347_v22 = vcombine.low %v482_v9, %v494_v10  ;;  %v255_v2 = vld [vmem:[#allocation6 + $0x388] sm:$0xff] }
 0x159   :  { %5134 = vmatpush1.bf16.msra.mxu1 %v6563_v59  ;;  %v878_v12 = vld [vmem:[#allocation6 + $0x1700] sm:$0xff]  ;;  %v627_v3 = vld [vmem:[#allocation6 + $0xf28] sm:$0xff] }
 0x15a   :  { %5135 = vmatprep.subr.bf16.mxu1 %v6588_v24  ;;  %v6732_v17 = vcombine.high %v866_v11, %v878_v12  ;;  %v518_v20 = vld [vmem:[#allocation6 + $0xbc0] sm:$0xff]  ;;  %v6731_v59 = vcombine.low %v866_v11, %v878_v12  ;;  %v6756_v24 = vcombine.high %v890_v21, %v902_v58  ;;  %v639_v4 = vld [vmem:[#allocation6 + $0xf88] sm:$0xff] }
 0x15b   :  { %5095 = vmatpush1.bf16.msra.mxu0 %v6203_v29  ;;  %v6372_v23 = vcombine.high %v506_v19, %v518_v20  ;;  %v6371_v29 = vcombine.low %v506_v19, %v518_v20  ;;  %v267_v9 = vld [vmem:[#allocation6 + $0x3e8] sm:$0xff] }
 0x15c   :  { %5096 = vmatprep.subr.bf16.mxu0 %v6228_v31  ;;  %v6014_v31 = vcombine.high %v147_v25, %v159_v26  ;;  %v279_v10 = vld [vmem:[#allocation6 + $0x448] sm:$0xff] }
 0x15d   :  { %5136 = vmatpush1.bf16.msra.mxu1 %v6587_v30  ;;  %v6755_v30 = vcombine.low %v890_v21, %v902_v58  ;;  %v651_v11 = vld [vmem:[#allocation6 + $0xfe8] sm:$0xff]  ;;  %v7023_v58 = vsub.s32 3, %v7001_v35 }
 0x15e   :  { %5137 = vmatprep.subr.bf16.mxu1 %v6612_v32  ;;  %v6398_v32 = vcombine.high %v531_v27, %v543_v28  ;;  %v663_v12 = vld [vmem:[#allocation6 + $0x1048] sm:$0xff] }
 0x15f   :  { %5097 = vmatpush1.bf16.msra.mxu0 %v6227_v38  ;;  %v6013_v38 = vcombine.low %v147_v25, %v159_v26  ;;  %v6518_v19 = vcombine.high %v651_v11, %v663_v12  ;;  %v291_v20 = vld [vmem:[#allocation6 + $0x4a8] sm:$0xff] }
 0x160   :  { %5098 = vmatprep.subr.bf16.mxu0 %v6252_v41  ;;  %v6038_v41 = vcombine.high %v171_v33, %v183_v34  ;;  %v303_v21 = vld [vmem:[#allocation6 + $0x508] sm:$0xff] }
 0x161   :  { %5138 = vmatpush1.bf16.msra.mxu1 %v6611_v39  ;;  %v6397_v39 = vcombine.low %v531_v27, %v543_v28  ;;  %v6158_v25 = vcombine.high %v291_v20, %v303_v21 }
 0x162   :  { %5139 = vmatprep.subr.bf16.mxu1 %v6636_v53  ;;  %v6422_v53 = vcombine.high %v555_v36, %v567_v37 }
 0x163   :  { %5099 = vmatpush1.bf16.msra.mxu0 %v6251_v47  ;;  %v6037_v47 = vcombine.low %v171_v33, %v183_v34  ;;  %v5830_v33 = vrot.slane %v7006_v45, %v7023_v58  ;;  %v699_v34 = vld [vmem:[#allocation6 + $0x1168] sm:$0xff] }
 0x164   :  { %5100 = vmatprep.subr.bf16.mxu0 %v6276_v49  ;;  %v6062_v49 = vcombine.high %v195_v42, %v207_v63 }
 0x165   :  { %5140 = vmatpush1.bf16.msra.mxu1 %v6635_v48  ;;  %v6421_v48 = vcombine.low %v555_v36, %v567_v37  ;;  %v711_v36 = vld [vmem:[#allocation6 + $0x11c8] sm:$0xff] }
 0x166   :  { %5141 = vmatprep.subr.bf16.mxu1 %v6660_v50  ;;  %v6446_v50 = vcombine.high %v579_v43, %v591_v44 }
 0x167   :  { %5101 = vmatpush1.bf16.msra.mxu0 %v6275_v57  ;;  %v6061_v57 = vcombine.low %v195_v42, %v207_v63 }
 0x168   :  { %5102 = vmatprep.subr.bf16.mxu0 %v6300_v61  ;;  %v6086_v61 = vcombine.high %v219_v51, %v231_v52 }
 0x169   :  { %5142 = vmatpush1.bf16.msra.mxu1 %v6659_v60  ;;  %v6445_v60 = vcombine.low %v579_v43, %v591_v44 }
 0x16a   :  { %5143 = vmatprep.subr.bf16.mxu1 %v6684_v0  ;;  %v6470_v0 = vcombine.high %v603_v55, %v615_v56 }
 0x16b   :  { %5103 = vmatpush1.bf16.msra.mxu0 %v6299_v5  ;;  %v6085_v5 = vcombine.low %v219_v51, %v231_v52  ;;  %v351_v51 = vld [vmem:[#allocation6 + $0x688] sm:$0xff] }
 0x16c   :  { %5104 = vmatprep.subr.bf16.mxu0 %v6324_v7  ;;  %v6110_v7 = vcombine.high %v243_v1, %v255_v2 }
 0x16d   :  { %5144 = vmatpush1.bf16.msra.mxu1 %v6683_v6  ;;  %v6469_v6 = vcombine.low %v603_v55, %v615_v56  ;;  %v723_v55 = vld [vmem:[#allocation6 + $0x1228] sm:$0xff] }
 0x16e   :  { %5145 = vmatprep.subr.bf16.mxu1 %v6708_v8  ;;  %v6494_v8 = vcombine.high %v627_v3, %v639_v4  ;;  %v735_v56 = vld [vmem:[#allocation6 + $0x1288] sm:$0xff] }
 0x16f   :  { %5105 = vmatpush1.bf16.msra.mxu0 %v6323_v13  ;;  %v6109_v13 = vcombine.low %v243_v1, %v255_v2  ;;  %v363_v1 = vld [vmem:[#allocation6 + $0x6e8] sm:$0xff] }
 0x170   :  { %5106 = vmatprep.subr.bf16.mxu0 %v6348_v16  ;;  %v6134_v16 = vcombine.high %v267_v9, %v279_v10  ;;  %v375_v2 = vld [vmem:[#allocation6 + $0x748] sm:$0xff] }
 0x171   :  { %5146 = vmatpush1.bf16.msra.mxu1 %v6707_v14  ;;  %v6493_v14 = vcombine.low %v627_v3, %v639_v4  ;;  %v747_v3 = vld [vmem:[#allocation6 + $0x12e8] sm:$0xff] }
 0x172   :  { %5147 = vmatprep.subr.bf16.mxu1 %v6732_v17  ;;  %v7020_v17 = vsub.s32 2, %v7001_v35  ;;  %v759_v4 = vld [vmem:[#allocation6 + $0x1348] sm:$0xff] }
 0x173   :  { %5107 = vmatpush1.bf16.msra.mxu0 %v6347_v22  ;;  %v675_v22 = vld [vmem:[#allocation6 + $0x10a8] sm:$0xff] }
 0x174   :  { %5108 = vmatprep.subr.bf16.mxu0 %v6372_v23  ;;  %v6133_v23 = vcombine.low %v267_v9, %v279_v10  ;;  %v5826_v27 = vrot.slane %v7006_v45, %v7020_v17  ;;  %v387_v9 = vld [vmem:[#allocation6 + $0x7a8] sm:$0xff] }
 0x175   :  { %5148 = vmatpush1.bf16.msra.mxu1 %v6731_v59  ;;  %v687_v59 = vld [vmem:[#allocation6 + $0x1108] sm:$0xff] }
 0x176   :  { %5149 = vmatprep.subr.bf16.mxu1 %v6756_v24  ;;  %v6517_v24 = vcombine.low %v651_v11, %v663_v12  ;;  %v6542_v28 = vcombine.high %v675_v22, %v687_v59  ;;  %v6541_v43 = vcombine.low %v675_v22, %v687_v59  ;;  %v399_v10 = vld [vmem:[#allocation6 + $0x808] sm:$0xff] }
 0x177   :  { %5109 = vmatpush1.bf16.msra.mxu0 %v6371_v29  ;;  %v315_v29 = vld [vmem:[#allocation6 + $0x568] sm:$0xff] }
 0x178   :  { %5160 = vmatprep.subr.bf16.mxu0 %v6014_v31  ;;  %v771_v11 = vld [vmem:[#allocation6 + $0x13a8] sm:$0xff] }
 0x179   :  { %5150 = vmatpush1.bf16.msra.mxu1 %v6755_v30  ;;  %v327_v30 = vld [vmem:[#allocation6 + $0x5c8] sm:$0xff] }
 0x17a   :  { %5201 = vmatprep.subr.bf16.mxu1 %v6398_v32  ;;  %5111 = vmatmul.mubr.bf16.vlgmr.msra.gmra.mrb[16].mxu0 %v6981_v40  ;;  %v6182_v44 = vcombine.high %v315_v29, %v327_v30  ;;  %v783_v12 = vld [vmem:[#allocation6 + $0x1408] sm:$0xff] }
 0x17b   :  { %5161 = vmatpush1.bf16.msra.mxu0 %v6013_v38  ;;  %5192 = vmatprep.mubr.bf16.mxu0 %v6971_v15  ;;  %v795_v22 = vld [vmem:[#allocation6 + $0x1468] sm:$0xff] }
 0x17c   :  { %5152 = vmatmul.mubr.bf16.vlgmr.msra.gmra.mrb[16].mxu1 %v6983_v62  ;;  %5162 = vmatprep.subr.bf16.mxu0 %v6038_v41  ;;  %v6157_v41 = vcombine.low %v291_v20, %v303_v21  ;;  %v411_v20 = vld [vmem:[#allocation6 + $0x868] sm:$0xff] }
 0x17d   :  { %5202 = vmatpush1.bf16.msra.mxu1 %v6397_v39  ;;  %5233 = vmatprep.mubr.bf16.mxu1 %v6973_v18  ;;  %v423_v21 = vld [vmem:[#allocation6 + $0x8c8] sm:$0xff] }
 0x17e   :  { %5203 = vmatprep.subr.bf16.mxu1 %v6422_v53  ;;  %v807_v59 = vld [vmem:[#allocation6 + $0x14c8] sm:$0xff] }
 0x17f   :  { %5163 = vmatpush1.bf16.msra.mxu0 %v6037_v47 }
 0x180   :  { %5164 = vmatprep.subr.bf16.mxu0 %v6062_v49  ;;  %v6566_v49 = vcombine.high %v699_v34, %v711_v36 }
 0x181   :  { %5204 = vmatpush1.bf16.msra.mxu1 %v6421_v48 }
 0x182   :  { %5205 = vmatprep.subr.bf16.mxu1 %v6446_v50  ;;  %v339_v50 = vld [vmem:[#allocation6 + $0x628] sm:$0xff] }
 0x183   :  { %5165 = vmatpush1.bf16.msra.mxu0 %v6061_v57  ;;  %v6181_v57 = vcombine.low %v315_v29, %v327_v30  ;;  %v819_v29 = vld [vmem:[#allocation6 + $0x1528] sm:$0xff] }
 0x184   :  { %5166 = vmatprep.subr.bf16.mxu0 %v6086_v61  ;;  %v6206_v61 = vcombine.high %v339_v50, %v351_v51  ;;  %v831_v30 = vld [vmem:[#allocation6 + $0x1588] sm:$0xff] }
 0x185   :  { %5206 = vmatpush1.bf16.msra.mxu1 %v6445_v60  ;;  %v6565_v60 = vcombine.low %v699_v34, %v711_v36  ;;  %v6686_v34 = vcombine.high %v819_v29, %v831_v30  ;;  %v459_v36 = vld [vmem:[#allocation6 + $0x9e8] sm:$0xff] }
 0x186   :  { %5207 = vmatprep.subr.bf16.mxu1 %v6470_v0  ;;  %v6590_v0 = vcombine.high %v723_v55, %v735_v56 }
 0x187   :  { %5167 = vmatpush1.bf16.msra.mxu0 %v6085_v5  ;;  %v6205_v5 = vcombine.low %v339_v50, %v351_v51 }
 0x188   :  { %5168 = vmatprep.subr.bf16.mxu0 %v6110_v7  ;;  %v6230_v7 = vcombine.high %v363_v1, %v375_v2 }
 0x189   :  { %5208 = vmatpush1.bf16.msra.mxu1 %v6469_v6  ;;  %v6589_v6 = vcombine.low %v723_v55, %v735_v56  ;;  %v507_v55 = vld [vmem:[#allocation6 + $0xb68] sm:$0xff] }
 0x18a   :  { %5209 = vmatprep.subr.bf16.mxu1 %v6494_v8  ;;  %v6614_v8 = vcombine.high %v747_v3, %v759_v4  ;;  %v519_v56 = vld [vmem:[#allocation6 + $0xbc8] sm:$0xff] }
 0x18b   :  { %5169 = vmatpush1.bf16.msra.mxu0 %v6109_v13  ;;  %v6229_v13 = vcombine.low %v363_v1, %v375_v2  ;;  %v6374_v1 = vcombine.high %v507_v55, %v519_v56 }
 0x18c   :  { %5170 = vmatprep.subr.bf16.mxu0 %v6134_v16  ;;  %v6254_v16 = vcombine.high %v387_v9, %v399_v10 }
 0x18d   :  { %5210 = vmatpush1.bf16.msra.mxu1 %v6493_v14  ;;  %v4866_v26 = vpop.f32.mrb[4].mxu0  ;;  %v6613_v14 = vcombine.low %v747_v3, %v759_v4  ;;  %v148_v3 = vld [vmem:[#allocation6 + $0x30] sm:$0xff] }
 0x18e   :  { %5211 = vmatprep.subr.bf16.mxu1 %v6518_v19  ;;  %v4868_v32 = vpop.f32.mrb[5].mxu0  ;;  %v6638_v19 = vcombine.high %v771_v11, %v783_v12  ;;  %v160_v4 = vld [vmem:[#allocation6 + $0x90] sm:$0xff] }
 0x18f   :  { %v4907_v31 = vpop.f32.mrb[4].mxu1  ;;  %v4870_v39 = vpop.f32.mrb[6].mxu0  ;;  %5171 = vmatpush1.bf16.msra.mxu0 %v6133_v23  ;;  %v6253_v23 = vcombine.low %v387_v9, %v399_v10  ;;  %v6016_v9 = vcombine.high %v148_v3, %v160_v4 }
 0x190   :  { %v4908_v37 = vadd.f32 %v4907_v31, %v4866_v26  ;;  %v4909_v38 = vpop.f32.mrb[5].mxu1  ;;  %v4871_v63 = vpop.f32.mrb[7].mxu0  ;;  %5172 = vmatprep.subr.bf16.mxu0 %v6158_v25  ;;  %v6278_v25 = vcombine.high %v411_v20, %v423_v21  ;;  %v6662_v26 = vcombine.high %v795_v22, %v807_v59  ;;  %v6277_v31 = vcombine.low %v411_v20, %v423_v21  ;;  %v855_v39 = vld [vmem:[#allocation6 + $0x1648] sm:$0xff] }
 0x191   :  { %v4910_v53 = vadd.f32 %v4909_v38, %v4868_v32  ;;  %v4911_v42 = vpop.f32.mrb[6].mxu1  ;;  %5212 = vmatpush1.bf16.msra.mxu1 %v6517_v24  ;;  %v6637_v24 = vcombine.low %v771_v11, %v783_v12  ;;  %v6661_v32 = vcombine.low %v795_v22, %v807_v59  ;;  %v843_v38 = vld [vmem:[#allocation6 + $0x15e8] sm:$0xff]  ;;  %v172_v11 = vld [vmem:[#allocation6 + $0xf0] sm:$0xff] }
 0x192   :  { %v5937_v47 = vadd.f32 %v5826_v27, %v4908_v37  ;;  %v4912_v48 = vpop.f32.mrb[7].mxu1  ;;  %5213 = vmatprep.subr.bf16.mxu1 %v6542_v28  ;;  %v435_v27 = vld [vmem:[#allocation6 + $0x928] sm:$0xff]  ;;  %v6710_v63 = vcombine.high %v843_v38, %v855_v39  ;;  %v6709_v50 = vcombine.low %v843_v38, %v855_v39  ;;  %v184_v12 = vld [vmem:[#allocation6 + $0x150] sm:$0xff] }
 0x193   :  { %v5938_v52 = vadd.f32 %v5830_v33, %v4910_v53  ;;  %5173 = vmatpush1.bf16.msra.mxu0 %v6157_v41  ;;  %v447_v28 = vld [vmem:[#allocation6 + $0x988] sm:$0xff]  ;;  %v6685_v53 = vcombine.low %v819_v29, %v831_v30  ;;  %v6040_v20 = vcombine.high %v172_v11, %v184_v12  ;;  %v196_v22 = vld [vmem:[#allocation6 + $0x1b0] sm:$0xff] }
 0x194   :  { %5961 = vst [vmem:[#allocation9 + $0x10] sm:$0xff] %v5937_v47  ;;  %5174 = vmatprep.subr.bf16.mxu0 %v6182_v44  ;;  %v6302_v33 = vcombine.high %v435_v27, %v447_v28  ;;  %v471_v37 = vld [vmem:[#allocation6 + $0xa48] sm:$0xff]  ;;  %v6301_v41 = vcombine.low %v435_v27, %v447_v28  ;;  %v208_v59 = vld [vmem:[#allocation6 + $0x210] sm:$0xff] }
 0x195   :  { %5962 = vst [vmem:[#allocation9 + $0x18] sm:$0xff] %v5938_v52  ;;  %5214 = vmatpush1.bf16.msra.mxu1 %v6541_v43  ;;  %v6326_v42 = vcombine.high %v459_v36, %v471_v37  ;;  %v483_v43 = vld [vmem:[#allocation6 + $0xaa8] sm:$0xff]  ;;  %v6064_v27 = vcombine.high %v196_v22, %v208_v59  ;;  %v220_v29 = vld [vmem:[#allocation6 + $0x270] sm:$0xff] }
 0x196   :  { %5215 = vmatprep.subr.bf16.mxu1 %v6566_v49  ;;  %v495_v44 = vld [vmem:[#allocation6 + $0xb08] sm:$0xff]  ;;  %v6325_v49 = vcombine.low %v459_v36, %v471_v37  ;;  %v232_v30 = vld [vmem:[#allocation6 + $0x2d0] sm:$0xff] }
 0x197   :  { %5175 = vmatpush1.bf16.msra.mxu0 %v6181_v57  ;;  %v867_v47 = vld [vmem:[#allocation6 + $0x16a8] sm:$0xff]  ;;  %v6350_v51 = vcombine.high %v483_v43, %v495_v44  ;;  %v6088_v36 = vcombine.high %v220_v29, %v232_v30  ;;  %v244_v38 = vld [vmem:[#allocation6 + $0x330] sm:$0xff] }
 0x198   :  { %5176 = vmatprep.subr.bf16.mxu0 %v6206_v61  ;;  %v879_v48 = vld [vmem:[#allocation6 + $0x1708] sm:$0xff]  ;;  %v6349_v61 = vcombine.low %v483_v43, %v495_v44  ;;  %v256_v39 = vld [vmem:[#allocation6 + $0x390] sm:$0xff] }
 0x199   :  { %5216 = vmatpush1.bf16.msra.mxu1 %v6565_v60  ;;  %v6734_v52 = vcombine.high %v867_v47, %v879_v48  ;;  %v891_v57 = vld [vmem:[#allocation6 + $0x1768] sm:$0xff]  ;;  %v6112_v43 = vcombine.high %v244_v38, %v256_v39 }
 0x19a   :  { %5217 = vmatprep.subr.bf16.mxu1 %v6590_v0  ;;  %v903_v60 = vld [vmem:[#allocation6 + $0x17c8] sm:$0xff]  ;;  %v6733_v0 = vcombine.low %v867_v47, %v879_v48  ;;  %v268_v47 = vld [vmem:[#allocation6 + $0x3f0] sm:$0xff] }
 0x19b   :  { %5177 = vmatpush1.bf16.msra.mxu0 %v6205_v5  ;;  %v6758_v2 = vcombine.high %v891_v57, %v903_v60  ;;  %v532_v5 = vld [vmem:[#allocation6 + $0xc30] sm:$0xff] }
 0x19c   :  { %5178 = vmatprep.subr.bf16.mxu0 %v6230_v7  ;;  %v6373_v7 = vcombine.low %v507_v55, %v519_v56  ;;  %v280_v48 = vld [vmem:[#allocation6 + $0x450] sm:$0xff]  ;;  %v7034_v56 = vsub.s32 4, %v7001_v35 }
 0x19d   :  { %5218 = vmatpush1.bf16.msra.mxu1 %v6589_v6  ;;  %v544_v6 = vld [vmem:[#allocation6 + $0xc90] sm:$0xff]  ;;  %v6136_v55 = vcombine.high %v268_v47, %v280_v48 }
 0x19e   :  { %5219 = vmatprep.subr.bf16.mxu1 %v6614_v8  ;;  %v6757_v8 = vcombine.low %v891_v57, %v903_v60  ;;  %v6400_v10 = vcombine.high %v532_v5, %v544_v6  ;;  %v292_v60 = vld [vmem:[#allocation6 + $0x4b0] sm:$0xff] }
 0x19f   :  { %5179 = vmatpush1.bf16.msra.mxu0 %v6229_v13  ;;  %v556_v13 = vld [vmem:[#allocation6 + $0xcf0] sm:$0xff] }
 0x1a0   :  { %5180 = vmatprep.subr.bf16.mxu0 %v6254_v16  ;;  %v6015_v16 = vcombine.low %v148_v3, %v160_v4  ;;  %v6135_v3 = vcombine.low %v268_v47, %v280_v48  ;;  %v388_v48 = vld [vmem:[#allocation6 + $0x7b0] sm:$0xff] }
 0x1a1   :  { %5220 = vmatpush1.bf16.msra.mxu1 %v6613_v14  ;;  %v568_v14 = vld [vmem:[#allocation6 + $0xd50] sm:$0xff] }
 0x1a2   :  { %5221 = vmatprep.subr.bf16.mxu1 %v6638_v19  ;;  %v6399_v19 = vcombine.low %v532_v5, %v544_v6  ;;  %v6424_v21 = vcombine.high %v556_v13, %v568_v14 }
 0x1a3   :  { %5181 = vmatpush1.bf16.msra.mxu0 %v6253_v23  ;;  %v580_v23 = vld [vmem:[#allocation6 + $0xdb0] sm:$0xff] }
 0x1a4   :  { %5182 = vmatprep.subr.bf16.mxu0 %v6278_v25  ;;  %v6039_v25 = vcombine.low %v172_v11, %v184_v12 }
 0x1a5   :  { %5222 = vmatpush1.bf16.msra.mxu1 %v6637_v24  ;;  %v592_v24 = vld [vmem:[#allocation6 + $0xe10] sm:$0xff] }
 0x1a6   :  { %5223 = vmatprep.subr.bf16.mxu1 %v6662_v26  ;;  %v6423_v26 = vcombine.low %v556_v13, %v568_v14  ;;  %v6448_v28 = vcombine.high %v580_v23, %v592_v24  ;;  %v700_v14 = vld [vmem:[#allocation6 + $0x1170] sm:$0xff] }
 0x1a7   :  { %5183 = vmatpush1.bf16.msra.mxu0 %v6277_v31  ;;  %v604_v31 = vld [vmem:[#allocation6 + $0xe70] sm:$0xff] }
 0x1a8   :  { %5184 = vmatprep.subr.bf16.mxu0 %v6302_v33  ;;  %v6063_v33 = vcombine.low %v196_v22, %v208_v59 }
 0x1a9   :  { %5224 = vmatpush1.bf16.msra.mxu1 %v6661_v32  ;;  %v616_v32 = vld [vmem:[#allocation6 + $0xed0] sm:$0xff] }
 0x1aa   :  { %5225 = vmatprep.subr.bf16.mxu1 %v6686_v34  ;;  %v6447_v34 = vcombine.low %v580_v23, %v592_v24  ;;  %v6472_v37 = vcombine.high %v604_v31, %v616_v32 }
 0x1ab   :  { %5185 = vmatpush1.bf16.msra.mxu0 %v6301_v41  ;;  %v628_v41 = vld [vmem:[#allocation6 + $0xf30] sm:$0xff] }
 0x1ac   :  { %5186 = vmatprep.subr.bf16.mxu0 %v6326_v42  ;;  %v6087_v42 = vcombine.low %v220_v29, %v232_v30  ;;  %v340_v30 = vld [vmem:[#allocation6 + $0x630] sm:$0xff] }
 0x1ad   :  { %5226 = vmatpush1.bf16.msra.mxu1 %v6685_v53  ;;  %v640_v53 = vld [vmem:[#allocation6 + $0xf90] sm:$0xff] }
 0x1ae   :  { %5227 = vmatprep.subr.bf16.mxu1 %v6710_v63  ;;  %v6471_v63 = vcombine.low %v604_v31, %v616_v32  ;;  %v6496_v44 = vcombine.high %v628_v41, %v640_v53  ;;  %v724_v32 = vld [vmem:[#allocation6 + $0x1230] sm:$0xff] }
 0x1af   :  { %5187 = vmatpush1.bf16.msra.mxu0 %v6325_v49  ;;  %v652_v49 = vld [vmem:[#allocation6 + $0xff0] sm:$0xff] }
 0x1b0   :  { %5188 = vmatprep.subr.bf16.mxu0 %v6350_v51  ;;  %v6111_v51 = vcombine.low %v244_v38, %v256_v39  ;;  %v364_v39 = vld [vmem:[#allocation6 + $0x6f0] sm:$0xff] }
 0x1b1   :  { %5228 = vmatpush1.bf16.msra.mxu1 %v6709_v50  ;;  %v664_v50 = vld [vmem:[#allocation6 + $0x1050] sm:$0xff] }
 0x1b2   :  { %5229 = vmatprep.subr.bf16.mxu1 %v6734_v52  ;;  %v6495_v52 = vcombine.low %v628_v41, %v640_v53  ;;  %v6520_v57 = vcombine.high %v652_v49, %v664_v50  ;;  %v6519_v4 = vcombine.low %v652_v49, %v664_v50  ;;  %v376_v41 = vld [vmem:[#allocation6 + $0x750] sm:$0xff] }
 0x1b3   :  { %5189 = vmatpush1.bf16.msra.mxu0 %v6349_v61  ;;  %v304_v61 = vld [vmem:[#allocation6 + $0x510] sm:$0xff] }
 0x1b4   :  { %5190 = vmatprep.subr.bf16.mxu0 %v6374_v1  ;;  %v676_v1 = vld [vmem:[#allocation6 + $0x10b0] sm:$0xff]  ;;  %v6160_v5 = vcombine.high %v292_v60, %v304_v61  ;;  %v6159_v22 = vcombine.low %v292_v60, %v304_v61 }
 0x1b5   :  { %5230 = vmatpush1.bf16.msra.mxu1 %v6733_v0  ;;  %v7037_v0 = vsub.s32 5, %v7001_v35  ;;  %v748_v53 = vld [vmem:[#allocation6 + $0x12f0] sm:$0xff] }
 0x1b6   :  { %5231 = vmatprep.subr.bf16.mxu1 %v6758_v2  ;;  %v688_v2 = vld [vmem:[#allocation6 + $0x1110] sm:$0xff] }
 0x1b7   :  { %5191 = vmatpush1.bf16.msra.mxu0 %v6373_v7  ;;  %v5834_v7 = vrot.slane %v7006_v45, %v7034_v56  ;;  %v5838_v13 = vrot.slane %v7006_v45, %v7037_v0  ;;  %v352_v45 = vld [vmem:[#allocation6 + $0x690] sm:$0xff] }
 0x1b8   :  { %5242 = vmatprep.subr.bf16.mxu0 %v6016_v9  ;;  %v316_v9 = vld [vmem:[#allocation6 + $0x570] sm:$0xff] }
 0x1b9   :  { %5232 = vmatpush1.bf16.msra.mxu1 %v6757_v8  ;;  %v6544_v8 = vcombine.high %v676_v1, %v688_v2  ;;  %v400_v49 = vld [vmem:[#allocation6 + $0x810] sm:$0xff] }
 0x1ba   :  { %5283 = vmatprep.subr.bf16.mxu1 %v6400_v10  ;;  %5193 = vmatmul.mubr.bf16.vlgmr.msra.gmra.mrb[20].mxu0 %v6981_v40  ;;  %v328_v10 = vld [vmem:[#allocation6 + $0x5d0] sm:$0xff] }
 0x1bb   :  { %5243 = vmatpush1.bf16.msra.mxu0 %v6015_v16  ;;  %5274 = vmatprep.mubr.bf16.mxu0 %v6971_v15  ;;  %v712_v16 = vld [vmem:[#allocation6 + $0x11d0] sm:$0xff] }
 0x1bc   :  { %5234 = vmatmul.mubr.bf16.vlgmr.msra.gmra.mrb[20].mxu1 %v6983_v62  ;;  %5244 = vmatprep.subr.bf16.mxu0 %v6040_v20  ;;  %v6568_v29 = vcombine.high %v700_v14, %v712_v16  ;;  %v772_v50 = vld [vmem:[#allocation6 + $0x13b0] sm:$0xff] }
 0x1bd   :  { %5284 = vmatpush1.bf16.msra.mxu1 %v6399_v19  ;;  %5315 = vmatprep.mubr.bf16.mxu1 %v6973_v18  ;;  %v412_v61 = vld [vmem:[#allocation6 + $0x870] sm:$0xff] }
 0x1be   :  { %5285 = vmatprep.subr.bf16.mxu1 %v6424_v21 }
 0x1bf   :  { %5245 = vmatpush1.bf16.msra.mxu0 %v6039_v25  ;;  %v6543_v25 = vcombine.low %v676_v1, %v688_v2  ;;  %v424_v1 = vld [vmem:[#allocation6 + $0x8d0] sm:$0xff] }
 0x1c0   :  { %5246 = vmatprep.subr.bf16.mxu0 %v6064_v27  ;;  %v796_v2 = vld [vmem:[#allocation6 + $0x1470] sm:$0xff] }
 0x1c1   :  { %5286 = vmatpush1.bf16.msra.mxu1 %v6423_v26  ;;  %v6184_v26 = vcombine.high %v316_v9, %v328_v10 }
 0x1c2   :  { %5287 = vmatprep.subr.bf16.mxu1 %v6448_v28 }
 0x1c3   :  { %5247 = vmatpush1.bf16.msra.mxu0 %v6063_v33  ;;  %v736_v33 = vld [vmem:[#allocation6 + $0x1290] sm:$0xff] }
 0x1c4   :  { %5248 = vmatprep.subr.bf16.mxu0 %v6088_v36  ;;  %v6567_v36 = vcombine.low %v700_v14, %v712_v16  ;;  %v6592_v38 = vcombine.high %v724_v32, %v736_v33 }
 0x1c5   :  { %5288 = vmatpush1.bf16.msra.mxu1 %v6447_v34  ;;  %v6183_v34 = vcombine.low %v316_v9, %v328_v10  ;;  %v448_v9 = vld [vmem:[#allocation6 + $0x990] sm:$0xff] }
 0x1c6   :  { %5289 = vmatprep.subr.bf16.mxu1 %v6472_v37  ;;  %v6208_v37 = vcombine.high %v340_v30, %v352_v45  ;;  %v820_v10 = vld [vmem:[#allocation6 + $0x1530] sm:$0xff] }
 0x1c7   :  { %5249 = vmatpush1.bf16.msra.mxu0 %v6087_v42  ;;  %v760_v42 = vld [vmem:[#allocation6 + $0x1350] sm:$0xff] }
 0x1c8   :  { %5250 = vmatprep.subr.bf16.mxu0 %v6112_v43  ;;  %v6591_v43 = vcombine.low %v724_v32, %v736_v33  ;;  %v6616_v47 = vcombine.high %v748_v53, %v760_v42  ;;  %v508_v33 = vld [vmem:[#allocation6 + $0xb70] sm:$0xff] }
 0x1c9   :  { %5290 = vmatpush1.bf16.msra.mxu1 %v6471_v63  ;;  %v6207_v63 = vcombine.low %v340_v30, %v352_v45 }
 0x1ca   :  { %5291 = vmatprep.subr.bf16.mxu1 %v6496_v44  ;;  %v6232_v44 = vcombine.high %v364_v39, %v376_v41 }
 0x1cb   :  { %5251 = vmatpush1.bf16.msra.mxu0 %v6111_v51  ;;  %v784_v51 = vld [vmem:[#allocation6 + $0x1410] sm:$0xff] }
 0x1cc   :  { %5252 = vmatprep.subr.bf16.mxu0 %v6136_v55  ;;  %v6615_v55 = vcombine.low %v748_v53, %v760_v42  ;;  %v6640_v60 = vcombine.high %v772_v50, %v784_v51  ;;  %v149_v42 = vld [vmem:[#allocation6 + $0x38] sm:$0xff] }
 0x1cd   :  { %5292 = vmatpush1.bf16.msra.mxu1 %v6495_v52  ;;  %v4948_v6 = vpop.f32.mrb[8].mxu0  ;;  %v6231_v52 = vcombine.low %v364_v39, %v376_v41 }
 0x1ce   :  { %5293 = vmatprep.subr.bf16.mxu1 %v6520_v57  ;;  %v4950_v12 = vpop.f32.mrb[9].mxu0  ;;  %v6256_v57 = vcombine.high %v388_v48, %v400_v49 }
 0x1cf   :  { %v4989_v11 = vpop.f32.mrb[8].mxu1  ;;  %v4952_v21 = vpop.f32.mrb[10].mxu0  ;;  %5253 = vmatpush1.bf16.msra.mxu0 %v6135_v3  ;;  %v808_v3 = vld [vmem:[#allocation6 + $0x14d0] sm:$0xff] }
 0x1d0   :  { %v4990_v19 = vadd.f32 %v4989_v11, %v4948_v6  ;;  %v4991_v20 = vpop.f32.mrb[9].mxu1  ;;  %v4953_v24 = vpop.f32.mrb[11].mxu0  ;;  %5254 = vmatprep.subr.bf16.mxu0 %v6160_v5  ;;  %v6639_v5 = vcombine.low %v772_v50, %v784_v51  ;;  %v6280_v6 = vcombine.high %v412_v61, %v424_v1  ;;  %v832_v11 = vld [vmem:[#allocation6 + $0x1590] sm:$0xff]  ;;  %v173_v51 = vld [vmem:[#allocation6 + $0xf8] sm:$0xff] }
 0x1d1   :  { %v4992_v59 = vadd.f32 %v4991_v20, %v4950_v12  ;;  %v4993_v23 = vpop.f32.mrb[10].mxu1  ;;  %5294 = vmatpush1.bf16.msra.mxu1 %v6519_v4  ;;  %v6255_v4 = vcombine.low %v388_v48, %v400_v49  ;;  %v6279_v12 = vcombine.low %v412_v61, %v424_v1  ;;  %v6688_v16 = vcombine.high %v820_v10, %v832_v11  ;;  %v472_v20 = vld [vmem:[#allocation6 + $0xa50] sm:$0xff] }
 0x1d2   :  { %v5939_v27 = vadd.f32 %v5834_v7, %v4990_v19  ;;  %v4994_v28 = vpop.f32.mrb[11].mxu1  ;;  %5295 = vmatprep.subr.bf16.mxu1 %v6544_v8  ;;  %v6664_v7 = vcombine.high %v796_v2, %v808_v3  ;;  %v436_v8 = vld [vmem:[#allocation6 + $0x930] sm:$0xff]  ;;  %v6687_v23 = vcombine.low %v820_v10, %v832_v11  ;;  %v221_v11 = vld [vmem:[#allocation6 + $0x278] sm:$0xff] }
 0x1d3   :  { %v5940_v31 = vadd.f32 %v5838_v13, %v4992_v59  ;;  %5255 = vmatpush1.bf16.msra.mxu0 %v6159_v22  ;;  %v6663_v13 = vcombine.low %v796_v2, %v808_v3  ;;  %v6304_v14 = vcombine.high %v436_v8, %v448_v9  ;;  %v460_v19 = vld [vmem:[#allocation6 + $0x9f0] sm:$0xff]  ;;  %v6303_v59 = vcombine.low %v436_v8, %v448_v9  ;;  %v197_v3 = vld [vmem:[#allocation6 + $0x1b8] sm:$0xff] }
 0x1d4   :  { %5963 = vst [vmem:[#allocation9 + $0x20] sm:$0xff] %v5939_v27  ;;  %5256 = vmatprep.subr.bf16.mxu0 %v6184_v26  ;;  %v844_v21 = vld [vmem:[#allocation6 + $0x15f0] sm:$0xff]  ;;  %v6328_v24 = vcombine.high %v460_v19, %v472_v20  ;;  %v6327_v30 = vcombine.low %v460_v19, %v472_v20 }
 0x1d5   :  { %5964 = vst [vmem:[#allocation9 + $0x28] sm:$0xff] %v5940_v31  ;;  %5296 = vmatpush1.bf16.msra.mxu1 %v6543_v25  ;;  %v856_v22 = vld [vmem:[#allocation6 + $0x1650] sm:$0xff] }
 0x1d6   :  { %5297 = vmatprep.subr.bf16.mxu1 %v6568_v29  ;;  %v6712_v25 = vcombine.high %v844_v21, %v856_v22  ;;  %v484_v26 = vld [vmem:[#allocation6 + $0xab0] sm:$0xff]  ;;  %v6711_v45 = vcombine.low %v844_v21, %v856_v22  ;;  %v245_v22 = vld [vmem:[#allocation6 + $0x338] sm:$0xff] }
 0x1d7   :  { %5257 = vmatpush1.bf16.msra.mxu0 %v6183_v34  ;;  %v496_v27 = vld [vmem:[#allocation6 + $0xb10] sm:$0xff] }
 0x1d8   :  { %5258 = vmatprep.subr.bf16.mxu0 %v6208_v37  ;;  %v868_v28 = vld [vmem:[#allocation6 + $0x16b0] sm:$0xff]  ;;  %v6352_v31 = vcombine.high %v484_v26, %v496_v27 }
 0x1d9   :  { %5298 = vmatpush1.bf16.msra.mxu1 %v6567_v36  ;;  %v880_v29 = vld [vmem:[#allocation6 + $0x1710] sm:$0xff] }
 0x1da   :  { %5299 = vmatprep.subr.bf16.mxu1 %v6592_v38  ;;  %v6736_v32 = vcombine.high %v868_v28, %v880_v29  ;;  %v520_v34 = vld [vmem:[#allocation6 + $0xbd0] sm:$0xff]  ;;  %v6351_v38 = vcombine.low %v484_v26, %v496_v27  ;;  %v6735_v39 = vcombine.low %v868_v28, %v880_v29  ;;  %v269_v29 = vld [vmem:[#allocation6 + $0x3f8] sm:$0xff] }
 0x1db   :  { %5259 = vmatpush1.bf16.msra.mxu0 %v6207_v63  ;;  %v892_v36 = vld [vmem:[#allocation6 + $0x1770] sm:$0xff]  ;;  %v6376_v41 = vcombine.high %v508_v33, %v520_v34  ;;  %v161_v63 = vld [vmem:[#allocation6 + $0x98] sm:$0xff] }
 0x1dc   :  { %5260 = vmatprep.subr.bf16.mxu0 %v6232_v44  ;;  %v904_v37 = vld [vmem:[#allocation6 + $0x17d0] sm:$0xff]  ;;  %v545_v44 = vld [vmem:[#allocation6 + $0xc98] sm:$0xff]  ;;  %v6018_v49 = vcombine.high %v149_v42, %v161_v63 }
 0x1dd   :  { %5300 = vmatpush1.bf16.msra.mxu1 %v6591_v43  ;;  %v6760_v53 = vcombine.high %v892_v36, %v904_v37  ;;  %v533_v43 = vld [vmem:[#allocation6 + $0xc38] sm:$0xff]  ;;  %v6759_v48 = vcombine.low %v892_v36, %v904_v37  ;;  %v7048_v36 = vsub.s32 6, %v7001_v35 }
 0x1de   :  { %5301 = vmatprep.subr.bf16.mxu1 %v6616_v47  ;;  %v6375_v47 = vcombine.low %v508_v33, %v520_v34  ;;  %v6402_v50 = vcombine.high %v533_v43, %v545_v44  ;;  %v6401_v61 = vcombine.low %v533_v43, %v545_v44 }
 0x1df   :  { %5261 = vmatpush1.bf16.msra.mxu0 %v6231_v52  ;;  %v185_v52 = vld [vmem:[#allocation6 + $0x158] sm:$0xff] }
 0x1e0   :  { %5262 = vmatprep.subr.bf16.mxu0 %v6256_v57  ;;  %v569_v57 = vld [vmem:[#allocation6 + $0xd58] sm:$0xff]  ;;  %v6042_v1 = vcombine.high %v173_v51, %v185_v52 }
 0x1e1   :  { %5302 = vmatpush1.bf16.msra.mxu1 %v6615_v55  ;;  %v557_v55 = vld [vmem:[#allocation6 + $0xcf8] sm:$0xff] }
 0x1e2   :  { %5303 = vmatprep.subr.bf16.mxu1 %v6640_v60  ;;  %v6017_v60 = vcombine.low %v149_v42, %v161_v63  ;;  %v6426_v2 = vcombine.high %v557_v55, %v569_v57  ;;  %v6425_v8 = vcombine.low %v557_v55, %v569_v57  ;;  %v689_v42 = vld [vmem:[#allocation6 + $0x1118] sm:$0xff] }
 0x1e3   :  { %5263 = vmatpush1.bf16.msra.mxu0 %v6255_v4  ;;  %v209_v4 = vld [vmem:[#allocation6 + $0x218] sm:$0xff] }
 0x1e4   :  { %5264 = vmatprep.subr.bf16.mxu0 %v6280_v6  ;;  %v593_v6 = vld [vmem:[#allocation6 + $0xe18] sm:$0xff]  ;;  %v6066_v9 = vcombine.high %v197_v3, %v209_v4 }
 0x1e5   :  { %5304 = vmatpush1.bf16.msra.mxu1 %v6639_v5  ;;  %v581_v5 = vld [vmem:[#allocation6 + $0xdb8] sm:$0xff] }
 0x1e6   :  { %5305 = vmatprep.subr.bf16.mxu1 %v6664_v7  ;;  %v6041_v7 = vcombine.low %v173_v51, %v185_v52  ;;  %v6450_v10 = vcombine.high %v581_v5, %v593_v6  ;;  %v6449_v19 = vcombine.low %v581_v5, %v593_v6  ;;  %v317_v51 = vld [vmem:[#allocation6 + $0x578] sm:$0xff] }
 0x1e7   :  { %5265 = vmatpush1.bf16.msra.mxu0 %v6279_v12  ;;  %v233_v12 = vld [vmem:[#allocation6 + $0x2d8] sm:$0xff] }
 0x1e8   :  { %5266 = vmatprep.subr.bf16.mxu0 %v6304_v14  ;;  %v617_v14 = vld [vmem:[#allocation6 + $0xed8] sm:$0xff]  ;;  %v6090_v20 = vcombine.high %v221_v11, %v233_v12 }
 0x1e9   :  { %5306 = vmatpush1.bf16.msra.mxu1 %v6663_v13  ;;  %v605_v13 = vld [vmem:[#allocation6 + $0xe78] sm:$0xff] }
 0x1ea   :  { %5307 = vmatprep.subr.bf16.mxu1 %v6688_v16  ;;  %v6065_v16 = vcombine.low %v197_v3, %v209_v4  ;;  %v6474_v21 = vcombine.high %v605_v13, %v617_v14  ;;  %v6473_v26 = vcombine.low %v605_v13, %v617_v14  ;;  %v329_v52 = vld [vmem:[#allocation6 + $0x5d8] sm:$0xff] }
 0x1eb   :  { %5267 = vmatpush1.bf16.msra.mxu0 %v6303_v59  ;;  %v257_v59 = vld [vmem:[#allocation6 + $0x398] sm:$0xff] }
 0x1ec   :  { %5268 = vmatprep.subr.bf16.mxu0 %v6328_v24  ;;  %v641_v24 = vld [vmem:[#allocation6 + $0xf98] sm:$0xff]  ;;  %v6114_v27 = vcombine.high %v245_v22, %v257_v59 }
 0x1ed   :  { %5308 = vmatpush1.bf16.msra.mxu1 %v6687_v23  ;;  %v629_v23 = vld [vmem:[#allocation6 + $0xf38] sm:$0xff] }
 0x1ee   :  { %5309 = vmatprep.subr.bf16.mxu1 %v6712_v25  ;;  %v6089_v25 = vcombine.low %v221_v11, %v233_v12  ;;  %v6498_v28 = vcombine.high %v629_v23, %v641_v24  ;;  %v6497_v33 = vcombine.low %v629_v23, %v641_v24  ;;  %v341_v13 = vld [vmem:[#allocation6 + $0x638] sm:$0xff] }
 0x1ef   :  { %5269 = vmatpush1.bf16.msra.mxu0 %v6327_v30  ;;  %v281_v30 = vld [vmem:[#allocation6 + $0x458] sm:$0xff] }
 0x1f0   :  { %5270 = vmatprep.subr.bf16.mxu0 %v6352_v31  ;;  %v665_v31 = vld [vmem:[#allocation6 + $0x1058] sm:$0xff]  ;;  %v6138_v34 = vcombine.high %v269_v29, %v281_v30  ;;  %v6137_v63 = vcombine.low %v269_v29, %v281_v30 }
 0x1f1   :  { %5310 = vmatpush1.bf16.msra.mxu1 %v6711_v45  ;;  %v653_v45 = vld [vmem:[#allocation6 + $0xff8] sm:$0xff] }
 0x1f2   :  { %5311 = vmatprep.subr.bf16.mxu1 %v6736_v32  ;;  %v6113_v32 = vcombine.low %v245_v22, %v257_v59  ;;  %v6522_v37 = vcombine.high %v653_v45, %v665_v31  ;;  %v6521_v43 = vcombine.low %v653_v45, %v665_v31  ;;  %v353_v14 = vld [vmem:[#allocation6 + $0x698] sm:$0xff] }
 0x1f3   :  { %5271 = vmatpush1.bf16.msra.mxu0 %v6351_v38  ;;  %v293_v38 = vld [vmem:[#allocation6 + $0x4b8] sm:$0xff]  ;;  %v6210_v59 = vcombine.high %v341_v13, %v353_v14 }
 0x1f4   :  { %5272 = vmatprep.subr.bf16.mxu0 %v6376_v41  ;;  %v7051_v41 = vsub.s32 7, %v7001_v35  ;;  %v365_v24 = vld [vmem:[#allocation6 + $0x6f8] sm:$0xff] }
 0x1f5   :  { %5312 = vmatpush1.bf16.msra.mxu1 %v6735_v39  ;;  %v305_v39 = vld [vmem:[#allocation6 + $0x518] sm:$0xff] }
 0x1f6   :  { %5313 = vmatprep.subr.bf16.mxu1 %v6760_v53  ;;  %v677_v53 = vld [vmem:[#allocation6 + $0x10b8] sm:$0xff]  ;;  %v6162_v44 = vcombine.high %v293_v38, %v305_v39  ;;  %v6161_v4 = vcombine.low %v293_v38, %v305_v39 }
 0x1f7   :  { %5273 = vmatpush1.bf16.msra.mxu0 %v6375_v47  ;;  %v389_v31 = vld [vmem:[#allocation6 + $0x7b8] sm:$0xff] }
 0x1f8   :  { %5324 = vmatprep.subr.bf16.mxu0 %v6018_v49 }
 0x1f9   :  { %5314 = vmatpush1.bf16.msra.mxu1 %v6759_v48  ;;  %v6793_v48 = vld [vmem:[#allocation8] sm:$0xff] }
 0x1fa   :  { %5365 = vmatprep.subr.bf16.mxu1 %v6402_v50  ;;  %5275 = vmatmul.mubr.bf16.vlgmr.msra.gmra.mrb[24].mxu0 %v6981_v40  ;;  %v5842_v49 = vrot.slane %v6793_v48, %v7048_v36  ;;  %v6546_v50 = vcombine.high %v677_v53, %v689_v42  ;;  %v5846_v35 = vrot.slane %v6793_v48, %v7051_v41 }
 0x1fb   :  { %5325 = vmatpush1.bf16.msra.mxu0 %v6017_v60  ;;  %5356 = vmatprep.mubr.bf16.mxu0 %v6971_v15  ;;  %v701_v60 = vld [vmem:[#allocation6 + $0x1178] sm:$0xff] }
 0x1fc   :  { %5316 = vmatmul.mubr.bf16.vlgmr.msra.gmra.mrb[24].mxu1 %v6983_v62  ;;  %5326 = vmatprep.subr.bf16.mxu0 %v6042_v1 }
 0x1fd   :  { %5366 = vmatpush1.bf16.msra.mxu1 %v6401_v61  ;;  %5397 = vmatprep.mubr.bf16.mxu1 %v6973_v18  ;;  %v713_v61 = vld [vmem:[#allocation6 + $0x11d8] sm:$0xff] }
 0x1fe   :  { %5367 = vmatprep.subr.bf16.mxu1 %v6426_v2  ;;  %v6570_v12 = vcombine.high %v701_v60, %v713_v61  ;;  %v6569_v22 = vcombine.low %v701_v60, %v713_v61 }
 0x1ff   :  { %5327 = vmatpush1.bf16.msra.mxu0 %v6041_v7 }
 0x200   :  { %5328 = vmatprep.subr.bf16.mxu0 %v6066_v9  ;;  %v6186_v9 = vcombine.high %v317_v51, %v329_v52 }
 0x201   :  { %5368 = vmatpush1.bf16.msra.mxu1 %v6425_v8  ;;  %v6545_v8 = vcombine.low %v677_v53, %v689_v42  ;;  %v413_v42 = vld [vmem:[#allocation6 + $0x878] sm:$0xff] }
 0x202   :  { %5369 = vmatprep.subr.bf16.mxu1 %v6450_v10 }
 0x203   :  { %5329 = vmatpush1.bf16.msra.mxu0 %v6065_v16 }
 0x204   :  { %5330 = vmatprep.subr.bf16.mxu0 %v6090_v20  ;;  %v737_v20 = vld [vmem:[#allocation6 + $0x1298] sm:$0xff] }
 0x205   :  { %5370 = vmatpush1.bf16.msra.mxu1 %v6449_v19  ;;  %v725_v19 = vld [vmem:[#allocation6 + $0x1238] sm:$0xff] }
 0x206   :  { %5371 = vmatprep.subr.bf16.mxu1 %v6474_v21  ;;  %v6185_v21 = vcombine.low %v317_v51, %v329_v52  ;;  %v6594_v23 = vcombine.high %v725_v19, %v737_v20  ;;  %v6593_v29 = vcombine.low %v725_v19, %v737_v20  ;;  %v437_v51 = vld [vmem:[#allocation6 + $0x938] sm:$0xff] }
 0x207   :  { %5331 = vmatpush1.bf16.msra.mxu0 %v6089_v25  ;;  %v377_v25 = vld [vmem:[#allocation6 + $0x758] sm:$0xff] }
 0x208   :  { %5332 = vmatprep.subr.bf16.mxu0 %v6114_v27  ;;  %v761_v27 = vld [vmem:[#allocation6 + $0x1358] sm:$0xff]  ;;  %v6234_v30 = vcombine.high %v365_v24, %v377_v25 }
 0x209   :  { %5372 = vmatpush1.bf16.msra.mxu1 %v6473_v26  ;;  %v749_v26 = vld [vmem:[#allocation6 + $0x12f8] sm:$0xff] }
 0x20a   :  { %5373 = vmatprep.subr.bf16.mxu1 %v6498_v28  ;;  %v6209_v28 = vcombine.low %v341_v13, %v353_v14  ;;  %v6618_v45 = vcombine.high %v749_v26, %v761_v27  ;;  %v6617_v38 = vcombine.low %v749_v26, %v761_v27  ;;  %v449_v52 = vld [vmem:[#allocation6 + $0x998] sm:$0xff] }
 0x20b   :  { %5333 = vmatpush1.bf16.msra.mxu0 %v6113_v32  ;;  %v401_v32 = vld [vmem:[#allocation6 + $0x818] sm:$0xff]  ;;  %v6306_v61 = vcombine.high %v437_v51, %v449_v52 }
 0x20c   :  { %5334 = vmatprep.subr.bf16.mxu0 %v6138_v34  ;;  %v785_v34 = vld [vmem:[#allocation6 + $0x1418] sm:$0xff]  ;;  %v6258_v39 = vcombine.high %v389_v31, %v401_v32 }
 0x20d   :  { %5374 = vmatpush1.bf16.msra.mxu1 %v6497_v33  ;;  %v5030_v47 = vpop.f32.mrb[12].mxu0  ;;  %v773_v33 = vld [vmem:[#allocation6 + $0x13b8] sm:$0xff] }
 0x20e   :  { %5375 = vmatprep.subr.bf16.mxu1 %v6522_v37  ;;  %v5032_v57 = vpop.f32.mrb[13].mxu0  ;;  %v6233_v37 = vcombine.low %v365_v24, %v377_v25  ;;  %v6642_v53 = vcombine.high %v773_v33, %v785_v34  ;;  %v6641_v48 = vcombine.low %v773_v33, %v785_v34  ;;  %v881_v13 = vld [vmem:[#allocation6 + $0x1718] sm:$0xff] }
 0x20f   :  { %v5071_v55 = vpop.f32.mrb[12].mxu1  ;;  %v5034_v3 = vpop.f32.mrb[14].mxu0  ;;  %5335 = vmatpush1.bf16.msra.mxu0 %v6137_v63  ;;  %v425_v63 = vld [vmem:[#allocation6 + $0x8d8] sm:$0xff] }
 0x210   :  { %v5072_v1 = vadd.f32 %v5071_v55, %v5030_v47  ;;  %v5073_v2 = vpop.f32.mrb[13].mxu1  ;;  %v5035_v7 = vpop.f32.mrb[15].mxu0  ;;  %5336 = vmatprep.subr.bf16.mxu0 %v6162_v44  ;;  %v809_v44 = vld [vmem:[#allocation6 + $0x14d8] sm:$0xff]  ;;  %v6257_v47 = vcombine.low %v389_v31, %v401_v32 }
 0x211   :  { %v5074_v5 = vadd.f32 %v5073_v2, %v5032_v57  ;;  %v5075_v6 = vpop.f32.mrb[14].mxu1  ;;  %5376 = vmatpush1.bf16.msra.mxu1 %v6521_v43  ;;  %v797_v43 = vld [vmem:[#allocation6 + $0x1478] sm:$0xff] }
 0x212   :  { %v5941_v10 = vadd.f32 %v5842_v49, %v5072_v1  ;;  %v5076_v11 = vpop.f32.mrb[15].mxu1  ;;  %5377 = vmatprep.subr.bf16.mxu1 %v6546_v50  ;;  %v6282_v49 = vcombine.high %v413_v42, %v425_v63  ;;  %v6666_v50 = vcombine.high %v797_v43, %v809_v44  ;;  %v821_v55 = vld [vmem:[#allocation6 + $0x1538] sm:$0xff]  ;;  %v6665_v60 = vcombine.low %v797_v43, %v809_v44 }
 0x213   :  { %v5942_v16 = vadd.f32 %v5846_v35, %v5074_v5  ;;  %5337 = vmatpush1.bf16.msra.mxu0 %v6161_v4  ;;  %v833_v57 = vld [vmem:[#allocation6 + $0x1598] sm:$0xff]  ;;  %v6281_v35 = vcombine.low %v413_v42, %v425_v63  ;;  %v6305_v6 = vcombine.low %v437_v51, %v449_v52 }
 0x214   :  { %5965 = vst [vmem:[#allocation9 + $0x30] sm:$0xff] %v5941_v10  ;;  %5338 = vmatprep.subr.bf16.mxu0 %v6186_v9  ;;  %v6690_v1 = vcombine.high %v821_v55, %v833_v57  ;;  %v461_v2 = vld [vmem:[#allocation6 + $0x9f8] sm:$0xff]  ;;  %v6689_v7 = vcombine.low %v821_v55, %v833_v57 }
 0x215   :  { %5966 = vst [vmem:[#allocation9 + $0x38] sm:$0xff] %v5942_v16  ;;  %5378 = vmatpush1.bf16.msra.mxu1 %v6545_v8  ;;  %v473_v3 = vld [vmem:[#allocation6 + $0xa58] sm:$0xff] }
 0x216   :  { %5379 = vmatprep.subr.bf16.mxu1 %v6570_v12  ;;  %v845_v4 = vld [vmem:[#allocation6 + $0x15f8] sm:$0xff]  ;;  %v6330_v8 = vcombine.high %v461_v2, %v473_v3  ;;  %v6329_v14 = vcombine.low %v461_v2, %v473_v3 }
 0x217   :  { %5339 = vmatpush1.bf16.msra.mxu0 %v6185_v21  ;;  %v857_v5 = vld [vmem:[#allocation6 + $0x1658] sm:$0xff] }
 0x218   :  { %5340 = vmatprep.subr.bf16.mxu0 %v6210_v59  ;;  %v6714_v9 = vcombine.high %v845_v4, %v857_v5  ;;  %v485_v10 = vld [vmem:[#allocation6 + $0xab8] sm:$0xff]  ;;  %v6713_v16 = vcombine.low %v845_v4, %v857_v5 }
 0x219   :  { %5380 = vmatpush1.bf16.msra.mxu1 %v6569_v22  ;;  %v497_v11 = vld [vmem:[#allocation6 + $0xb18] sm:$0xff] }
 0x21a   :  { %5381 = vmatprep.subr.bf16.mxu1 %v6594_v23  ;;  %v869_v12 = vld [vmem:[#allocation6 + $0x16b8] sm:$0xff]  ;;  %v6354_v19 = vcombine.high %v485_v10, %v497_v11  ;;  %v6353_v24 = vcombine.low %v485_v10, %v497_v11 }
 0x21b   :  { %5341 = vmatpush1.bf16.msra.mxu0 %v6209_v28  ;;  %v6738_v20 = vcombine.high %v869_v12, %v881_v13  ;;  %v509_v21 = vld [vmem:[#allocation6 + $0xb78] sm:$0xff]  ;;  %v6737_v25 = vcombine.low %v869_v12, %v881_v13  ;;  %v150_v28 = vld [vmem:[#allocation6 + $0x40] sm:$0xff] }
 0x21c   :  { %5342 = vmatprep.subr.bf16.mxu0 %v6234_v30  ;;  %v521_v22 = vld [vmem:[#allocation6 + $0xbd8] sm:$0xff]  ;;  %v534_v30 = vld [vmem:[#allocation6 + $0xc40] sm:$0xff] }
 0x21d   :  { %5382 = vmatpush1.bf16.msra.mxu1 %v6593_v29  ;;  %v893_v59 = vld [vmem:[#allocation6 + $0x1778] sm:$0xff]  ;;  %v6378_v26 = vcombine.high %v509_v21, %v521_v22  ;;  %v162_v29 = vld [vmem:[#allocation6 + $0xa0] sm:$0xff]  ;;  %v6377_v31 = vcombine.low %v509_v21, %v521_v22 }
 0x21e   :  { %5383 = vmatprep.subr.bf16.mxu1 %v6618_v45  ;;  %v905_v23 = vld [vmem:[#allocation6 + $0x17d8] sm:$0xff]  ;;  %v546_v45 = vld [vmem:[#allocation6 + $0xca0] sm:$0xff]  ;;  %v6020_v33 = vcombine.high %v150_v28, %v162_v29  ;;  %v6019_v42 = vcombine.low %v150_v28, %v162_v29 }
 0x21f   :  { %5343 = vmatpush1.bf16.msra.mxu0 %v6233_v37  ;;  %v6762_v27 = vcombine.high %v893_v59, %v905_v23  ;;  %v6761_v32 = vcombine.low %v893_v59, %v905_v23  ;;  %v6404_v34 = vcombine.high %v534_v30, %v546_v45  ;;  %v174_v37 = vld [vmem:[#allocation6 + $0x100] sm:$0xff]  ;;  %v6403_v63 = vcombine.low %v534_v30, %v546_v45 }
 0x220   :  { %5344 = vmatprep.subr.bf16.mxu0 %v6258_v39  ;;  %v558_v39 = vld [vmem:[#allocation6 + $0xd00] sm:$0xff] }
 0x221   :  { %5384 = vmatpush1.bf16.msra.mxu1 %v6617_v38  ;;  %v186_v38 = vld [vmem:[#allocation6 + $0x160] sm:$0xff] }
 0x222   :  { %5385 = vmatprep.subr.bf16.mxu1 %v6642_v53  ;;  %v570_v53 = vld [vmem:[#allocation6 + $0xd60] sm:$0xff]  ;;  %v6044_v43 = vcombine.high %v174_v37, %v186_v38  ;;  %v6043_v51 = vcombine.low %v174_v37, %v186_v38 }
 0x223   :  { %5345 = vmatpush1.bf16.msra.mxu0 %v6257_v47  ;;  %v6428_v44 = vcombine.high %v558_v39, %v570_v53  ;;  %v198_v47 = vld [vmem:[#allocation6 + $0x1c0] sm:$0xff]  ;;  %v6427_v52 = vcombine.low %v558_v39, %v570_v53 }
 0x224   :  { %5346 = vmatprep.subr.bf16.mxu0 %v6282_v49  ;;  %v582_v49 = vld [vmem:[#allocation6 + $0xdc0] sm:$0xff] }
 0x225   :  { %5386 = vmatpush1.bf16.msra.mxu1 %v6641_v48  ;;  %v210_v48 = vld [vmem:[#allocation6 + $0x220] sm:$0xff] }
 0x226   :  { %5387 = vmatprep.subr.bf16.mxu1 %v6666_v50  ;;  %v594_v50 = vld [vmem:[#allocation6 + $0xe20] sm:$0xff]  ;;  %v6068_v55 = vcombine.high %v198_v47, %v210_v48  ;;  %v6067_v2 = vcombine.low %v198_v47, %v210_v48 }
 0x227   :  { %5347 = vmatpush1.bf16.msra.mxu0 %v6281_v35  ;;  %v6452_v57 = vcombine.high %v582_v49, %v594_v50  ;;  %v222_v35 = vld [vmem:[#allocation6 + $0x280] sm:$0xff]  ;;  %v6451_v3 = vcombine.low %v582_v49, %v594_v50 }
 0x228   :  { %5348 = vmatprep.subr.bf16.mxu0 %v6306_v61  ;;  %v606_v61 = vld [vmem:[#allocation6 + $0xe80] sm:$0xff] }
 0x229   :  { %5388 = vmatpush1.bf16.msra.mxu1 %v6665_v60  ;;  %v234_v60 = vld [vmem:[#allocation6 + $0x2e0] sm:$0xff] }
 0x22a   :  { %5389 = vmatprep.subr.bf16.mxu1 %v6690_v1  ;;  %v618_v1 = vld [vmem:[#allocation6 + $0xee0] sm:$0xff]  ;;  %v6092_v4 = vcombine.high %v222_v35, %v234_v60  ;;  %v6091_v10 = vcombine.low %v222_v35, %v234_v60 }
 0x22b   :  { %5349 = vmatpush1.bf16.msra.mxu0 %v6305_v6  ;;  %v6476_v5 = vcombine.high %v606_v61, %v618_v1  ;;  %v246_v6 = vld [vmem:[#allocation6 + $0x340] sm:$0xff]  ;;  %v6475_v11 = vcombine.low %v606_v61, %v618_v1 }
 0x22c   :  { %5350 = vmatprep.subr.bf16.mxu0 %v6330_v8  ;;  %v630_v8 = vld [vmem:[#allocation6 + $0xf40] sm:$0xff] }
 0x22d   :  { %5390 = vmatpush1.bf16.msra.mxu1 %v6689_v7  ;;  %v258_v7 = vld [vmem:[#allocation6 + $0x3a0] sm:$0xff] }
 0x22e   :  { %5391 = vmatprep.subr.bf16.mxu1 %v6714_v9  ;;  %v642_v9 = vld [vmem:[#allocation6 + $0xfa0] sm:$0xff]  ;;  %v6116_v12 = vcombine.high %v246_v6, %v258_v7  ;;  %v6115_v21 = vcombine.low %v246_v6, %v258_v7 }
 0x22f   :  { %5351 = vmatpush1.bf16.msra.mxu0 %v6329_v14  ;;  %v6500_v13 = vcombine.high %v630_v8, %v642_v9  ;;  %v270_v14 = vld [vmem:[#allocation6 + $0x400] sm:$0xff]  ;;  %v6499_v22 = vcombine.low %v630_v8, %v642_v9 }
 0x230   :  { %5352 = vmatprep.subr.bf16.mxu0 %v6354_v19  ;;  %v654_v19 = vld [vmem:[#allocation6 + $0x1000] sm:$0xff] }
 0x231   :  { %5392 = vmatpush1.bf16.msra.mxu1 %v6713_v16  ;;  %v282_v16 = vld [vmem:[#allocation6 + $0x460] sm:$0xff] }
 0x232   :  { %5393 = vmatprep.subr.bf16.mxu1 %v6738_v20  ;;  %v666_v20 = vld [vmem:[#allocation6 + $0x1060] sm:$0xff]  ;;  %v6140_v59 = vcombine.high %v270_v14, %v282_v16  ;;  %v6139_v29 = vcombine.low %v270_v14, %v282_v16 }
 0x233   :  { %5353 = vmatpush1.bf16.msra.mxu0 %v6353_v24  ;;  %v6524_v23 = vcombine.high %v654_v19, %v666_v20  ;;  %v294_v24 = vld [vmem:[#allocation6 + $0x4c0] sm:$0xff]  ;;  %v6523_v30 = vcombine.low %v654_v19, %v666_v20 }
 0x234   :  { %5354 = vmatprep.subr.bf16.mxu0 %v6378_v26  ;;  %v7059_v26 = vld [vmem:[#allocation8 + $0x8] sm:$0xff]  ;;  %v690_v28 = vld [vmem:[#allocation6 + $0x1120] sm:$0xff] }
 0x235   :  { %5394 = vmatpush1.bf16.msra.mxu1 %v6737_v25  ;;  %v306_v25 = vld [vmem:[#allocation6 + $0x520] sm:$0xff]  ;;  %v5854_v53 = vrot.slane %v7059_v26, %v7009_v46 }
 0x236   :  { %5395 = vmatprep.subr.bf16.mxu1 %v6762_v27  ;;  %v678_v27 = vld [vmem:[#allocation6 + $0x10c0] sm:$0xff]  ;;  %v6164_v45 = vcombine.high %v294_v24, %v306_v25  ;;  %v6163_v48 = vcombine.low %v294_v24, %v306_v25 }
 0x237   :  { %5355 = vmatpush1.bf16.msra.mxu0 %v6377_v31  ;;  %v330_v37 = vld [vmem:[#allocation6 + $0x5e0] sm:$0xff] }
 0x238   :  { %5406 = vmatprep.subr.bf16.mxu0 %v6020_v33  ;;  %v6548_v33 = vcombine.high %v678_v27, %v690_v28  ;;  %v342_v61 = vld [vmem:[#allocation6 + $0x640] sm:$0xff] }
 0x239   :  { %5396 = vmatpush1.bf16.msra.mxu1 %v6761_v32  ;;  %v5850_v32 = vrot.slane %v7059_v26, %v7004_v54  ;;  %v354_v1 = vld [vmem:[#allocation6 + $0x6a0] sm:$0xff] }
 0x23a   :  { %5447 = vmatprep.subr.bf16.mxu1 %v6404_v34  ;;  %5357 = vmatmul.mubr.bf16.vlgmr.msra.gmra.mrb[28].mxu0 %v6981_v40  ;;  %v318_v34 = vld [vmem:[#allocation6 + $0x580] sm:$0xff]  ;;  %v6212_v7 = vcombine.high %v342_v61, %v354_v1 }
 0x23b   :  { %5407 = vmatpush1.bf16.msra.mxu0 %v6019_v42  ;;  %5438 = vmatprep.mubr.bf16.mxu0 %v6971_v15  ;;  %v702_v42 = vld [vmem:[#allocation6 + $0x1180] sm:$0xff] }
 0x23c   :  { %5398 = vmatmul.mubr.bf16.vlgmr.msra.gmra.mrb[28].mxu1 %v6983_v62  ;;  %5408 = vmatprep.subr.bf16.mxu0 %v6044_v43  ;;  %v366_v9 = vld [vmem:[#allocation6 + $0x700] sm:$0xff] }
 0x23d   :  { %5448 = vmatpush1.bf16.msra.mxu1 %v6403_v63  ;;  %5479 = vmatprep.mubr.bf16.mxu1 %v6973_v18  ;;  %v714_v63 = vld [vmem:[#allocation6 + $0x11e0] sm:$0xff] }
 0x23e   :  { %5449 = vmatprep.subr.bf16.mxu1 %v6428_v44  ;;  %v6572_v60 = vcombine.high %v702_v42, %v714_v63  ;;  %v6571_v6 = vcombine.low %v702_v42, %v714_v63  ;;  %v390_v20 = vld [vmem:[#allocation6 + $0x7c0] sm:$0xff] }
 0x23f   :  { %5409 = vmatpush1.bf16.msra.mxu0 %v6043_v51 }
 0x240   :  { %5410 = vmatprep.subr.bf16.mxu0 %v6068_v55  ;;  %v6188_v55 = vcombine.high %v318_v34, %v330_v37 }
 0x241   :  { %5450 = vmatpush1.bf16.msra.mxu1 %v6427_v52  ;;  %v6547_v52 = vcombine.low %v678_v27, %v690_v28  ;;  %v414_v28 = vld [vmem:[#allocation6 + $0x880] sm:$0xff] }
 0x242   :  { %5451 = vmatprep.subr.bf16.mxu1 %v6452_v57 }
 0x243   :  { %5411 = vmatpush1.bf16.msra.mxu0 %v6067_v2 }
 0x244   :  { %5412 = vmatprep.subr.bf16.mxu0 %v6092_v4  ;;  %v738_v4 = vld [vmem:[#allocation6 + $0x12a0] sm:$0xff] }
 0x245   :  { %5452 = vmatpush1.bf16.msra.mxu1 %v6451_v3  ;;  %v726_v3 = vld [vmem:[#allocation6 + $0x1240] sm:$0xff] }
 0x246   :  { %5453 = vmatprep.subr.bf16.mxu1 %v6476_v5  ;;  %v6187_v5 = vcombine.low %v318_v34, %v330_v37  ;;  %v6596_v8 = vcombine.high %v726_v3, %v738_v4  ;;  %v6595_v14 = vcombine.low %v726_v3, %v738_v4  ;;  %v438_v37 = vld [vmem:[#allocation6 + $0x940] sm:$0xff] }
 0x247   :  { %5413 = vmatpush1.bf16.msra.mxu0 %v6091_v10  ;;  %v378_v10 = vld [vmem:[#allocation6 + $0x760] sm:$0xff] }
 0x248   :  { %5414 = vmatprep.subr.bf16.mxu0 %v6116_v12  ;;  %v762_v12 = vld [vmem:[#allocation6 + $0x1360] sm:$0xff]  ;;  %v6236_v16 = vcombine.high %v366_v9, %v378_v10 }
 0x249   :  { %5454 = vmatpush1.bf16.msra.mxu1 %v6475_v11  ;;  %v750_v11 = vld [vmem:[#allocation6 + $0x1300] sm:$0xff] }
 0x24a   :  { %5455 = vmatprep.subr.bf16.mxu1 %v6500_v13  ;;  %v6211_v13 = vcombine.low %v342_v61, %v354_v1  ;;  %v6620_v19 = vcombine.high %v750_v11, %v762_v12  ;;  %v6619_v24 = vcombine.low %v750_v11, %v762_v12  ;;  %v870_v61 = vld [vmem:[#allocation6 + $0x16c0] sm:$0xff] }
 0x24b   :  { %5415 = vmatpush1.bf16.msra.mxu0 %v6115_v21  ;;  %v402_v21 = vld [vmem:[#allocation6 + $0x820] sm:$0xff] }
 0x24c   :  { %5416 = vmatprep.subr.bf16.mxu0 %v6140_v59  ;;  %v786_v59 = vld [vmem:[#allocation6 + $0x1420] sm:$0xff]  ;;  %v6260_v25 = vcombine.high %v390_v20, %v402_v21 }
 0x24d   :  { %5456 = vmatpush1.bf16.msra.mxu1 %v6499_v22  ;;  %v5112_v31 = vpop.f32.mrb[16].mxu0  ;;  %v774_v22 = vld [vmem:[#allocation6 + $0x13c0] sm:$0xff] }
 0x24e   :  { %5457 = vmatprep.subr.bf16.mxu1 %v6524_v23  ;;  %v5114_v39 = vpop.f32.mrb[17].mxu0  ;;  %v6235_v23 = vcombine.low %v366_v9, %v378_v10  ;;  %v6644_v27 = vcombine.high %v774_v22, %v786_v59  ;;  %v882_v1 = vld [vmem:[#allocation6 + $0x1720] sm:$0xff] }
 0x24f   :  { %v5153_v38 = vpop.f32.mrb[16].mxu1  ;;  %v5116_v47 = vpop.f32.mrb[18].mxu0  ;;  %5417 = vmatpush1.bf16.msra.mxu0 %v6139_v29  ;;  %v426_v29 = vld [vmem:[#allocation6 + $0x8e0] sm:$0xff]  ;;  %v6739_v11 = vcombine.low %v870_v61, %v882_v1 }
 0x250   :  { %v5154_v43 = vadd.f32 %v5153_v38, %v5112_v31  ;;  %v5155_v44 = vpop.f32.mrb[17].mxu1  ;;  %v5117_v51 = vpop.f32.mrb[19].mxu0  ;;  %5418 = vmatprep.subr.bf16.mxu0 %v6164_v45  ;;  %v810_v45 = vld [vmem:[#allocation6 + $0x14e0] sm:$0xff]  ;;  %v6259_v31 = vcombine.low %v390_v20, %v402_v21  ;;  %v6283_v42 = vcombine.low %v414_v28, %v426_v29  ;;  %v547_v20 = vld [vmem:[#allocation6 + $0xca8] sm:$0xff] }
 0x251   :  { %v5156_v49 = vadd.f32 %v5155_v44, %v5114_v39  ;;  %v5157_v50 = vpop.f32.mrb[18].mxu1  ;;  %5458 = vmatpush1.bf16.msra.mxu1 %v6523_v30  ;;  %v798_v30 = vld [vmem:[#allocation6 + $0x1480] sm:$0xff] }
 0x252   :  { %v5943_v57 = vadd.f32 %v5850_v32, %v5154_v43  ;;  %v5158_v35 = vpop.f32.mrb[19].mxu1  ;;  %5459 = vmatprep.subr.bf16.mxu1 %v6548_v33  ;;  %v6643_v32 = vcombine.low %v774_v22, %v786_v59  ;;  %v6284_v33 = vcombine.high %v414_v28, %v426_v29  ;;  %v6668_v34 = vcombine.high %v798_v30, %v810_v45  ;;  %v450_v38 = vld [vmem:[#allocation6 + $0x9a0] sm:$0xff]  ;;  %v571_v28 = vld [vmem:[#allocation6 + $0xd68] sm:$0xff] }
 0x253   :  { %v5944_v2 = vadd.f32 %v5854_v53, %v5156_v49  ;;  %5419 = vmatpush1.bf16.msra.mxu0 %v6163_v48  ;;  %v822_v39 = vld [vmem:[#allocation6 + $0x1540] sm:$0xff]  ;;  %v6667_v63 = vcombine.low %v798_v30, %v810_v45  ;;  %v6308_v43 = vcombine.high %v438_v37, %v450_v38  ;;  %v6307_v51 = vcombine.low %v438_v37, %v450_v38  ;;  %v595_v37 = vld [vmem:[#allocation6 + $0xe28] sm:$0xff] }
 0x254   :  { %5967 = vst [vmem:[#allocation9 + $0x40] sm:$0xff] %v5943_v57  ;;  %5420 = vmatprep.subr.bf16.mxu0 %v6188_v55  ;;  %v834_v53 = vld [vmem:[#allocation6 + $0x15a0] sm:$0xff] }
 0x255   :  { %5968 = vst [vmem:[#allocation9 + $0x48] sm:$0xff] %v5944_v2  ;;  %5460 = vmatpush1.bf16.msra.mxu1 %v6547_v52  ;;  %v6692_v44 = vcombine.high %v822_v39, %v834_v53  ;;  %v462_v47 = vld [vmem:[#allocation6 + $0xa00] sm:$0xff]  ;;  %v6691_v52 = vcombine.low %v822_v39, %v834_v53 }
 0x256   :  { %5461 = vmatprep.subr.bf16.mxu1 %v6572_v60  ;;  %v474_v48 = vld [vmem:[#allocation6 + $0xa60] sm:$0xff] }
 0x257   :  { %5421 = vmatpush1.bf16.msra.mxu0 %v6187_v5  ;;  %v846_v49 = vld [vmem:[#allocation6 + $0x1600] sm:$0xff]  ;;  %v6332_v55 = vcombine.high %v462_v47, %v474_v48  ;;  %v6331_v2 = vcombine.low %v462_v47, %v474_v48  ;;  %v6740_v5 = vcombine.high %v870_v61, %v882_v1  ;;  %v619_v47 = vld [vmem:[#allocation6 + $0xee8] sm:$0xff] }
 0x258   :  { %5422 = vmatprep.subr.bf16.mxu0 %v6212_v7  ;;  %v858_v50 = vld [vmem:[#allocation6 + $0x1660] sm:$0xff] }
 0x259   :  { %5462 = vmatpush1.bf16.msra.mxu1 %v6571_v6  ;;  %v6716_v57 = vcombine.high %v846_v49, %v858_v50  ;;  %v486_v35 = vld [vmem:[#allocation6 + $0xac0] sm:$0xff]  ;;  %v6715_v3 = vcombine.low %v846_v49, %v858_v50 }
 0x25a   :  { %5463 = vmatprep.subr.bf16.mxu1 %v6596_v8  ;;  %v498_v60 = vld [vmem:[#allocation6 + $0xb20] sm:$0xff] }
 0x25b   :  { %5423 = vmatpush1.bf16.msra.mxu0 %v6211_v13  ;;  %v6356_v4 = vcombine.high %v486_v35, %v498_v60  ;;  %v510_v6 = vld [vmem:[#allocation6 + $0xb80] sm:$0xff]  ;;  %v6355_v10 = vcombine.low %v486_v35, %v498_v60  ;;  %v643_v35 = vld [vmem:[#allocation6 + $0xfa8] sm:$0xff] }
 0x25c   :  { %5424 = vmatprep.subr.bf16.mxu0 %v6236_v16  ;;  %v522_v7 = vld [vmem:[#allocation6 + $0xbe0] sm:$0xff]  ;;  %v163_v16 = vld [vmem:[#allocation6 + $0xa8] sm:$0xff] }
 0x25d   :  { %5464 = vmatpush1.bf16.msra.mxu1 %v6595_v14  ;;  %v894_v8 = vld [vmem:[#allocation6 + $0x1780] sm:$0xff]  ;;  %v6380_v12 = vcombine.high %v510_v6, %v522_v7  ;;  %v151_v14 = vld [vmem:[#allocation6 + $0x48] sm:$0xff]  ;;  %v6379_v21 = vcombine.low %v510_v6, %v522_v7 }
 0x25e   :  { %5465 = vmatprep.subr.bf16.mxu1 %v6620_v19  ;;  %v906_v9 = vld [vmem:[#allocation6 + $0x17e0] sm:$0xff]  ;;  %v535_v19 = vld [vmem:[#allocation6 + $0xc48] sm:$0xff]  ;;  %v6022_v59 = vcombine.high %v151_v14, %v163_v16  ;;  %v6021_v29 = vcombine.low %v151_v14, %v163_v16 }
 0x25f   :  { %5425 = vmatpush1.bf16.msra.mxu0 %v6235_v23  ;;  %v6764_v13 = vcombine.high %v894_v8, %v906_v9  ;;  %v6763_v22 = vcombine.low %v894_v8, %v906_v9  ;;  %v6406_v23 = vcombine.high %v535_v19, %v547_v20  ;;  %v6405_v30 = vcombine.low %v535_v19, %v547_v20  ;;  %v667_v6 = vld [vmem:[#allocation6 + $0x1068] sm:$0xff] }
 0x260   :  { %5426 = vmatprep.subr.bf16.mxu0 %v6260_v25  ;;  %v187_v25 = vld [vmem:[#allocation6 + $0x168] sm:$0xff] }
 0x261   :  { %5466 = vmatpush1.bf16.msra.mxu1 %v6619_v24  ;;  %v175_v24 = vld [vmem:[#allocation6 + $0x108] sm:$0xff] }
 0x262   :  { %5467 = vmatprep.subr.bf16.mxu1 %v6644_v27  ;;  %v559_v27 = vld [vmem:[#allocation6 + $0xd08] sm:$0xff]  ;;  %v6046_v45 = vcombine.high %v175_v24, %v187_v25  ;;  %v6045_v38 = vcombine.low %v175_v24, %v187_v25 }
 0x263   :  { %5427 = vmatpush1.bf16.msra.mxu0 %v6259_v31  ;;  %v6430_v31 = vcombine.high %v559_v27, %v571_v28  ;;  %v6429_v39 = vcombine.low %v559_v27, %v571_v28  ;;  %v691_v14 = vld [vmem:[#allocation6 + $0x1128] sm:$0xff]  ;;  %v5862_v28 = vrot.slane %v7059_v26, %v7023_v58 }
 0x264   :  { %5428 = vmatprep.subr.bf16.mxu0 %v6284_v33  ;;  %v211_v33 = vld [vmem:[#allocation6 + $0x228] sm:$0xff] }
 0x265   :  { %5468 = vmatpush1.bf16.msra.mxu1 %v6643_v32  ;;  %v199_v32 = vld [vmem:[#allocation6 + $0x1c8] sm:$0xff] }
 0x266   :  { %5469 = vmatprep.subr.bf16.mxu1 %v6668_v34  ;;  %v583_v34 = vld [vmem:[#allocation6 + $0xdc8] sm:$0xff]  ;;  %v6070_v53 = vcombine.high %v199_v32, %v211_v33  ;;  %v6069_v48 = vcombine.low %v199_v32, %v211_v33 }
 0x267   :  { %5429 = vmatpush1.bf16.msra.mxu0 %v6283_v42  ;;  %v6454_v42 = vcombine.high %v583_v34, %v595_v37  ;;  %v6453_v49 = vcombine.low %v583_v34, %v595_v37  ;;  %v331_v24 = vld [vmem:[#allocation6 + $0x5e8] sm:$0xff] }
 0x268   :  { %5430 = vmatprep.subr.bf16.mxu0 %v6308_v43  ;;  %v235_v43 = vld [vmem:[#allocation6 + $0x2e8] sm:$0xff] }
 0x269   :  { %5470 = vmatpush1.bf16.msra.mxu1 %v6667_v63  ;;  %v223_v63 = vld [vmem:[#allocation6 + $0x288] sm:$0xff] }
 0x26a   :  { %5471 = vmatprep.subr.bf16.mxu1 %v6692_v44  ;;  %v607_v44 = vld [vmem:[#allocation6 + $0xe88] sm:$0xff]  ;;  %v6094_v50 = vcombine.high %v223_v63, %v235_v43  ;;  %v6093_v60 = vcombine.low %v223_v63, %v235_v43 }
 0x26b   :  { %5431 = vmatpush1.bf16.msra.mxu0 %v6307_v51  ;;  %v6478_v51 = vcombine.high %v607_v44, %v619_v47  ;;  %v6477_v61 = vcombine.low %v607_v44, %v619_v47  ;;  %v343_v44 = vld [vmem:[#allocation6 + $0x648] sm:$0xff] }
 0x26c   :  { %5432 = vmatprep.subr.bf16.mxu0 %v6332_v55  ;;  %v259_v55 = vld [vmem:[#allocation6 + $0x3a8] sm:$0xff] }
 0x26d   :  { %5472 = vmatpush1.bf16.msra.mxu1 %v6691_v52  ;;  %v247_v52 = vld [vmem:[#allocation6 + $0x348] sm:$0xff] }
 0x26e   :  { %5473 = vmatprep.subr.bf16.mxu1 %v6716_v57  ;;  %v631_v57 = vld [vmem:[#allocation6 + $0xf48] sm:$0xff]  ;;  %v6118_v1 = vcombine.high %v247_v52, %v259_v55  ;;  %v6117_v7 = vcombine.low %v247_v52, %v259_v55 }
 0x26f   :  { %5433 = vmatpush1.bf16.msra.mxu0 %v6331_v2  ;;  %v6502_v2 = vcombine.high %v631_v57, %v643_v35  ;;  %v6501_v8 = vcombine.low %v631_v57, %v643_v35  ;;  %v355_v47 = vld [vmem:[#allocation6 + $0x6a8] sm:$0xff] }
 0x270   :  { %5434 = vmatprep.subr.bf16.mxu0 %v6356_v4  ;;  %v283_v4 = vld [vmem:[#allocation6 + $0x468] sm:$0xff]  ;;  %v6214_v55 = vcombine.high %v343_v44, %v355_v47 }
 0x271   :  { %5474 = vmatpush1.bf16.msra.mxu1 %v6715_v3  ;;  %v271_v3 = vld [vmem:[#allocation6 + $0x408] sm:$0xff] }
 0x272   :  { %5475 = vmatprep.subr.bf16.mxu1 %v6740_v5  ;;  %v655_v5 = vld [vmem:[#allocation6 + $0x1008] sm:$0xff]  ;;  %v6142_v9 = vcombine.high %v271_v3, %v283_v4  ;;  %v6141_v16 = vcombine.low %v271_v3, %v283_v4 }
 0x273   :  { %5435 = vmatpush1.bf16.msra.mxu0 %v6355_v10  ;;  %v6526_v10 = vcombine.high %v655_v5, %v667_v6  ;;  %v6525_v19 = vcombine.low %v655_v5, %v667_v6  ;;  %v367_v35 = vld [vmem:[#allocation6 + $0x708] sm:$0xff] }
 0x274   :  { %5436 = vmatprep.subr.bf16.mxu0 %v6380_v12  ;;  %v307_v12 = vld [vmem:[#allocation6 + $0x528] sm:$0xff] }
 0x275   :  { %5476 = vmatpush1.bf16.msra.mxu1 %v6739_v11  ;;  %v295_v11 = vld [vmem:[#allocation6 + $0x4c8] sm:$0xff] }
 0x276   :  { %5477 = vmatprep.subr.bf16.mxu1 %v6764_v13  ;;  %v679_v13 = vld [vmem:[#allocation6 + $0x10c8] sm:$0xff]  ;;  %v6166_v20 = vcombine.high %v295_v11, %v307_v12  ;;  %v6165_v33 = vcombine.low %v295_v11, %v307_v12 }
 0x277   :  { %5437 = vmatpush1.bf16.msra.mxu0 %v6379_v21  ;;  %v391_v6 = vld [vmem:[#allocation6 + $0x7c8] sm:$0xff] }
 0x278   :  { %5488 = vmatprep.subr.bf16.mxu0 %v6022_v59  ;;  %v6550_v59 = vcombine.high %v679_v13, %v691_v14 }
 0x279   :  { %5478 = vmatpush1.bf16.msra.mxu1 %v6763_v22  ;;  %v5858_v22 = vrot.slane %v7059_v26, %v7020_v17 }
 0x27a   :  { %5529 = vmatprep.subr.bf16.mxu1 %v6406_v23  ;;  %5439 = vmatmul.mubr.bf16.vlgmr.msra.gmra.mrb[32].mxu0 %v6981_v40  ;;  %v319_v23 = vld [vmem:[#allocation6 + $0x588] sm:$0xff] }
 0x27b   :  { %5489 = vmatpush1.bf16.msra.mxu0 %v6021_v29  ;;  %5520 = vmatprep.mubr.bf16.mxu0 %v6971_v15  ;;  %v703_v29 = vld [vmem:[#allocation6 + $0x1188] sm:$0xff] }
 0x27c   :  { %5480 = vmatmul.mubr.bf16.vlgmr.msra.gmra.mrb[32].mxu1 %v6983_v62  ;;  %5490 = vmatprep.subr.bf16.mxu0 %v6046_v45 }
 0x27d   :  { %5530 = vmatpush1.bf16.msra.mxu1 %v6405_v30  ;;  %5561 = vmatprep.mubr.bf16.mxu1 %v6973_v18  ;;  %v715_v30 = vld [vmem:[#allocation6 + $0x11e8] sm:$0xff] }
 0x27e   :  { %5531 = vmatprep.subr.bf16.mxu1 %v6430_v31  ;;  %v6574_v43 = vcombine.high %v703_v29, %v715_v30  ;;  %v6573_v52 = vcombine.low %v703_v29, %v715_v30 }
 0x27f   :  { %5491 = vmatpush1.bf16.msra.mxu0 %v6045_v38 }
 0x280   :  { %5492 = vmatprep.subr.bf16.mxu0 %v6070_v53  ;;  %v6190_v53 = vcombine.high %v319_v23, %v331_v24 }
 0x281   :  { %5532 = vmatpush1.bf16.msra.mxu1 %v6429_v39  ;;  %v6549_v39 = vcombine.low %v679_v13, %v691_v14  ;;  %v415_v14 = vld [vmem:[#allocation6 + $0x888] sm:$0xff] }
 0x282   :  { %5533 = vmatprep.subr.bf16.mxu1 %v6454_v42 }
 0x283   :  { %5493 = vmatpush1.bf16.msra.mxu0 %v6069_v48 }
 0x284   :  { %5494 = vmatprep.subr.bf16.mxu0 %v6094_v50  ;;  %v739_v50 = vld [vmem:[#allocation6 + $0x12a8] sm:$0xff] }
 0x285   :  { %5534 = vmatpush1.bf16.msra.mxu1 %v6453_v49  ;;  %v727_v49 = vld [vmem:[#allocation6 + $0x1248] sm:$0xff] }
 0x286   :  { %5535 = vmatprep.subr.bf16.mxu1 %v6478_v51  ;;  %v6189_v51 = vcombine.low %v319_v23, %v331_v24  ;;  %v6598_v57 = vcombine.high %v727_v49, %v739_v50  ;;  %v6597_v3 = vcombine.low %v727_v49, %v739_v50  ;;  %v439_v24 = vld [vmem:[#allocation6 + $0x948] sm:$0xff] }
 0x287   :  { %5495 = vmatpush1.bf16.msra.mxu0 %v6093_v60  ;;  %v379_v60 = vld [vmem:[#allocation6 + $0x768] sm:$0xff] }
 0x288   :  { %5496 = vmatprep.subr.bf16.mxu0 %v6118_v1  ;;  %v763_v1 = vld [vmem:[#allocation6 + $0x1368] sm:$0xff]  ;;  %v6238_v4 = vcombine.high %v367_v35, %v379_v60 }
 0x289   :  { %5536 = vmatpush1.bf16.msra.mxu1 %v6477_v61  ;;  %v751_v61 = vld [vmem:[#allocation6 + $0x1308] sm:$0xff] }
 0x28a   :  { %5537 = vmatprep.subr.bf16.mxu1 %v6502_v2  ;;  %v6213_v2 = vcombine.low %v343_v44, %v355_v47  ;;  %v6622_v5 = vcombine.high %v751_v61, %v763_v1  ;;  %v6621_v11 = vcombine.low %v751_v61, %v763_v1  ;;  %v871_v44 = vld [vmem:[#allocation6 + $0x16c8] sm:$0xff] }
 0x28b   :  { %5497 = vmatpush1.bf16.msra.mxu0 %v6117_v7  ;;  %v403_v7 = vld [vmem:[#allocation6 + $0x828] sm:$0xff] }
 0x28c   :  { %5498 = vmatprep.subr.bf16.mxu0 %v6142_v9  ;;  %v787_v9 = vld [vmem:[#allocation6 + $0x1428] sm:$0xff]  ;;  %v6262_v12 = vcombine.high %v391_v6, %v403_v7 }
 0x28d   :  { %5538 = vmatpush1.bf16.msra.mxu1 %v6501_v8  ;;  %v5194_v21 = vpop.f32.mrb[20].mxu0  ;;  %v775_v8 = vld [vmem:[#allocation6 + $0x13c8] sm:$0xff] }
 0x28e   :  { %5539 = vmatprep.subr.bf16.mxu1 %v6526_v10  ;;  %v5196_v27 = vpop.f32.mrb[21].mxu0  ;;  %v6237_v10 = vcombine.low %v367_v35, %v379_v60  ;;  %v6646_v13 = vcombine.high %v775_v8, %v787_v9  ;;  %v883_v47 = vld [vmem:[#allocation6 + $0x1728] sm:$0xff] }
 0x28f   :  { %v5235_v25 = vpop.f32.mrb[20].mxu1  ;;  %v5198_v32 = vpop.f32.mrb[22].mxu0  ;;  %5499 = vmatpush1.bf16.msra.mxu0 %v6141_v16  ;;  %v427_v16 = vld [vmem:[#allocation6 + $0x8e8] sm:$0xff]  ;;  %v6741_v61 = vcombine.low %v871_v44, %v883_v47 }
 0x290   :  { %v5236_v45 = vadd.f32 %v5235_v25, %v5194_v21  ;;  %v5237_v31 = vpop.f32.mrb[21].mxu1  ;;  %v5199_v38 = vpop.f32.mrb[23].mxu0  ;;  %5500 = vmatprep.subr.bf16.mxu0 %v6166_v20  ;;  %v811_v20 = vld [vmem:[#allocation6 + $0x14e8] sm:$0xff]  ;;  %v6261_v21 = vcombine.low %v391_v6, %v403_v7  ;;  %v6285_v29 = vcombine.low %v415_v14, %v427_v16  ;;  %v548_v6 = vld [vmem:[#allocation6 + $0xcb0] sm:$0xff] }
 0x291   :  { %v5238_v34 = vadd.f32 %v5237_v31, %v5196_v27  ;;  %v5239_v37 = vpop.f32.mrb[22].mxu1  ;;  %5540 = vmatpush1.bf16.msra.mxu1 %v6525_v19  ;;  %v799_v19 = vld [vmem:[#allocation6 + $0x1488] sm:$0xff] }
 0x292   :  { %v5945_v42 = vadd.f32 %v5858_v22, %v5236_v45  ;;  %v5240_v63 = vpop.f32.mrb[23].mxu1  ;;  %5541 = vmatprep.subr.bf16.mxu1 %v6550_v59  ;;  %v6645_v22 = vcombine.low %v775_v8, %v787_v9  ;;  %v6286_v59 = vcombine.high %v415_v14, %v427_v16  ;;  %v6670_v23 = vcombine.high %v799_v19, %v811_v20  ;;  %v451_v25 = vld [vmem:[#allocation6 + $0x9a8] sm:$0xff]  ;;  %v572_v14 = vld [vmem:[#allocation6 + $0xd70] sm:$0xff] }
 0x293   :  { %v5946_v48 = vadd.f32 %v5862_v28, %v5238_v34  ;;  %5501 = vmatpush1.bf16.msra.mxu0 %v6165_v33  ;;  %v823_v27 = vld [vmem:[#allocation6 + $0x1548] sm:$0xff]  ;;  %v6669_v30 = vcombine.low %v799_v19, %v811_v20  ;;  %v6310_v45 = vcombine.high %v439_v24, %v451_v25  ;;  %v6309_v38 = vcombine.low %v439_v24, %v451_v25  ;;  %v596_v24 = vld [vmem:[#allocation6 + $0xe30] sm:$0xff] }
 0x294   :  { %5969 = vst [vmem:[#allocation9 + $0x50] sm:$0xff] %v5945_v42  ;;  %5502 = vmatprep.subr.bf16.mxu0 %v6190_v53  ;;  %v835_v28 = vld [vmem:[#allocation6 + $0x15a8] sm:$0xff] }
 0x295   :  { %5970 = vst [vmem:[#allocation9 + $0x58] sm:$0xff] %v5946_v48  ;;  %5542 = vmatpush1.bf16.msra.mxu1 %v6549_v39  ;;  %v6694_v31 = vcombine.high %v823_v27, %v835_v28  ;;  %v463_v32 = vld [vmem:[#allocation6 + $0xa08] sm:$0xff]  ;;  %v6693_v39 = vcombine.low %v823_v27, %v835_v28 }
 0x296   :  { %5543 = vmatprep.subr.bf16.mxu1 %v6574_v43  ;;  %v475_v33 = vld [vmem:[#allocation6 + $0xa68] sm:$0xff] }
 0x297   :  { %5503 = vmatpush1.bf16.msra.mxu0 %v6189_v51  ;;  %v847_v34 = vld [vmem:[#allocation6 + $0x1608] sm:$0xff]  ;;  %v6334_v53 = vcombine.high %v463_v32, %v475_v33  ;;  %v6333_v48 = vcombine.low %v463_v32, %v475_v33  ;;  %v6742_v51 = vcombine.high %v871_v44, %v883_v47  ;;  %v620_v32 = vld [vmem:[#allocation6 + $0xef0] sm:$0xff] }
 0x298   :  { %5504 = vmatprep.subr.bf16.mxu0 %v6214_v55  ;;  %v859_v37 = vld [vmem:[#allocation6 + $0x1668] sm:$0xff] }
 0x299   :  { %5544 = vmatpush1.bf16.msra.mxu1 %v6573_v52  ;;  %v6718_v42 = vcombine.high %v847_v34, %v859_v37  ;;  %v487_v63 = vld [vmem:[#allocation6 + $0xac8] sm:$0xff]  ;;  %v6717_v49 = vcombine.low %v847_v34, %v859_v37 }
 0x29a   :  { %5545 = vmatprep.subr.bf16.mxu1 %v6598_v57  ;;  %v499_v43 = vld [vmem:[#allocation6 + $0xb28] sm:$0xff] }
 0x29b   :  { %5505 = vmatpush1.bf16.msra.mxu0 %v6213_v2  ;;  %v6358_v50 = vcombine.high %v487_v63, %v499_v43  ;;  %v511_v52 = vld [vmem:[#allocation6 + $0xb88] sm:$0xff]  ;;  %v6357_v60 = vcombine.low %v487_v63, %v499_v43  ;;  %v644_v63 = vld [vmem:[#allocation6 + $0xfb0] sm:$0xff] }
 0x29c   :  { %5506 = vmatprep.subr.bf16.mxu0 %v6238_v4  ;;  %v523_v55 = vld [vmem:[#allocation6 + $0xbe8] sm:$0xff]  ;;  %v164_v4 = vld [vmem:[#allocation6 + $0xb0] sm:$0xff] }
 0x29d   :  { %5546 = vmatpush1.bf16.msra.mxu1 %v6597_v3  ;;  %v895_v57 = vld [vmem:[#allocation6 + $0x1788] sm:$0xff]  ;;  %v6382_v1 = vcombine.high %v511_v52, %v523_v55  ;;  %v152_v3 = vld [vmem:[#allocation6 + $0x50] sm:$0xff]  ;;  %v6381_v7 = vcombine.low %v511_v52, %v523_v55 }
 0x29e   :  { %5547 = vmatprep.subr.bf16.mxu1 %v6622_v5  ;;  %v907_v35 = vld [vmem:[#allocation6 + $0x17e8] sm:$0xff]  ;;  %v536_v5 = vld [vmem:[#allocation6 + $0xc50] sm:$0xff]  ;;  %v6024_v9 = vcombine.high %v152_v3, %v164_v4  ;;  %v6023_v16 = vcombine.low %v152_v3, %v164_v4 }
 0x29f   :  { %5507 = vmatpush1.bf16.msra.mxu0 %v6237_v10  ;;  %v6766_v2 = vcombine.high %v895_v57, %v907_v35  ;;  %v6765_v8 = vcombine.low %v895_v57, %v907_v35  ;;  %v6408_v10 = vcombine.high %v536_v5, %v548_v6  ;;  %v6407_v19 = vcombine.low %v536_v5, %v548_v6  ;;  %v668_v52 = vld [vmem:[#allocation6 + $0x1070] sm:$0xff] }
 0x2a0   :  { %5508 = vmatprep.subr.bf16.mxu0 %v6262_v12  ;;  %v188_v12 = vld [vmem:[#allocation6 + $0x170] sm:$0xff] }
 0x2a1   :  { %5548 = vmatpush1.bf16.msra.mxu1 %v6621_v11  ;;  %v176_v11 = vld [vmem:[#allocation6 + $0x110] sm:$0xff] }
 0x2a2   :  { %5549 = vmatprep.subr.bf16.mxu1 %v6646_v13  ;;  %v560_v13 = vld [vmem:[#allocation6 + $0xd10] sm:$0xff]  ;;  %v6048_v20 = vcombine.high %v176_v11, %v188_v12  ;;  %v6047_v25 = vcombine.low %v176_v11, %v188_v12 }
 0x2a3   :  { %5509 = vmatpush1.bf16.msra.mxu0 %v6261_v21  ;;  %v6432_v21 = vcombine.high %v560_v13, %v572_v14  ;;  %v6431_v27 = vcombine.low %v560_v13, %v572_v14  ;;  %v692_v3 = vld [vmem:[#allocation6 + $0x1130] sm:$0xff]  ;;  %v5870_v14 = vrot.slane %v7059_v26, %v7037_v0 }
 0x2a4   :  { %5510 = vmatprep.subr.bf16.mxu0 %v6286_v59  ;;  %v212_v59 = vld [vmem:[#allocation6 + $0x230] sm:$0xff] }
 0x2a5   :  { %5550 = vmatpush1.bf16.msra.mxu1 %v6645_v22  ;;  %v200_v22 = vld [vmem:[#allocation6 + $0x1d0] sm:$0xff] }
 0x2a6   :  { %5551 = vmatprep.subr.bf16.mxu1 %v6670_v23  ;;  %v584_v23 = vld [vmem:[#allocation6 + $0xdd0] sm:$0xff]  ;;  %v6072_v28 = vcombine.high %v200_v22, %v212_v59  ;;  %v6071_v33 = vcombine.low %v200_v22, %v212_v59 }
 0x2a7   :  { %5511 = vmatpush1.bf16.msra.mxu0 %v6285_v29  ;;  %v6456_v29 = vcombine.high %v584_v23, %v596_v24  ;;  %v6455_v34 = vcombine.low %v584_v23, %v596_v24  ;;  %v332_v11 = vld [vmem:[#allocation6 + $0x5f0] sm:$0xff] }
 0x2a8   :  { %5512 = vmatprep.subr.bf16.mxu0 %v6310_v45  ;;  %v236_v45 = vld [vmem:[#allocation6 + $0x2f0] sm:$0xff] }
 0x2a9   :  { %5552 = vmatpush1.bf16.msra.mxu1 %v6669_v30  ;;  %v224_v30 = vld [vmem:[#allocation6 + $0x290] sm:$0xff] }
 0x2aa   :  { %5553 = vmatprep.subr.bf16.mxu1 %v6694_v31  ;;  %v608_v31 = vld [vmem:[#allocation6 + $0xe90] sm:$0xff]  ;;  %v6096_v37 = vcombine.high %v224_v30, %v236_v45  ;;  %v6095_v43 = vcombine.low %v224_v30, %v236_v45 }
 0x2ab   :  { %5513 = vmatpush1.bf16.msra.mxu0 %v6309_v38  ;;  %v6480_v38 = vcombine.high %v608_v31, %v620_v32  ;;  %v6479_v44 = vcombine.low %v608_v31, %v620_v32  ;;  %v344_v31 = vld [vmem:[#allocation6 + $0x650] sm:$0xff] }
 0x2ac   :  { %5514 = vmatprep.subr.bf16.mxu0 %v6334_v53  ;;  %v260_v53 = vld [vmem:[#allocation6 + $0x3b0] sm:$0xff] }
 0x2ad   :  { %5554 = vmatpush1.bf16.msra.mxu1 %v6693_v39  ;;  %v248_v39 = vld [vmem:[#allocation6 + $0x350] sm:$0xff] }
 0x2ae   :  { %5555 = vmatprep.subr.bf16.mxu1 %v6718_v42  ;;  %v632_v42 = vld [vmem:[#allocation6 + $0xf50] sm:$0xff]  ;;  %v6120_v47 = vcombine.high %v248_v39, %v260_v53  ;;  %v6119_v55 = vcombine.low %v248_v39, %v260_v53 }
 0x2af   :  { %5515 = vmatpush1.bf16.msra.mxu0 %v6333_v48  ;;  %v6504_v48 = vcombine.high %v632_v42, %v644_v63  ;;  %v6503_v57 = vcombine.low %v632_v42, %v644_v63  ;;  %v368_v42 = vld [vmem:[#allocation6 + $0x710] sm:$0xff] }
 0x2b0   :  { %5516 = vmatprep.subr.bf16.mxu0 %v6358_v50  ;;  %v284_v50 = vld [vmem:[#allocation6 + $0x470] sm:$0xff] }
 0x2b1   :  { %5556 = vmatpush1.bf16.msra.mxu1 %v6717_v49  ;;  %v272_v49 = vld [vmem:[#allocation6 + $0x410] sm:$0xff] }
 0x2b2   :  { %5557 = vmatprep.subr.bf16.mxu1 %v6742_v51  ;;  %v656_v51 = vld [vmem:[#allocation6 + $0x1010] sm:$0xff]  ;;  %v6144_v35 = vcombine.high %v272_v49, %v284_v50  ;;  %v6143_v4 = vcombine.low %v272_v49, %v284_v50 }
 0x2b3   :  { %5517 = vmatpush1.bf16.msra.mxu0 %v6357_v60  ;;  %v6528_v60 = vcombine.high %v656_v51, %v668_v52  ;;  %v6527_v5 = vcombine.low %v656_v51, %v668_v52  ;;  %v380_v63 = vld [vmem:[#allocation6 + $0x770] sm:$0xff] }
 0x2b4   :  { %5518 = vmatprep.subr.bf16.mxu0 %v6382_v1  ;;  %v308_v1 = vld [vmem:[#allocation6 + $0x530] sm:$0xff]  ;;  %v6240_v49 = vcombine.high %v368_v42, %v380_v63 }
 0x2b5   :  { %5558 = vmatpush1.bf16.msra.mxu1 %v6741_v61  ;;  %v296_v61 = vld [vmem:[#allocation6 + $0x4d0] sm:$0xff] }
 0x2b6   :  { %5559 = vmatprep.subr.bf16.mxu1 %v6766_v2  ;;  %v680_v2 = vld [vmem:[#allocation6 + $0x10d0] sm:$0xff]  ;;  %v6168_v6 = vcombine.high %v296_v61, %v308_v1  ;;  %v6167_v59 = vcombine.low %v296_v61, %v308_v1 }
 0x2b7   :  { %5519 = vmatpush1.bf16.msra.mxu0 %v6381_v7  ;;  %v392_v51 = vld [vmem:[#allocation6 + $0x7d0] sm:$0xff] }
 0x2b8   :  { %5570 = vmatprep.subr.bf16.mxu0 %v6024_v9  ;;  %v6552_v9 = vcombine.high %v680_v2, %v692_v3  ;;  %v404_v52 = vld [vmem:[#allocation6 + $0x830] sm:$0xff] }
 0x2b9   :  { %5560 = vmatpush1.bf16.msra.mxu1 %v6765_v8  ;;  %v5866_v8 = vrot.slane %v7059_v26, %v7034_v56  ;;  %v356_v26 = vld [vmem:[#allocation6 + $0x6b0] sm:$0xff]  ;;  %v6264_v61 = vcombine.high %v392_v51, %v404_v52 }
 0x2ba   :  { %5611 = vmatprep.subr.bf16.mxu1 %v6408_v10  ;;  %5521 = vmatmul.mubr.bf16.vlgmr.msra.gmra.mrb[36].mxu0 %v6981_v40  ;;  %v320_v10 = vld [vmem:[#allocation6 + $0x590] sm:$0xff]  ;;  %v6216_v39 = vcombine.high %v344_v31, %v356_v26 }
 0x2bb   :  { %5571 = vmatpush1.bf16.msra.mxu0 %v6023_v16  ;;  %5602 = vmatprep.mubr.bf16.mxu0 %v6971_v15  ;;  %v704_v16 = vld [vmem:[#allocation6 + $0x1190] sm:$0xff] }
 0x2bc   :  { %5562 = vmatmul.mubr.bf16.vlgmr.msra.gmra.mrb[36].mxu1 %v6983_v62  ;;  %5572 = vmatprep.subr.bf16.mxu0 %v6048_v20 }
 0x2bd   :  { %5612 = vmatpush1.bf16.msra.mxu1 %v6407_v19  ;;  %5643 = vmatprep.mubr.bf16.mxu1 %v6973_v18  ;;  %v716_v19 = vld [vmem:[#allocation6 + $0x11f0] sm:$0xff] }
 0x2be   :  { %5613 = vmatprep.subr.bf16.mxu1 %v6432_v21  ;;  %v6576_v45 = vcombine.high %v704_v16, %v716_v19 }
 0x2bf   :  { %5573 = vmatpush1.bf16.msra.mxu0 %v6047_v25 }
 0x2c0   :  { %5574 = vmatprep.subr.bf16.mxu0 %v6072_v28  ;;  %v6192_v28 = vcombine.high %v320_v10, %v332_v11 }
 0x2c1   :  { %5614 = vmatpush1.bf16.msra.mxu1 %v6431_v27  ;;  %v6551_v27 = vcombine.low %v680_v2, %v692_v3  ;;  %v416_v2 = vld [vmem:[#allocation6 + $0x890] sm:$0xff] }
 0x2c2   :  { %5615 = vmatprep.subr.bf16.mxu1 %v6456_v29  ;;  %v428_v3 = vld [vmem:[#allocation6 + $0x8f0] sm:$0xff] }
 0x2c3   :  { %5575 = vmatpush1.bf16.msra.mxu0 %v6071_v33  ;;  %v728_v33 = vld [vmem:[#allocation6 + $0x1250] sm:$0xff] }
 0x2c4   :  { %5576 = vmatprep.subr.bf16.mxu0 %v6096_v37  ;;  %v6191_v37 = vcombine.low %v320_v10, %v332_v11  ;;  %v440_v10 = vld [vmem:[#allocation6 + $0x950] sm:$0xff] }
 0x2c5   :  { %5616 = vmatpush1.bf16.msra.mxu1 %v6455_v34  ;;  %v740_v34 = vld [vmem:[#allocation6 + $0x12b0] sm:$0xff] }
 0x2c6   :  { %5617 = vmatprep.subr.bf16.mxu1 %v6480_v38  ;;  %v6575_v38 = vcombine.low %v704_v16, %v716_v19  ;;  %v6600_v53 = vcombine.high %v728_v33, %v740_v34  ;;  %v452_v11 = vld [vmem:[#allocation6 + $0x9b0] sm:$0xff] }
 0x2c7   :  { %5577 = vmatpush1.bf16.msra.mxu0 %v6095_v43  ;;  %v752_v43 = vld [vmem:[#allocation6 + $0x1310] sm:$0xff]  ;;  %v6312_v19 = vcombine.high %v440_v10, %v452_v11 }
 0x2c8   :  { %5578 = vmatprep.subr.bf16.mxu0 %v6120_v47  ;;  %v6215_v47 = vcombine.low %v344_v31, %v356_v26  ;;  %v884_v31 = vld [vmem:[#allocation6 + $0x1730] sm:$0xff] }
 0x2c9   :  { %5618 = vmatpush1.bf16.msra.mxu1 %v6479_v44  ;;  %v764_v44 = vld [vmem:[#allocation6 + $0x1370] sm:$0xff] }
 0x2ca   :  { %5619 = vmatprep.subr.bf16.mxu1 %v6504_v48  ;;  %v6599_v48 = vcombine.low %v728_v33, %v740_v34  ;;  %v6624_v50 = vcombine.high %v752_v43, %v764_v44 }
 0x2cb   :  { %5579 = vmatpush1.bf16.msra.mxu0 %v6119_v55  ;;  %v776_v55 = vld [vmem:[#allocation6 + $0x13d0] sm:$0xff] }
 0x2cc   :  { %5580 = vmatprep.subr.bf16.mxu0 %v6144_v35  ;;  %v6239_v35 = vcombine.low %v368_v42, %v380_v63 }
 0x2cd   :  { %5620 = vmatpush1.bf16.msra.mxu1 %v6503_v57  ;;  %v5276_v7 = vpop.f32.mrb[24].mxu0  ;;  %v788_v57 = vld [vmem:[#allocation6 + $0x1430] sm:$0xff] }
 0x2ce   :  { %5621 = vmatprep.subr.bf16.mxu1 %v6528_v60  ;;  %v5278_v13 = vpop.f32.mrb[25].mxu0  ;;  %v6623_v60 = vcombine.low %v752_v43, %v764_v44  ;;  %v6648_v1 = vcombine.high %v776_v55, %v788_v57 }
 0x2cf   :  { %v5317_v12 = vpop.f32.mrb[24].mxu1  ;;  %v5280_v22 = vpop.f32.mrb[26].mxu0  ;;  %5581 = vmatpush1.bf16.msra.mxu0 %v6143_v4  ;;  %v800_v4 = vld [vmem:[#allocation6 + $0x1490] sm:$0xff] }
 0x2d0   :  { %v5318_v20 = vadd.f32 %v5317_v12, %v5276_v7  ;;  %v5319_v21 = vpop.f32.mrb[25].mxu1  ;;  %v5281_v25 = vpop.f32.mrb[27].mxu0  ;;  %5582 = vmatprep.subr.bf16.mxu0 %v6168_v6  ;;  %v6263_v6 = vcombine.low %v392_v51, %v404_v52  ;;  %v6647_v7 = vcombine.low %v776_v55, %v788_v57  ;;  %v824_v12 = vld [vmem:[#allocation6 + $0x1550] sm:$0xff] }
 0x2d1   :  { %v5320_v23 = vadd.f32 %v5319_v21, %v5278_v13  ;;  %v5321_v24 = vpop.f32.mrb[26].mxu1  ;;  %5622 = vmatpush1.bf16.msra.mxu1 %v6527_v5  ;;  %v812_v5 = vld [vmem:[#allocation6 + $0x14f0] sm:$0xff] }
 0x2d2   :  { %v5947_v29 = vadd.f32 %v5866_v8, %v5318_v20  ;;  %v5322_v30 = vpop.f32.mrb[27].mxu1  ;;  %5623 = vmatprep.subr.bf16.mxu1 %v6552_v9  ;;  %v6288_v8 = vcombine.high %v416_v2, %v428_v3  ;;  %v6672_v9 = vcombine.high %v800_v4, %v812_v5  ;;  %v836_v13 = vld [vmem:[#allocation6 + $0x15b0] sm:$0xff]  ;;  %v6671_v16 = vcombine.low %v800_v4, %v812_v5 }
 0x2d3   :  { %v5948_v32 = vadd.f32 %v5870_v14, %v5320_v23  ;;  %5583 = vmatpush1.bf16.msra.mxu0 %v6167_v59  ;;  %v6287_v14 = vcombine.low %v416_v2, %v428_v3  ;;  %v6696_v20 = vcombine.high %v824_v12, %v836_v13  ;;  %v464_v21 = vld [vmem:[#allocation6 + $0xa10] sm:$0xff]  ;;  %v6311_v24 = vcombine.low %v440_v10, %v452_v11 }
 0x2d4   :  { %5971 = vst [vmem:[#allocation9 + $0x60] sm:$0xff] %v5947_v29  ;;  %5584 = vmatprep.subr.bf16.mxu0 %v6192_v28  ;;  %v476_v22 = vld [vmem:[#allocation6 + $0xa70] sm:$0xff]  ;;  %v6695_v25 = vcombine.low %v824_v12, %v836_v13 }
 0x2d5   :  { %5972 = vst [vmem:[#allocation9 + $0x68] sm:$0xff] %v5948_v32  ;;  %5624 = vmatpush1.bf16.msra.mxu1 %v6551_v27  ;;  %v848_v59 = vld [vmem:[#allocation6 + $0x1610] sm:$0xff]  ;;  %v6336_v27 = vcombine.high %v464_v21, %v476_v22  ;;  %v6335_v26 = vcombine.low %v464_v21, %v476_v22 }
 0x2d6   :  { %5625 = vmatprep.subr.bf16.mxu1 %v6576_v45  ;;  %v860_v23 = vld [vmem:[#allocation6 + $0x1670] sm:$0xff] }
 0x2d7   :  { %5585 = vmatpush1.bf16.msra.mxu0 %v6191_v37  ;;  %v6720_v28 = vcombine.high %v848_v59, %v860_v23  ;;  %v488_v29 = vld [vmem:[#allocation6 + $0xad0] sm:$0xff]  ;;  %v6719_v32 = vcombine.low %v848_v59, %v860_v23 }
 0x2d8   :  { %5586 = vmatprep.subr.bf16.mxu0 %v6216_v39  ;;  %v500_v30 = vld [vmem:[#allocation6 + $0xb30] sm:$0xff] }
 0x2d9   :  { %5626 = vmatpush1.bf16.msra.mxu1 %v6575_v38  ;;  %v872_v45 = vld [vmem:[#allocation6 + $0x16d0] sm:$0xff]  ;;  %v6360_v33 = vcombine.high %v488_v29, %v500_v30  ;;  %v6359_v42 = vcombine.low %v488_v29, %v500_v30 }
 0x2da   :  { %5627 = vmatprep.subr.bf16.mxu1 %v6600_v53  ;;  %v6744_v34 = vcombine.high %v872_v45, %v884_v31  ;;  %v512_v37 = vld [vmem:[#allocation6 + $0xb90] sm:$0xff]  ;;  %v6743_v63 = vcombine.low %v872_v45, %v884_v31  ;;  %v273_v45 = vld [vmem:[#allocation6 + $0x418] sm:$0xff] }
 0x2db   :  { %5587 = vmatpush1.bf16.msra.mxu0 %v6215_v47  ;;  %v524_v38 = vld [vmem:[#allocation6 + $0xbf0] sm:$0xff]  ;;  %v153_v47 = vld [vmem:[#allocation6 + $0x58] sm:$0xff] }
 0x2dc   :  { %5588 = vmatprep.subr.bf16.mxu0 %v6240_v49  ;;  %v896_v39 = vld [vmem:[#allocation6 + $0x1790] sm:$0xff]  ;;  %v6384_v43 = vcombine.high %v512_v37, %v524_v38  ;;  %v537_v49 = vld [vmem:[#allocation6 + $0xc58] sm:$0xff]  ;;  %v6383_v51 = vcombine.low %v512_v37, %v524_v38 }
 0x2dd   :  { %5628 = vmatpush1.bf16.msra.mxu1 %v6599_v48  ;;  %v908_v53 = vld [vmem:[#allocation6 + $0x17f0] sm:$0xff]  ;;  %v165_v48 = vld [vmem:[#allocation6 + $0xb8] sm:$0xff] }
 0x2de   :  { %5629 = vmatprep.subr.bf16.mxu1 %v6624_v50  ;;  %v6768_v44 = vcombine.high %v896_v39, %v908_v53  ;;  %v549_v50 = vld [vmem:[#allocation6 + $0xcb8] sm:$0xff]  ;;  %v6767_v52 = vcombine.low %v896_v39, %v908_v53  ;;  %v6026_v55 = vcombine.high %v153_v47, %v165_v48  ;;  %v6025_v2 = vcombine.low %v153_v47, %v165_v48 }
 0x2df   :  { %5589 = vmatpush1.bf16.msra.mxu0 %v6239_v35  ;;  %v6410_v57 = vcombine.high %v537_v49, %v549_v50  ;;  %v177_v35 = vld [vmem:[#allocation6 + $0x118] sm:$0xff]  ;;  %v6409_v3 = vcombine.low %v537_v49, %v549_v50  ;;  %v6794_v49 = vld [vmem:[#allocation8 + $0x8] sm:$0xff] }
 0x2e0   :  { %5590 = vmatprep.subr.bf16.mxu0 %v6264_v61  ;;  %v561_v61 = vld [vmem:[#allocation6 + $0xd18] sm:$0xff]  ;;  %v5874_v50 = vrot.slane %v6794_v49, %v7048_v36 }
 0x2e1   :  { %5630 = vmatpush1.bf16.msra.mxu1 %v6623_v60  ;;  %v189_v60 = vld [vmem:[#allocation6 + $0x178] sm:$0xff] }
 0x2e2   :  { %5631 = vmatprep.subr.bf16.mxu1 %v6648_v1  ;;  %v573_v1 = vld [vmem:[#allocation6 + $0xd78] sm:$0xff]  ;;  %v6050_v4 = vcombine.high %v177_v35, %v189_v60  ;;  %v6049_v10 = vcombine.low %v177_v35, %v189_v60  ;;  %v5878_v60 = vrot.slane %v6794_v49, %v7051_v41 }
 0x2e3   :  { %5591 = vmatpush1.bf16.msra.mxu0 %v6263_v6  ;;  %v6434_v5 = vcombine.high %v561_v61, %v573_v1  ;;  %v201_v6 = vld [vmem:[#allocation6 + $0x1d8] sm:$0xff]  ;;  %v6433_v11 = vcombine.low %v561_v61, %v573_v1 }
 0x2e4   :  { %5592 = vmatprep.subr.bf16.mxu0 %v6288_v8  ;;  %v585_v8 = vld [vmem:[#allocation6 + $0xdd8] sm:$0xff] }
 0x2e5   :  { %5632 = vmatpush1.bf16.msra.mxu1 %v6647_v7  ;;  %v213_v7 = vld [vmem:[#allocation6 + $0x238] sm:$0xff] }
 0x2e6   :  { %5633 = vmatprep.subr.bf16.mxu1 %v6672_v9  ;;  %v597_v9 = vld [vmem:[#allocation6 + $0xe38] sm:$0xff]  ;;  %v6074_v12 = vcombine.high %v201_v6, %v213_v7  ;;  %v6073_v21 = vcombine.low %v201_v6, %v213_v7 }
 0x2e7   :  { %5593 = vmatpush1.bf16.msra.mxu0 %v6287_v14  ;;  %v6458_v13 = vcombine.high %v585_v8, %v597_v9  ;;  %v225_v14 = vld [vmem:[#allocation6 + $0x298] sm:$0xff]  ;;  %v6457_v22 = vcombine.low %v585_v8, %v597_v9 }
 0x2e8   :  { %5594 = vmatprep.subr.bf16.mxu0 %v6312_v19  ;;  %v609_v19 = vld [vmem:[#allocation6 + $0xe98] sm:$0xff] }
 0x2e9   :  { %5634 = vmatpush1.bf16.msra.mxu1 %v6671_v16  ;;  %v237_v16 = vld [vmem:[#allocation6 + $0x2f8] sm:$0xff] }
 0x2ea   :  { %5635 = vmatprep.subr.bf16.mxu1 %v6696_v20  ;;  %v621_v20 = vld [vmem:[#allocation6 + $0xef8] sm:$0xff]  ;;  %v6098_v59 = vcombine.high %v225_v14, %v237_v16  ;;  %v6097_v29 = vcombine.low %v225_v14, %v237_v16 }
 0x2eb   :  { %5595 = vmatpush1.bf16.msra.mxu0 %v6311_v24  ;;  %v6482_v23 = vcombine.high %v609_v19, %v621_v20  ;;  %v249_v24 = vld [vmem:[#allocation6 + $0x358] sm:$0xff] }
 0x2ec   :  { %5596 = vmatprep.subr.bf16.mxu0 %v6336_v27  ;;  %v633_v27 = vld [vmem:[#allocation6 + $0xf58] sm:$0xff] }
 0x2ed   :  { %5636 = vmatpush1.bf16.msra.mxu1 %v6695_v25  ;;  %v261_v25 = vld [vmem:[#allocation6 + $0x3b8] sm:$0xff] }
 0x2ee   :  { %5637 = vmatprep.subr.bf16.mxu1 %v6720_v28  ;;  %v645_v28 = vld [vmem:[#allocation6 + $0xfb8] sm:$0xff]  ;;  %v6122_v30 = vcombine.high %v249_v24, %v261_v25 }
 0x2ef   :  { %5597 = vmatpush1.bf16.msra.mxu0 %v6335_v26  ;;  %v285_v31 = vld [vmem:[#allocation6 + $0x478] sm:$0xff] }
 0x2f0   :  { %5598 = vmatprep.subr.bf16.mxu0 %v6360_v33  ;;  %v657_v26 = vld [vmem:[#allocation6 + $0x1018] sm:$0xff]  ;;  %v6121_v33 = vcombine.low %v249_v24, %v261_v25  ;;  %v6146_v37 = vcombine.high %v273_v45, %v285_v31 }
 0x2f1   :  { %5638 = vmatpush1.bf16.msra.mxu1 %v6719_v32  ;;  %v669_v32 = vld [vmem:[#allocation6 + $0x1078] sm:$0xff] }
 0x2f2   :  { %5639 = vmatprep.subr.bf16.mxu1 %v6744_v34  ;;  %v6505_v34 = vcombine.low %v633_v27, %v645_v28  ;;  %v6530_v38 = vcombine.high %v657_v26, %v669_v32  ;;  %v297_v39 = vld [vmem:[#allocation6 + $0x4d8] sm:$0xff] }
 0x2f3   :  { %5599 = vmatpush1.bf16.msra.mxu0 %v6359_v42  ;;  %v309_v53 = vld [vmem:[#allocation6 + $0x538] sm:$0xff] }
 0x2f4   :  { %5600 = vmatprep.subr.bf16.mxu0 %v6384_v43  ;;  %v681_v42 = vld [vmem:[#allocation6 + $0x10d8] sm:$0xff]  ;;  %v6145_v43 = vcombine.low %v273_v45, %v285_v31  ;;  %v6170_v47 = vcombine.high %v297_v39, %v309_v53 }
 0x2f5   :  { %5640 = vmatpush1.bf16.msra.mxu1 %v6743_v63  ;;  %v693_v63 = vld [vmem:[#allocation6 + $0x1138] sm:$0xff] }
 0x2f6   :  { %5641 = vmatprep.subr.bf16.mxu1 %v6768_v44  ;;  %v6529_v44 = vcombine.low %v657_v26, %v669_v32  ;;  %v705_v61 = vld [vmem:[#allocation6 + $0x1198] sm:$0xff]  ;;  %v6553_v9 = vcombine.low %v681_v42, %v693_v63 }
 0x2f7   :  { %5601 = vmatpush1.bf16.msra.mxu0 %v6383_v51  ;;  %v6554_v51 = vcombine.high %v681_v42, %v693_v63  ;;  %v717_v1 = vld [vmem:[#allocation6 + $0x11f8] sm:$0xff] }
 0x2f8   :  { %5652 = vmatprep.subr.bf16.mxu0 %v6026_v55  ;;  %v333_v55 = vld [vmem:[#allocation6 + $0x5f8] sm:$0xff] }
 0x2f9   :  { %5642 = vmatpush1.bf16.msra.mxu1 %v6767_v52  ;;  %v321_v52 = vld [vmem:[#allocation6 + $0x598] sm:$0xff] }
 0x2fa   :  { %5693 = vmatprep.subr.bf16.mxu1 %v6410_v57  ;;  %5603 = vmatmul.mubr.bf16.vlgmr.msra.gmra.mrb[40].mxu0 %v6981_v40  ;;  %v345_v14 = vld [vmem:[#allocation6 + $0x658] sm:$0xff] }
 0x2fb   :  { %5653 = vmatpush1.bf16.msra.mxu0 %v6025_v2  ;;  %5684 = vmatprep.mubr.bf16.mxu0 %v6971_v15  ;;  %v6481_v15 = vcombine.low %v609_v19, %v621_v20  ;;  %v357_v16 = vld [vmem:[#allocation6 + $0x6b8] sm:$0xff] }
 0x2fc   :  { %5644 = vmatmul.mubr.bf16.vlgmr.msra.gmra.mrb[40].mxu1 %v6983_v62  ;;  %5654 = vmatprep.subr.bf16.mxu0 %v6050_v4  ;;  %v729_v20 = vld [vmem:[#allocation6 + $0x1258] sm:$0xff] }
 0x2fd   :  { %5694 = vmatpush1.bf16.msra.mxu1 %v6409_v3  ;;  %5725 = vmatprep.mubr.bf16.mxu1 %v6973_v18  ;;  %v6506_v18 = vcombine.high %v633_v27, %v645_v28  ;;  %v369_v25 = vld [vmem:[#allocation6 + $0x718] sm:$0xff] }
 0x2fe   :  { %5695 = vmatprep.subr.bf16.mxu1 %v6434_v5  ;;  %v6169_v5 = vcombine.low %v297_v39, %v309_v53  ;;  %v381_v27 = vld [vmem:[#allocation6 + $0x778] sm:$0xff] }
 0x2ff   :  { %5655 = vmatpush1.bf16.msra.mxu0 %v6049_v10  ;;  %v6194_v10 = vcombine.high %v321_v52, %v333_v55  ;;  %v753_v28 = vld [vmem:[#allocation6 + $0x1318] sm:$0xff] }
 0x300   :  { %5656 = vmatprep.subr.bf16.mxu0 %v6074_v12  ;;  %v393_v31 = vld [vmem:[#allocation6 + $0x7d8] sm:$0xff] }
 0x301   :  { %5696 = vmatpush1.bf16.msra.mxu1 %v6433_v11  ;;  %v405_v26 = vld [vmem:[#allocation6 + $0x838] sm:$0xff] }
 0x302   :  { %5697 = vmatprep.subr.bf16.mxu1 %v6458_v13  ;;  %v6578_v13 = vcombine.high %v705_v61, %v717_v1  ;;  %v777_v32 = vld [vmem:[#allocation6 + $0x13d8] sm:$0xff] }
 0x303   :  { %5657 = vmatpush1.bf16.msra.mxu0 %v6073_v21  ;;  %v741_v21 = vld [vmem:[#allocation6 + $0x12b8] sm:$0xff] }
 0x304   :  { %5658 = vmatprep.subr.bf16.mxu0 %v6098_v59  ;;  %v6577_v59 = vcombine.low %v705_v61, %v717_v1  ;;  %v6602_v24 = vcombine.high %v729_v20, %v741_v21  ;;  %v417_v53 = vld [vmem:[#allocation6 + $0x898] sm:$0xff] }
 0x305   :  { %5698 = vmatpush1.bf16.msra.mxu1 %v6457_v22  ;;  %v6193_v22 = vcombine.low %v321_v52, %v333_v55  ;;  %v429_v42 = vld [vmem:[#allocation6 + $0x8f8] sm:$0xff] }
 0x306   :  { %5699 = vmatprep.subr.bf16.mxu1 %v6482_v23  ;;  %v6218_v23 = vcombine.high %v345_v14, %v357_v16  ;;  %v801_v63 = vld [vmem:[#allocation6 + $0x1498] sm:$0xff] }
 0x307   :  { %5659 = vmatpush1.bf16.msra.mxu0 %v6097_v29  ;;  %v765_v29 = vld [vmem:[#allocation6 + $0x1378] sm:$0xff] }
 0x308   :  { %5660 = vmatprep.subr.bf16.mxu0 %v6122_v30  ;;  %v6601_v30 = vcombine.low %v729_v20, %v741_v21  ;;  %v6626_v45 = vcombine.high %v753_v28, %v765_v29  ;;  %v825_v52 = vld [vmem:[#allocation6 + $0x1558] sm:$0xff] }
 0x309   :  { %5700 = vmatpush1.bf16.msra.mxu1 %v6481_v15  ;;  %v6217_v15 = vcombine.low %v345_v14, %v357_v16  ;;  %v837_v55 = vld [vmem:[#allocation6 + $0x15b8] sm:$0xff] }
 0x30a   :  { %5701 = vmatprep.subr.bf16.mxu1 %v6506_v18  ;;  %v6242_v18 = vcombine.high %v369_v25, %v381_v27  ;;  %v6698_v61 = vcombine.high %v825_v52, %v837_v55  ;;  %v465_v1 = vld [vmem:[#allocation6 + $0xa18] sm:$0xff] }
 0x30b   :  { %5661 = vmatpush1.bf16.msra.mxu0 %v6121_v33  ;;  %v789_v33 = vld [vmem:[#allocation6 + $0x1438] sm:$0xff] }
 0x30c   :  { %5662 = vmatprep.subr.bf16.mxu0 %v6146_v37  ;;  %v6625_v37 = vcombine.low %v753_v28, %v765_v29  ;;  %v6650_v39 = vcombine.high %v777_v32, %v789_v33  ;;  %v513_v20 = vld [vmem:[#allocation6 + $0xb98] sm:$0xff] }
 0x30d   :  { %5702 = vmatpush1.bf16.msra.mxu1 %v6505_v34  ;;  %v5358_v48 = vpop.f32.mrb[28].mxu0  ;;  %v6241_v34 = vcombine.low %v369_v25, %v381_v27  ;;  %v525_v21 = vld [vmem:[#allocation6 + $0xbf8] sm:$0xff] }
 0x30e   :  { %5703 = vmatprep.subr.bf16.mxu1 %v6530_v38  ;;  %v5360_v35 = vpop.f32.mrb[29].mxu0  ;;  %v6266_v38 = vcombine.high %v393_v31, %v405_v26  ;;  %v6386_v25 = vcombine.high %v513_v20, %v525_v21  ;;  %v6385_v28 = vcombine.low %v513_v20, %v525_v21 }
 0x30f   :  { %v5399_v57 = vpop.f32.mrb[28].mxu1  ;;  %v5362_v4 = vpop.f32.mrb[30].mxu0  ;;  %5663 = vmatpush1.bf16.msra.mxu0 %v6145_v43  ;;  %v813_v43 = vld [vmem:[#allocation6 + $0x14f8] sm:$0xff] }
 0x310   :  { %v5400_v2 = vadd.f32 %v5399_v57, %v5358_v48  ;;  %v5401_v3 = vpop.f32.mrb[29].mxu1  ;;  %v5363_v8 = vpop.f32.mrb[31].mxu0  ;;  %5664 = vmatprep.subr.bf16.mxu0 %v6170_v47  ;;  %v6649_v47 = vcombine.low %v777_v32, %v789_v33  ;;  %v6290_v48 = vcombine.high %v417_v53, %v429_v42  ;;  %v6674_v49 = vcombine.high %v801_v63, %v813_v43  ;;  %v861_v4 = vld [vmem:[#allocation6 + $0x1678] sm:$0xff] }
 0x311   :  { %v5402_v6 = vadd.f32 %v5401_v3, %v5360_v35  ;;  %v5403_v7 = vpop.f32.mrb[30].mxu1  ;;  %5704 = vmatpush1.bf16.msra.mxu1 %v6529_v44  ;;  %v6265_v44 = vcombine.low %v393_v31, %v405_v26  ;;  %v6289_v57 = vcombine.low %v417_v53, %v429_v42  ;;  %v6673_v35 = vcombine.low %v801_v63, %v813_v43  ;;  %v849_v3 = vld [vmem:[#allocation6 + $0x1618] sm:$0xff] }
 0x312   :  { %v5949_v11 = vadd.f32 %v5874_v50, %v5400_v2  ;;  %v5404_v12 = vpop.f32.mrb[31].mxu1  ;;  %5705 = vmatprep.subr.bf16.mxu1 %v6554_v51  ;;  %v441_v50 = vld [vmem:[#allocation6 + $0x958] sm:$0xff]  ;;  %v6722_v8 = vcombine.high %v849_v3, %v861_v4  ;;  %v6721_v14 = vcombine.low %v849_v3, %v861_v4 }
 0x313   :  { %v5950_v19 = vadd.f32 %v5878_v60, %v5402_v6  ;;  %5665 = vmatpush1.bf16.msra.mxu0 %v6169_v5  ;;  %v453_v51 = vld [vmem:[#allocation6 + $0x9b8] sm:$0xff]  ;;  %v6697_v6 = vcombine.low %v825_v52, %v837_v55 }
 0x314   :  { %5973 = vst [vmem:[#allocation9 + $0x70] sm:$0xff] %v5949_v11  ;;  %5666 = vmatprep.subr.bf16.mxu0 %v6194_v10  ;;  %v6314_v60 = vcombine.high %v441_v50, %v453_v51  ;;  %v477_v2 = vld [vmem:[#allocation6 + $0xa78] sm:$0xff]  ;;  %v6313_v5 = vcombine.low %v441_v50, %v453_v51 }
 0x315   :  { %5974 = vst [vmem:[#allocation9 + $0x78] sm:$0xff] %v5950_v19  ;;  %5706 = vmatpush1.bf16.msra.mxu1 %v6553_v9  ;;  %v6338_v7 = vcombine.high %v465_v1, %v477_v2  ;;  %v489_v9 = vld [vmem:[#allocation6 + $0xad8] sm:$0xff] }
 0x316   :  { %5707 = vmatprep.subr.bf16.mxu1 %v6578_v13  ;;  %v501_v10 = vld [vmem:[#allocation6 + $0xb38] sm:$0xff]  ;;  %v6337_v13 = vcombine.low %v465_v1, %v477_v2 }
 0x317   :  { %5667 = vmatpush1.bf16.msra.mxu0 %v6193_v22  ;;  %v873_v11 = vld [vmem:[#allocation6 + $0x16d8] sm:$0xff]  ;;  %v6362_v16 = vcombine.high %v489_v9, %v501_v10 }
 0x318   :  { %5668 = vmatprep.subr.bf16.mxu0 %v6218_v23  ;;  %v885_v12 = vld [vmem:[#allocation6 + $0x1738] sm:$0xff]  ;;  %v6361_v23 = vcombine.low %v489_v9, %v501_v10 }
 0x319   :  { %5708 = vmatpush1.bf16.msra.mxu1 %v6577_v59  ;;  %v6746_v19 = vcombine.high %v873_v11, %v885_v12  ;;  %v897_v22 = vld [vmem:[#allocation6 + $0x1798] sm:$0xff] }
 0x31a   :  { %5709 = vmatprep.subr.bf16.mxu1 %v6602_v24  ;;  %v909_v59 = vld [vmem:[#allocation6 + $0x17f8] sm:$0xff]  ;;  %v6745_v24 = vcombine.low %v873_v11, %v885_v12 }
 0x31b   :  { %5669 = vmatpush1.bf16.msra.mxu0 %v6217_v15  ;;  %v6770_v27 = vcombine.high %v897_v22, %v909_v59  ;;  %v6769_v29 = vcombine.low %v897_v22, %v909_v59  ;;  %v7089_v15 = vld [vmem:[#allocation8 + $0x10] sm:$0xff] }
 0x31c   :  { %5670 = vmatprep.subr.bf16.mxu0 %v6242_v18  ;;  %v5882_v18 = vrot.slane %v7089_v15, %v7004_v54  ;;  %v5886_v26 = vrot.slane %v7089_v15, %v7009_v46  ;;  %v5890_v54 = vrot.slane %v7089_v15, %v7020_v17  ;;  %v5894_v46 = vrot.slane %v7089_v15, %v7023_v58 }
 0x31d   :  { %5710 = vmatpush1.bf16.msra.mxu1 %v6601_v30  ;;  %v5898_v17 = vrot.slane %v7089_v15, %v7034_v56  ;;  %v5902_v58 = vrot.slane %v7089_v15, %v7037_v0  ;;  %v5906_v56 = vrot.slane %v7089_v15, %v7048_v36  ;;  %v5910_v0 = vrot.slane %v7089_v15, %v7051_v41 }
 0x31e   :  { %5711 = vmatprep.subr.bf16.mxu1 %v6626_v45 }
 0x31f   :  { %5671 = vmatpush1.bf16.msra.mxu0 %v6241_v34 }
 0x320   :  { %5672 = vmatprep.subr.bf16.mxu0 %v6266_v38 }
 0x321   :  { %5712 = vmatpush1.bf16.msra.mxu1 %v6625_v37 }
 0x322   :  { %5713 = vmatprep.subr.bf16.mxu1 %v6650_v39 }
 0x323   :  { %5673 = vmatpush1.bf16.msra.mxu0 %v6265_v44 }
 0x324   :  { %5674 = vmatprep.subr.bf16.mxu0 %v6290_v48 }
 0x325   :  { %5714 = vmatpush1.bf16.msra.mxu1 %v6649_v47 }
 0x326   :  { %5715 = vmatprep.subr.bf16.mxu1 %v6674_v49 }
 0x327   :  { %5675 = vmatpush1.bf16.msra.mxu0 %v6289_v57 }
 0x328   :  { %5676 = vmatprep.subr.bf16.mxu0 %v6314_v60 }
 0x329   :  { %5716 = vmatpush1.bf16.msra.mxu1 %v6673_v35 }
 0x32a   :  { %5717 = vmatprep.subr.bf16.mxu1 %v6698_v61 }
 0x32b   :  { %5677 = vmatpush1.bf16.msra.mxu0 %v6313_v5 }
 0x32c   :  { %5678 = vmatprep.subr.bf16.mxu0 %v6338_v7 }
 0x32d   :  { %5718 = vmatpush1.bf16.msra.mxu1 %v6697_v6 }
 0x32e   :  { %5719 = vmatprep.subr.bf16.mxu1 %v6722_v8 }
 0x32f   :  { %5679 = vmatpush1.bf16.msra.mxu0 %v6337_v13 }
 0x330   :  { %5680 = vmatprep.subr.bf16.mxu0 %v6362_v16 }
 0x331   :  { %5720 = vmatpush1.bf16.msra.mxu1 %v6721_v14 }
 0x332   :  { %5721 = vmatprep.subr.bf16.mxu1 %v6746_v19 }
 0x333   :  { %5681 = vmatpush1.bf16.msra.mxu0 %v6361_v23 }
 0x334   :  { %5682 = vmatprep.subr.bf16.mxu0 %v6386_v25 }
 0x335   :  { %5722 = vmatpush1.bf16.msra.mxu1 %v6745_v24 }
 0x336   :  { %5723 = vmatprep.subr.bf16.mxu1 %v6770_v27 }
 0x337   :  { %5683 = vmatpush1.bf16.msra.mxu0 %v6385_v28 }
 0x339   :  { %5724 = vmatpush1.bf16.msra.mxu1 %v6769_v29 }
 0x33a   :  { %5685 = vmatmul.mubr.bf16.vlgmr.msra.gmra.mrb[44].mxu0 %v6981_v40 }
 0x33c   :  { %5726 = vmatmul.mubr.bf16.vlgmr.msra.gmra.mrb[44].mxu1 %v6983_v62 }
 0x34d   :  { %v5440_v30 = vpop.f32.mrb[32].mxu0 }
 0x34e   :  { %v5442_v31 = vpop.f32.mrb[33].mxu0 }
 0x34f   :  { %v5481_v45 = vpop.f32.mrb[32].mxu1  ;;  %v5444_v34 = vpop.f32.mrb[34].mxu0 }
 0x350   :  { %v5482_v32 = vadd.f32 %v5481_v45, %v5440_v30  ;;  %v5483_v33 = vpop.f32.mrb[33].mxu1  ;;  %v5445_v39 = vpop.f32.mrb[35].mxu0 }
 0x351   :  { %v5484_v37 = vadd.f32 %v5483_v33, %v5442_v31  ;;  %v5485_v38 = vpop.f32.mrb[34].mxu1 }
 0x352   :  { %v5951_v40 = vadd.f32 %v5882_v18, %v5482_v32  ;;  %v5486_v53 = vpop.f32.mrb[35].mxu1 }
 0x353   :  { %v5952_v62 = vadd.f32 %v5886_v26, %v5484_v37 }
 0x354   :  { %5975 = vst [vmem:[#allocation9 + $0x80] sm:$0xff] %v5951_v40 }
 0x355   :  { %5976 = vst [vmem:[#allocation9 + $0x88] sm:$0xff] %v5952_v62 }
 0x38d   :  { %v5522_v42 = vpop.f32.mrb[36].mxu0 }
 0x38e   :  { %v5524_v43 = vpop.f32.mrb[37].mxu0 }
 0x38f   :  { %v5563_v63 = vpop.f32.mrb[36].mxu1  ;;  %v5526_v48 = vpop.f32.mrb[38].mxu0 }
 0x390   :  { %v5564_v44 = vadd.f32 %v5563_v63, %v5522_v42  ;;  %v5565_v47 = vpop.f32.mrb[37].mxu1  ;;  %v5527_v51 = vpop.f32.mrb[39].mxu0 }
 0x391   :  { %v5566_v49 = vadd.f32 %v5565_v47, %v5524_v43  ;;  %v5567_v50 = vpop.f32.mrb[38].mxu1 }
 0x392   :  { %v5953_v52 = vadd.f32 %v5890_v54, %v5564_v44  ;;  %v5568_v55 = vpop.f32.mrb[39].mxu1 }
 0x393   :  { %v5954_v57 = vadd.f32 %v5894_v46, %v5566_v49 }
 0x394   :  { %5977 = vst [vmem:[#allocation9 + $0x90] sm:$0xff] %v5953_v52 }
 0x395   :  { %5978 = vst [vmem:[#allocation9 + $0x98] sm:$0xff] %v5954_v57 }
 0x3cd   :  { %v5604_v35 = vpop.f32.mrb[40].mxu0 }
 0x3ce   :  { %v5606_v61 = vpop.f32.mrb[41].mxu0 }
 0x3cf   :  { %v5645_v60 = vpop.f32.mrb[40].mxu1  ;;  %v5608_v3 = vpop.f32.mrb[42].mxu0 }
 0x3d0   :  { %v5646_v1 = vadd.f32 %v5645_v60, %v5604_v35  ;;  %v5647_v2 = vpop.f32.mrb[41].mxu1  ;;  %v5609_v6 = vpop.f32.mrb[43].mxu0 }
 0x3d1   :  { %v5648_v4 = vadd.f32 %v5647_v2, %v5606_v61  ;;  %v5649_v5 = vpop.f32.mrb[42].mxu1 }
 0x3d2   :  { %v5955_v7 = vadd.f32 %v5898_v17, %v5646_v1  ;;  %v5650_v8 = vpop.f32.mrb[43].mxu1 }
 0x3d3   :  { %v5956_v9 = vadd.f32 %v5902_v58, %v5648_v4 }
 0x3d4   :  { %5979 = vst [vmem:[#allocation9 + $0xa0] sm:$0xff] %v5955_v7 }
 0x3d5   :  { %5980 = vst [vmem:[#allocation9 + $0xa8] sm:$0xff] %v5956_v9 }
 0x40d   :  { %v5686_v10 = vpop.f32.mrb[44].mxu0 }
 0x40e   :  { %v5688_v12 = vpop.f32.mrb[45].mxu0 }
 0x40f   :  { %v5727_v11 = vpop.f32.mrb[44].mxu1  ;;  %v5690_v16 = vpop.f32.mrb[46].mxu0 }
 0x410   :  { %v5728_v13 = vadd.f32 %v5727_v11, %v5686_v10  ;;  %v5729_v14 = vpop.f32.mrb[45].mxu1  ;;  %v5691_v21 = vpop.f32.mrb[47].mxu0 }
 0x411   :  { %v5730_v19 = vadd.f32 %v5729_v14, %v5688_v12  ;;  %v5731_v20 = vpop.f32.mrb[46].mxu1 }
 0x412   :  { %v5957_v22 = vadd.f32 %v5906_v56, %v5728_v13  ;;  %v5732_v59 = vpop.f32.mrb[47].mxu1 }
 0x413   :  { %v5958_v23 = vadd.f32 %v5910_v0, %v5730_v19 }
 0x414   :  { %5981 = vst [vmem:[#allocation9 + $0xb0] sm:$0xff] %v5957_v22 }
 0x415   :  { %5982 = vst [vmem:[#allocation9 + $0xb8] sm:$0xff] %v5958_v23 }
 0x416   :  { %6872 = shalt.err (!%p6869_p0)
}
 0x417   :  { %s6873_s25 = scalar_lea.hbm %s7122_s3, 3072 }
 0x418   :  { %p6874_p1 = scmp.ne.s32.totalorder %s7122_s3, %s6873_s25  ;;  %p6877_p2 = scmp.lt.u32.totalorder %s6873_s25, %s7122_s3 }
 0x41a   :  { %p6879_p3 = pnand %p6877_p2, %p6874_p1 }
 0x41c   :  { %6882 = shalt.err (!%p6879_p3)
}
 0x41d   :  { %5992 = dma.vmem_to_hbm [thread:$0]  %s5990_s21, 3072, %s7122_s3, [#allocation5]  }
 0x41e   :  { %6887 = dma.done.wait [#allocation5], 3072  }
 0x41f   :  { %6888 = vsyncadd [#allocation5], 4294964224 }
 0x420   :  { %5996 = vsyncpa [#allocation4], 1 }
 0x421   :  { %5997 = vsyncpa [#allocation7], 1 }
 0x422   :  { %5998 = vsyncpa [#allocation5], 1 }

</bundles_post_ra>
